<compile_context>
chip_gen: v7x
topology: tpu7x:2x2x1
jax: 0.10.0
libtpu: 0.0.40
codegen_flags: <defaults>
</compile_context>

<pallas_src>
import functools

import numpy as np
import jax
import jax.numpy as jnp
from jax import lax
from jax.experimental import pallas as pl
from jax.experimental.pallas import tpu as pltpu

NEG_SLOPE = 0.01  # nn.LeakyReLU default negative_slope


# --------------------------------------------------------------------------- #
# Parameter init (torch-layout, mirrors the PyTorch module)                    #
# --------------------------------------------------------------------------- #
def init_params(key, input_channels=3, image_size=32, latent_dim=10,
                hidden_dims=(8, 16, 32), fc_hidden_dims=(256, 128)):
    state = {"key": key}

    def nxt():
        state["key"], sub = jax.random.split(state["key"])
        return sub

    def lin(i, o):
        return (0.05 * jax.random.normal(nxt(), (i, o), jnp.float32),
                0.05 * jax.random.normal(nxt(), (o,), jnp.float32))

    params = {}
    enc_conv, c = [], input_channels
    for h in hidden_dims:
        enc_conv.append((0.05 * jax.random.normal(nxt(), (h, c, 4, 4), jnp.float32),
                         0.05 * jax.random.normal(nxt(), (h,), jnp.float32)))
        c = h
    params["enc_conv"] = enc_conv
    conv_out = c * 4 * 4

    enc_fc, f = [], conv_out
    for h in fc_hidden_dims:
        enc_fc.append(lin(f, h))
        f = h
    params["enc_fc"] = enc_fc
    params["mu"] = lin(f, latent_dim)
    params["var"] = lin(f, latent_dim)

    # TODO(synk): self.decoder_input = nn.Linear(latent_dim, hidden_dims[-1]) exists
    # in the PyTorch __init__ but is never used in forward(); intentionally omitted.

    dec_fc, f = [], latent_dim
    for h in fc_hidden_dims[::-1]:
        dec_fc.append(lin(f, h))
        f = h
    params["dec_fc"] = dec_fc
    params["dec_fc_out"] = lin(f, conv_out)

    dec_conv, c = [], hidden_dims[-1]
    for h in list(hidden_dims[::-1][1:]) + [input_channels]:
        dec_conv.append((0.05 * jax.random.normal(nxt(), (c, h, 4, 4), jnp.float32),
                         0.05 * jax.random.normal(nxt(), (h,), jnp.float32)))
        c = h
    params["dec_conv"] = dec_conv
    return params


# --------------------------------------------------------------------------- #
# One-time weight-layout preparation (hoisted out of the traced forward)       #
# --------------------------------------------------------------------------- #
def _conv_as_matmuls(w_oihw, bias, H, W, B):
    """Conv2d(k=4, s=2, p=1) as  out2 = sum_kh (Sel_kh @ X2) @ M_kh + bias2.

    X2/out2 layout: rows = h*B + b, cols = w*C + c (lane-dense)."""
    w = np.asarray(w_oihw)                       # (Cout, Cin, 4, 4)
    Cout, Cin, K, _ = w.shape
    Ho, Wo = H // 2, W // 2
    sel = np.zeros((K, Ho * B, H * B), np.float32)
    for kh in range(K):
        for ho in range(Ho):
            h = 2 * ho + kh - 1
            if 0 <= h < H:
                for bb in range(B):
                    sel[kh, ho * B + bb, h * B + bb] = 1.0
    m = np.zeros((K, W * Cin, Wo * Cout), np.float32)
    for kh in range(K):
        for wo in range(Wo):
            for kw in range(K):
                wi = 2 * wo + kw - 1
                if 0 <= wi < W:
                    m[kh, wi * Cin:(wi + 1) * Cin,
                      wo * Cout:(wo + 1) * Cout] = w[:, :, kh, kw].T
    bias2 = np.tile(np.asarray(bias), Wo)[None, :]
    return (sel.reshape(K * Ho * B, H * B),
            m.reshape(K * W * Cin, Wo * Cout), bias2)


def _convT_as_matmuls(w_iohw, bias, H, W, B):
    """ConvTranspose2d(k=4, s=2, p=1) as out2 = sum_kh (Scat_kh @ X2) @ N_kh + bias2."""
    w = np.asarray(w_iohw)                       # (Cin, Cout, 4, 4)
    Cin, Cout, K, _ = w.shape
    Hout, Wout = 2 * H, 2 * W
    scat = np.zeros((K, Hout * B, H * B), np.float32)
    for kh in range(K):
        for iy in range(H):
            y = 2 * iy - 1 + kh
            if 0 <= y < Hout:
                for bb in range(B):
                    scat[kh, y * B + bb, iy * B + bb] = 1.0
    n = np.zeros((K, W * Cin, Wout * Cout), np.float32)
    for kh in range(K):
        for ix in range(W):
            for kw in range(K):
                xo = 2 * ix - 1 + kw
                if 0 <= xo < Wout:
                    n[kh, ix * Cin:(ix + 1) * Cin,
                      xo * Cout:(xo + 1) * Cout] = w[:, :, kh, kw]
    bias2 = np.tile(np.asarray(bias), Wout)[None, :]
    return (scat.reshape(K * Hout * B, H * B),
            n.reshape(K * W * Cin, Wout * Cout), bias2)


def prepare_params(params, *, batch, image_size=32, latent_dim=10,
                   compute_dtype=jnp.bfloat16):
    """All layout/packing work done once; the traced forward only moves data.

    compute_dtype=jnp.bfloat16 -> bf16 operands / f32 accumulation (fast path).
    compute_dtype=jnp.float32  -> full f32 for strict parity with PyTorch."""
    B = batch
    cdt = compute_dtype

    enc, H = [], image_size
    for (w, b) in params["enc_conv"]:
        sel, m, b2 = _conv_as_matmuls(w, b, H, H, B)
        enc.append((jnp.asarray(sel, cdt), jnp.asarray(m, cdt),
                    jnp.asarray(b2, jnp.float32)))
        H //= 2
    s_bot = H
    c_bot = params["enc_conv"][-1][0].shape[0]
    feat = c_bot * s_bot * s_bot

    # encoder FC stack; NCHW-flatten permutation folded into the first weight
    fc = []
    w1, b1 = params["enc_fc"][0]
    w1p = np.asarray(w1).reshape(c_bot, s_bot, s_bot, -1)
    w1p = w1p.transpose(1, 2, 0, 3).reshape(feat, -1)          # rows -> (h, w, c)
    fc.append((jnp.asarray(w1p, cdt),
               jnp.asarray(b1, jnp.float32).reshape(1, -1)))
    for (w, b) in params["enc_fc"][1:]:
        fc.append((jnp.asarray(w, cdt),
                   jnp.asarray(b, jnp.float32).reshape(1, -1)))

    # mu | var packed into a single lane-aligned block (var starts at lane 128)
    var_off = 128
    wmu, bmu = params["mu"]
    wvar, bvar = params["var"]
    f_in = wmu.shape[0]
    wmv = np.zeros((f_in, var_off + 128), np.float32)
    wmv[:, :latent_dim] = np.asarray(wmu)
    wmv[:, var_off:var_off + latent_dim] = np.asarray(wvar)
    bmv = np.zeros((1, var_off + 128), np.float32)
    bmv[0, :latent_dim] = np.asarray(bmu)
    bmv[0, var_off:var_off + latent_dim] = np.asarray(bvar)
    fc.append((jnp.asarray(wmv, cdt), jnp.asarray(bmv, jnp.float32)))

    # decoder FC stack; decoder_fc_output columns permuted so its output is
    # already in the 2-D conv layout (cols ordered (h, w, c))
    for (w, b) in params["dec_fc"]:
        fc.append((jnp.asarray(w, cdt),
                   jnp.asarray(b, jnp.float32).reshape(1, -1)))
    wdo, bdo = params["dec_fc_out"]
    wdop = np.asarray(wdo).reshape(-1, c_bot, s_bot, s_bot)
    wdop = wdop.transpose(0, 2, 3, 1).reshape(-1, feat)
    bdop = (np.asarray(bdo).reshape(c_bot, s_bot, s_bot)
            .transpose(1, 2, 0).reshape(1, feat))
    fc.append((jnp.asarray(wdop, cdt), jnp.asarray(bdop, jnp.float32)))

    dec, H = [], s_bot
    for (w, b) in params["dec_conv"]:
        scat, nmat, b2 = _convT_as_matmuls(w, b, H, H, B)
        dec.append((jnp.asarray(scat, cdt), jnp.asarray(nmat, cdt),
                    jnp.asarray(b2, jnp.float32)))
        H *= 2

    return {
        "B": B, "image_size": image_size, "latent_dim": latent_dim,
        "compute_dtype": cdt, "s_bot": s_bot, "c_bot": c_bot, "feat": feat,
        "var_off": var_off, "n_enc_fc": len(params["enc_fc"]),
        "n_dec_fc": len(params["dec_fc"]),
        "out_channels": params["dec_conv"][-1][0].shape[1],
        "enc_conv": enc, "fc": fc, "dec_conv": dec,
    }


# --------------------------------------------------------------------------- #
# The single fused Pallas kernel                                               #
# --------------------------------------------------------------------------- #
def _vae_fused_kernel(*refs, n_enc, n_dec, n_enc_fc, n_dec_fc,
                      enc_rk, dec_rk, s_bot, col_block,
                      latent_dim, var_off, slope):
    n_fc = 2 * (n_enc_fc + n_dec_fc + 2)
    n_in = 2 + 3 * n_enc + n_fc + 3 * n_dec
    x_ref, eps_ref = refs[0], refs[1]
    enc_refs = refs[2:2 + 3 * n_enc]
    fc_refs = refs[2 + 3 * n_enc:2 + 3 * n_enc + n_fc]
    dec_refs = refs[2 + 3 * n_enc + n_fc:n_in]
    muvar_ref, recon_ref, dscr_ref = refs[n_in], refs[n_in + 1], refs[n_in + 2]

    cdt = x_ref.dtype
    nb = eps_ref.shape[0]                       # batch

    def leaky(v):
        return jnp.where(v >= 0, v, slope * v)

    def sigmoid(v):                             # exact (review correctness note)
        return 1.0 / (1.0 + jnp.exp(-v))

    def ident(v):
        return v

    def dense(v, w_ref, b_ref, act):
        out = jnp.dot(v.astype(cdt), w_ref[...],
                      preferred_element_type=jnp.float32) + b_ref[...]
        return act(out)

    def conv_block(v, sel_ref, m_ref, b_ref, r_out, k_in, act):
        # out2 = sum over the 4 kh taps of (Sel_kh @ X2) @ M_kh + bias2
        sel = sel_ref[...]                      # (4*r_out, r_in)
        m = m_ref[...]                          # (4*k_in,  n_out)
        acc = None
        for t in range(4):
            rows = jnp.dot(sel[t * r_out:(t + 1) * r_out, :], v,
                           preferred_element_type=jnp.float32)
            term = jnp.dot(rows.astype(cdt), m[t * k_in:(t + 1) * k_in, :],
                           preferred_element_type=jnp.float32)
            acc = term if acc is None else acc + term
        return act(acc + b_ref[...])

    # ---- encoder conv stack (rows = h*B+b, cols = w*C+c, all VMEM-resident) ----
    x = x_ref[...]
    for l in range(n_enc):
        r_out, k_in = enc_rk[l]
        x = conv_block(x, enc_refs[3 * l], enc_refs[3 * l + 1],
                       enc_refs[3 * l + 2], r_out, k_in, leaky).astype(cdt)

    # ---- encoder FC stack ------------------------------------------------------
    # First FC consumes the conv layout directly: the NCHW-flatten permutation is
    # folded into w1's rows, split into s_bot row blocks (one per spatial row h).
    w1 = fc_refs[0][...]
    acc = None
    for h in range(s_bot):
        part = jnp.dot(x[h * nb:(h + 1) * nb, :],
                       w1[h * col_block:(h + 1) * col_block, :],
                       preferred_element_type=jnp.float32)
        acc = part if acc is None else acc + part
    a = leaky(acc + fc_refs[1][...])
    k = 2
    for _ in range(n_enc_fc - 1):
        a = dense(a, fc_refs[k], fc_refs[k + 1], leaky)
        k += 2

    # ---- mu | log_var as one lane-dense packed block ---------------------------
    mv = dense(a, fc_refs[k], fc_refs[k + 1], ident)
    k += 2
    muvar_ref[...] = mv.astype(muvar_ref.dtype)
    mu = mv[:, :latent_dim]
    log_var = mv[:, var_off:var_off + latent_dim]

    # ---- reparameterize (f32) --------------------------------------------------
    z = eps_ref[...].astype(jnp.float32) * jnp.exp(0.5 * log_var) + mu

    # ---- decoder FC stack ------------------------------------------------------
    d = z
    for _ in range(n_dec_fc):
        d = dense(d, fc_refs[k], fc_refs[k + 1], leaky)
        k += 2
    d = dense(d, fc_refs[k], fc_refs[k + 1], ident)      # (B, feat), cols (h,w,c)

    # (B, feat) -> conv layout (s_bot*B, col_block) via the VMEM scratch
    for i in range(s_bot):
        dscr_ref[i * nb:(i + 1) * nb, :] = (
            d[:, i * col_block:(i + 1) * col_block].astype(dscr_ref.dtype))
    d = dscr_ref[...]

    # ---- decoder conv-transpose stack (sub-pixel scatter folded into Scat/N) ---
    for l in range(n_dec):
        r_out, k_in = dec_rk[l]
        last = l == n_dec - 1
        d = conv_block(d, dec_refs[3 * l], dec_refs[3 * l + 1],
                       dec_refs[3 * l + 2], r_out, k_in,
                       sigmoid if last else leaky)
        if not last:
            d = d.astype(cdt)

    recon_ref[...] = d.astype(recon_ref.dtype)


# --------------------------------------------------------------------------- #
# Forward wrapper (one pallas_call; only module-boundary layout in XLA)        #
# --------------------------------------------------------------------------- #
def diag_conv_vae_forward(prep, x_nchw, eps):
    """Returns (recon, input, mu, log_var) matching DiagConvVAE.forward."""
    B = prep["B"]
    S = prep["image_size"]
    latent_dim = prep["latent_dim"]
    cdt = prep["compute_dtype"]
    s_bot = prep["s_bot"]
    var_off = prep["var_off"]
    out_c = prep["out_channels"]
    col_block = prep["feat"] // s_bot
    assert x_nchw.shape[0] == B and eps.shape == (B, latent_dim)

    cin = x_nchw.shape[1]
    # Module-boundary layout only: NCHW -> 2-D (rows = h*B+b, cols = w*C+c).
    x2 = jnp.transpose(x_nchw, (2, 0, 3, 1)).reshape(S * B, S * cin).astype(cdt)

    args = [x2, eps.astype(jnp.float32)]
    enc_rk = []
    for (sel, m, b2) in prep["enc_conv"]:
        args += [sel, m, b2]
        enc_rk.append((sel.shape[0] // 4, m.shape[0] // 4))
    for (w, b) in prep["fc"]:
        args += [w, b]
    dec_rk = []
    for (scat, nmat, b2) in prep["dec_conv"]:
        args += [scat, nmat, b2]
        dec_rk.append((scat.shape[0] // 4, nmat.shape[0] // 4))

    recon_rows = prep["dec_conv"][-1][0].shape[0] // 4       # 2H*B of last layer
    recon_cols = prep["dec_conv"][-1][1].shape[1]            # 2W*Cout of last layer

    kernel = functools.partial(
        _vae_fused_kernel,
        n_enc=len(prep["enc_conv"]), n_dec=len(prep["dec_conv"]),
        n_enc_fc=prep["n_enc_fc"], n_dec_fc=prep["n_dec_fc"],
        enc_rk=tuple(enc_rk), dec_rk=tuple(dec_rk),
        s_bot=s_bot, col_block=col_block,
        latent_dim=latent_dim, var_off=var_off, slope=NEG_SLOPE)

    muvar, recon2 = pl.pallas_call(
        kernel,
        out_shape=(jax.ShapeDtypeStruct((B, var_off + 128), jnp.float32),
                   jax.ShapeDtypeStruct((recon_rows, recon_cols), jnp.float32)),
        grid=(1,),
        in_specs=[pl.BlockSpec(a.shape, lambda i: (0, 0)) for a in args],
        out_specs=(pl.BlockSpec((B, var_off + 128), lambda i: (0, 0)),
                   pl.BlockSpec((recon_rows, recon_cols), lambda i: (0, 0))),
        scratch_shapes=[pltpu.VMEM((s_bot * B, col_block), cdt)],
    )(*args)

    mu = muvar[:, :latent_dim]
    log_var = muvar[:, var_off:var_off + latent_dim]
    # rows (y, b), cols (x, c) -> NCHW
    recon = jnp.transpose(recon2.reshape(S, B, S, out_c), (1, 3, 0, 2))
    return recon, x_nchw, mu, log_var


# --------------------------------------------------------------------------- #
# Pure-JAX reference (for the numerical self-check requested by the review)    #
# --------------------------------------------------------------------------- #
def reference_forward(params, x, eps):
    def lrelu(v):
        return jnp.where(v >= 0, v, NEG_SLOPE * v)

    h = x
    for (w, b) in params["enc_conv"]:
        h = lax.conv_general_dilated(h, w, (2, 2), ((1, 1), (1, 1)),
                                     dimension_numbers=("NCHW", "OIHW", "NCHW"))
        h = lrelu(h + b[None, :, None, None])
    hf = h.reshape(h.shape[0], -1)
    for (w, b) in params["enc_fc"]:
        hf = lrelu(hf @ w + b)
    mu = hf @ params["mu"][0] + params["mu"][1]
    log_var = hf @ params["var"][0] + params["var"][1]
    z = eps * jnp.exp(0.5 * log_var) + mu
    d = z
    for (w, b) in params["dec_fc"]:
        d = lrelu(d @ w + b)
    d = d @ params["dec_fc_out"][0] + params["dec_fc_out"][1]
    d = d.reshape(x.shape[0], -1, 4, 4)
    n = len(params["dec_conv"])
    for i, (w, b) in enumerate(params["dec_conv"]):
        wc = jnp.transpose(jnp.flip(w, (2, 3)), (1, 0, 2, 3))
        d = lax.conv_general_dilated(d, wc, (1, 1), ((2, 2), (2, 2)),
                                     lhs_dilation=(2, 2),
                                     dimension_numbers=("NCHW", "OIHW", "NCHW"))
        d = d + b[None, :, None, None]
        d = jax.nn.sigmoid(d) if i == n - 1 else lrelu(d)
    return d, mu, log_var


# --------------------------------------------------------------------------- #
# Main                                                                         #
# --------------------------------------------------------------------------- #
if __name__ == "__main__":
    key = jax.random.PRNGKey(0)
    pkey, xkey, ekey = jax.random.split(key, 3)

    B, C, S, LATENT = 2, 3, 32, 10
    params = init_params(pkey, input_channels=C, image_size=S, latent_dim=LATENT)
    x = jax.random.normal(xkey, (B, C, S, S), jnp.float32)
    eps = jax.random.normal(ekey, (B, LATENT), jnp.float32)  # replaces torch.randn_like

    prep = prepare_params(params, batch=B, image_size=S, latent_dim=LATENT,
                          compute_dtype=jnp.bfloat16)
    fwd = jax.jit(functools.partial(diag_conv_vae_forward, prep))
    recon, inp, mu, log_var = fwd(x, eps)
    jax.block_until_ready(recon)

    assert recon.shape == (B, C, S, S)
    assert mu.shape == (B, LATENT) and log_var.shape == (B, LATENT)

    # Numerical self-check vs. a pure-JAX f32 reference (validates the conv /
    # conv-transpose selection/scatter matrices and the layout permutations).
    r_ref, mu_ref, lv_ref = jax.jit(reference_forward)(params, x, eps)
    assert bool(jnp.allclose(mu, mu_ref, rtol=2e-2, atol=5e-3))
    assert bool(jnp.allclose(log_var, lv_ref, rtol=2e-2, atol=5e-3))
    assert bool(jnp.allclose(recon, r_ref, rtol=0.0, atol=2e-3))

    print("KERNEL_OK")
</pallas_src>

<mosaic_0001>
module attributes {stable_mosaic.version = 11 : i64} {
  func.func @_vae_fused_kernel(%arg0: i32, %arg1: memref<64x96xbf16, #tpu.memory_space<vmem>>, %arg2: memref<2x10xf32, #tpu.memory_space<vmem>>, %arg3: memref<128x64xbf16, #tpu.memory_space<vmem>>, %arg4: memref<384x128xbf16, #tpu.memory_space<vmem>>, %arg5: memref<1x128xf32, #tpu.memory_space<vmem>>, %arg6: memref<64x32xbf16, #tpu.memory_space<vmem>>, %arg7: memref<512x128xbf16, #tpu.memory_space<vmem>>, %arg8: memref<1x128xf32, #tpu.memory_space<vmem>>, %arg9: memref<32x16xbf16, #tpu.memory_space<vmem>>, %arg10: memref<512x128xbf16, #tpu.memory_space<vmem>>, %arg11: memref<1x128xf32, #tpu.memory_space<vmem>>, %arg12: memref<512x256xbf16, #tpu.memory_space<vmem>>, %arg13: memref<1x256xf32, #tpu.memory_space<vmem>>, %arg14: memref<256x128xbf16, #tpu.memory_space<vmem>>, %arg15: memref<1x128xf32, #tpu.memory_space<vmem>>, %arg16: memref<128x256xbf16, #tpu.memory_space<vmem>>, %arg17: memref<1x256xf32, #tpu.memory_space<vmem>>, %arg18: memref<10x128xbf16, #tpu.memory_space<vmem>>, %arg19: memref<1x128xf32, #tpu.memory_space<vmem>>, %arg20: memref<128x256xbf16, #tpu.memory_space<vmem>>, %arg21: memref<1x256xf32, #tpu.memory_space<vmem>>, %arg22: memref<256x512xbf16, #tpu.memory_space<vmem>>, %arg23: memref<1x512xf32, #tpu.memory_space<vmem>>, %arg24: memref<64x8xbf16, #tpu.memory_space<vmem>>, %arg25: memref<512x128xbf16, #tpu.memory_space<vmem>>, %arg26: memref<1x128xf32, #tpu.memory_space<vmem>>, %arg27: memref<128x16xbf16, #tpu.memory_space<vmem>>, %arg28: memref<512x128xbf16, #tpu.memory_space<vmem>>, %arg29: memref<1x128xf32, #tpu.memory_space<vmem>>, %arg30: memref<256x32xbf16, #tpu.memory_space<vmem>>, %arg31: memref<512x96xbf16, #tpu.memory_space<vmem>>, %arg32: memref<1x96xf32, #tpu.memory_space<vmem>>, %arg33: memref<2x256xf32, #tpu.memory_space<vmem>>, %arg34: memref<64x96xf32, #tpu.memory_space<vmem>>, %arg35: memref<8x128xbf16, #tpu.memory_space<vmem>>) attributes {dimension_semantics = [#tpu.dimension_semantics<arbitrary>], iteration_bounds = array<i64: 1>, scalar_prefetch = 0 : i64, scratch_operands = 1 : i64, tpu.core_type = #tpu.core_type<tc>, window_params = [{pipeline_mode = #tpu.pipeline_mode<synchronous>, transform_indices = @transform_0, window_bounds = array<i64: 64, 96>}, {pipeline_mode = #tpu.pipeline_mode<synchronous>, transform_indices = @transform_1, window_bounds = array<i64: 2, 10>}, {pipeline_mode = #tpu.pipeline_mode<synchronous>, transform_indices = @transform_2, window_bounds = array<i64: 128, 64>}, {pipeline_mode = #tpu.pipeline_mode<synchronous>, transform_indices = @transform_3, window_bounds = array<i64: 384, 128>}, {pipeline_mode = #tpu.pipeline_mode<synchronous>, transform_indices = @transform_4, window_bounds = array<i64: 1, 128>}, {pipeline_mode = #tpu.pipeline_mode<synchronous>, transform_indices = @transform_5, window_bounds = array<i64: 64, 32>}, {pipeline_mode = #tpu.pipeline_mode<synchronous>, transform_indices = @transform_6, window_bounds = array<i64: 512, 128>}, {pipeline_mode = #tpu.pipeline_mode<synchronous>, transform_indices = @transform_7, window_bounds = array<i64: 1, 128>}, {pipeline_mode = #tpu.pipeline_mode<synchronous>, transform_indices = @transform_8, window_bounds = array<i64: 32, 16>}, {pipeline_mode = #tpu.pipeline_mode<synchronous>, transform_indices = @transform_9, window_bounds = array<i64: 512, 128>}, {pipeline_mode = #tpu.pipeline_mode<synchronous>, transform_indices = @transform_10, window_bounds = array<i64: 1, 128>}, {pipeline_mode = #tpu.pipeline_mode<synchronous>, transform_indices = @transform_11, window_bounds = array<i64: 512, 256>}, {pipeline_mode = #tpu.pipeline_mode<synchronous>, transform_indices = @transform_12, window_bounds = array<i64: 1, 256>}, {pipeline_mode = #tpu.pipeline_mode<synchronous>, transform_indices = @transform_13, window_bounds = array<i64: 256, 128>}, {pipeline_mode = #tpu.pipeline_mode<synchronous>, transform_indices = @transform_14, window_bounds = array<i64: 1, 128>}, {pipeline_mode = #tpu.pipeline_mode<synchronous>, transform_indices = @transform_15, window_bounds = array<i64: 128, 256>}, {pipeline_mode = #tpu.pipeline_mode<synchronous>, transform_indices = @transform_16, window_bounds = array<i64: 1, 256>}, {pipeline_mode = #tpu.pipeline_mode<synchronous>, transform_indices = @transform_17, window_bounds = array<i64: 10, 128>}, {pipeline_mode = #tpu.pipeline_mode<synchronous>, transform_indices = @transform_18, window_bounds = array<i64: 1, 128>}, {pipeline_mode = #tpu.pipeline_mode<synchronous>, transform_indices = @transform_19, window_bounds = array<i64: 128, 256>}, {pipeline_mode = #tpu.pipeline_mode<synchronous>, transform_indices = @transform_20, window_bounds = array<i64: 1, 256>}, {pipeline_mode = #tpu.pipeline_mode<synchronous>, transform_indices = @transform_21, window_bounds = array<i64: 256, 512>}, {pipeline_mode = #tpu.pipeline_mode<synchronous>, transform_indices = @transform_22, window_bounds = array<i64: 1, 512>}, {pipeline_mode = #tpu.pipeline_mode<synchronous>, transform_indices = @transform_23, window_bounds = array<i64: 64, 8>}, {pipeline_mode = #tpu.pipeline_mode<synchronous>, transform_indices = @transform_24, window_bounds = array<i64: 512, 128>}, {pipeline_mode = #tpu.pipeline_mode<synchronous>, transform_indices = @transform_25, window_bounds = array<i64: 1, 128>}, {pipeline_mode = #tpu.pipeline_mode<synchronous>, transform_indices = @transform_26, window_bounds = array<i64: 128, 16>}, {pipeline_mode = #tpu.pipeline_mode<synchronous>, transform_indices = @transform_27, window_bounds = array<i64: 512, 128>}, {pipeline_mode = #tpu.pipeline_mode<synchronous>, transform_indices = @transform_28, window_bounds = array<i64: 1, 128>}, {pipeline_mode = #tpu.pipeline_mode<synchronous>, transform_indices = @transform_29, window_bounds = array<i64: 256, 32>}, {pipeline_mode = #tpu.pipeline_mode<synchronous>, transform_indices = @transform_30, window_bounds = array<i64: 512, 96>}, {pipeline_mode = #tpu.pipeline_mode<synchronous>, transform_indices = @transform_31, window_bounds = array<i64: 1, 96>}, {pipeline_mode = #tpu.pipeline_mode<synchronous>, transform_indices = @transform_32, window_bounds = array<i64: 2, 256>}, {pipeline_mode = #tpu.pipeline_mode<synchronous>, transform_indices = @transform_33, window_bounds = array<i64: 64, 96>}]} {
    %c0 = arith.constant 0 : index
    %c0_0 = arith.constant 0 : index
    %0 = vector.load %arg1[%c0, %c0_0] : memref<64x96xbf16, #tpu.memory_space<vmem>>, vector<64x96xbf16>
    %c0_1 = arith.constant 0 : index
    %c0_2 = arith.constant 0 : index
    %1 = vector.load %arg3[%c0_1, %c0_2] : memref<128x64xbf16, #tpu.memory_space<vmem>>, vector<128x64xbf16>
    %c0_3 = arith.constant 0 : index
    %c0_4 = arith.constant 0 : index
    %2 = vector.load %arg4[%c0_3, %c0_4] : memref<384x128xbf16, #tpu.memory_space<vmem>>, vector<384x128xbf16>
    %3 = vector.extract_strided_slice %1 {offsets = [0, 0], sizes = [32, 64], strides = [1, 1]} : vector<128x64xbf16> to vector<32x64xbf16>
    %cst = arith.constant dense<0.000000e+00> : vector<32x96xf32>
    %4 = tpu.matmul %3, %0, %cst {dimension_numbers = #tpu.dot_dimension_numbers<[1], [0], [0], [1], [0, 0, 1, 1], [], []>} : vector<32x64xbf16>, vector<64x96xbf16>, vector<32x96xf32> -> vector<32x96xf32>
    %5 = arith.truncf %4 : vector<32x96xf32> to vector<32x96xbf16>
    %6 = vector.extract_strided_slice %2 {offsets = [0, 0], sizes = [96, 128], strides = [1, 1]} : vector<384x128xbf16> to vector<96x128xbf16>
    %cst_5 = arith.constant dense<0.000000e+00> : vector<32x128xf32>
    %7 = tpu.matmul %5, %6, %cst_5 {dimension_numbers = #tpu.dot_dimension_numbers<[1], [0], [0], [1], [0, 0, 1, 1], [], []>} : vector<32x96xbf16>, vector<96x128xbf16>, vector<32x128xf32> -> vector<32x128xf32>
    %8 = vector.extract_strided_slice %1 {offsets = [32, 0], sizes = [32, 64], strides = [1, 1]} : vector<128x64xbf16> to vector<32x64xbf16>
    %cst_6 = arith.constant dense<0.000000e+00> : vector<32x96xf32>
    %9 = tpu.matmul %8, %0, %cst_6 {dimension_numbers = #tpu.dot_dimension_numbers<[1], [0], [0], [1], [0, 0, 1, 1], [], []>} : vector<32x64xbf16>, vector<64x96xbf16>, vector<32x96xf32> -> vector<32x96xf32>
    %10 = arith.truncf %9 : vector<32x96xf32> to vector<32x96xbf16>
    %11 = vector.extract_strided_slice %2 {offsets = [96, 0], sizes = [96, 128], strides = [1, 1]} : vector<384x128xbf16> to vector<96x128xbf16>
    %cst_7 = arith.constant dense<0.000000e+00> : vector<32x128xf32>
    %12 = tpu.matmul %10, %11, %cst_7 {dimension_numbers = #tpu.dot_dimension_numbers<[1], [0], [0], [1], [0, 0, 1, 1], [], []>} : vector<32x96xbf16>, vector<96x128xbf16>, vector<32x128xf32> -> vector<32x128xf32>
    %13 = arith.addf %7, %12 : vector<32x128xf32>
    %14 = vector.extract_strided_slice %1 {offsets = [64, 0], sizes = [32, 64], strides = [1, 1]} : vector<128x64xbf16> to vector<32x64xbf16>
    %cst_8 = arith.constant dense<0.000000e+00> : vector<32x96xf32>
    %15 = tpu.matmul %14, %0, %cst_8 {dimension_numbers = #tpu.dot_dimension_numbers<[1], [0], [0], [1], [0, 0, 1, 1], [], []>} : vector<32x64xbf16>, vector<64x96xbf16>, vector<32x96xf32> -> vector<32x96xf32>
    %16 = arith.truncf %15 : vector<32x96xf32> to vector<32x96xbf16>
    %17 = vector.extract_strided_slice %2 {offsets = [192, 0], sizes = [96, 128], strides = [1, 1]} : vector<384x128xbf16> to vector<96x128xbf16>
    %cst_9 = arith.constant dense<0.000000e+00> : vector<32x128xf32>
    %18 = tpu.matmul %16, %17, %cst_9 {dimension_numbers = #tpu.dot_dimension_numbers<[1], [0], [0], [1], [0, 0, 1, 1], [], []>} : vector<32x96xbf16>, vector<96x128xbf16>, vector<32x128xf32> -> vector<32x128xf32>
    %19 = arith.addf %13, %18 : vector<32x128xf32>
    %20 = vector.extract_strided_slice %1 {offsets = [96, 0], sizes = [32, 64], strides = [1, 1]} : vector<128x64xbf16> to vector<32x64xbf16>
    %cst_10 = arith.constant dense<0.000000e+00> : vector<32x96xf32>
    %21 = tpu.matmul %20, %0, %cst_10 {dimension_numbers = #tpu.dot_dimension_numbers<[1], [0], [0], [1], [0, 0, 1, 1], [], []>} : vector<32x64xbf16>, vector<64x96xbf16>, vector<32x96xf32> -> vector<32x96xf32>
    %22 = arith.truncf %21 : vector<32x96xf32> to vector<32x96xbf16>
    %23 = vector.extract_strided_slice %2 {offsets = [288, 0], sizes = [96, 128], strides = [1, 1]} : vector<384x128xbf16> to vector<96x128xbf16>
    %cst_11 = arith.constant dense<0.000000e+00> : vector<32x128xf32>
    %24 = tpu.matmul %22, %23, %cst_11 {dimension_numbers = #tpu.dot_dimension_numbers<[1], [0], [0], [1], [0, 0, 1, 1], [], []>} : vector<32x96xbf16>, vector<96x128xbf16>, vector<32x128xf32> -> vector<32x128xf32>
    %25 = arith.addf %19, %24 : vector<32x128xf32>
    %c0_12 = arith.constant 0 : index
    %c0_13 = arith.constant 0 : index
    %26 = vector.load %arg5[%c0_12, %c0_13] : memref<1x128xf32, #tpu.memory_space<vmem>>, vector<1x128xf32>
    %27 = vector.broadcast %26 : vector<1x128xf32> to vector<32x128xf32>
    %28 = arith.addf %25, %27 : vector<32x128xf32>
    %cst_14 = arith.constant 0.000000e+00 : f32
    %29 = vector.broadcast %cst_14 : f32 to vector<32x128xf32>
    %30 = arith.cmpf oge, %28, %29 : vector<32x128xf32>
    %cst_15 = arith.constant 0.00999999977 : f32
    %31 = vector.broadcast %cst_15 : f32 to vector<32x128xf32>
    %32 = arith.mulf %31, %28 : vector<32x128xf32>
    %33 = arith.select %30, %28, %32 : vector<32x128xi1>, vector<32x128xf32>
    %34 = arith.truncf %33 : vector<32x128xf32> to vector<32x128xbf16>
    %c0_16 = arith.constant 0 : index
    %c0_17 = arith.constant 0 : index
    %35 = vector.load %arg6[%c0_16, %c0_17] : memref<64x32xbf16, #tpu.memory_space<vmem>>, vector<64x32xbf16>
    %c0_18 = arith.constant 0 : index
    %c0_19 = arith.constant 0 : index
    %36 = vector.load %arg7[%c0_18, %c0_19] : memref<512x128xbf16, #tpu.memory_space<vmem>>, vector<512x128xbf16>
    %37 = vector.extract_strided_slice %35 {offsets = [0, 0], sizes = [16, 32], strides = [1, 1]} : vector<64x32xbf16> to vector<16x32xbf16>
    %cst_20 = arith.constant dense<0.000000e+00> : vector<16x128xf32>
    %38 = tpu.matmul %37, %34, %cst_20 {dimension_numbers = #tpu.dot_dimension_numbers<[1], [0], [0], [1], [0, 0, 1, 1], [], []>} : vector<16x32xbf16>, vector<32x128xbf16>, vector<16x128xf32> -> vector<16x128xf32>
    %39 = arith.truncf %38 : vector<16x128xf32> to vector<16x128xbf16>
    %40 = vector.extract_strided_slice %36 {offsets = [0, 0], sizes = [128, 128], strides = [1, 1]} : vector<512x128xbf16> to vector<128x128xbf16>
    %cst_21 = arith.constant dense<0.000000e+00> : vector<16x128xf32>
    %41 = tpu.matmul %39, %40, %cst_21 {dimension_numbers = #tpu.dot_dimension_numbers<[1], [0], [0], [1], [0, 0, 1, 1], [], []>} : vector<16x128xbf16>, vector<128x128xbf16>, vector<16x128xf32> -> vector<16x128xf32>
    %42 = vector.extract_strided_slice %35 {offsets = [16, 0], sizes = [16, 32], strides = [1, 1]} : vector<64x32xbf16> to vector<16x32xbf16>
    %cst_22 = arith.constant dense<0.000000e+00> : vector<16x128xf32>
    %43 = tpu.matmul %42, %34, %cst_22 {dimension_numbers = #tpu.dot_dimension_numbers<[1], [0], [0], [1], [0, 0, 1, 1], [], []>} : vector<16x32xbf16>, vector<32x128xbf16>, vector<16x128xf32> -> vector<16x128xf32>
    %44 = arith.truncf %43 : vector<16x128xf32> to vector<16x128xbf16>
    %45 = vector.extract_strided_slice %36 {offsets = [128, 0], sizes = [128, 128], strides = [1, 1]} : vector<512x128xbf16> to vector<128x128xbf16>
    %cst_23 = arith.constant dense<0.000000e+00> : vector<16x128xf32>
    %46 = tpu.matmul %44, %45, %cst_23 {dimension_numbers = #tpu.dot_dimension_numbers<[1], [0], [0], [1], [0, 0, 1, 1], [], []>} : vector<16x128xbf16>, vector<128x128xbf16>, vector<16x128xf32> -> vector<16x128xf32>
    %47 = arith.addf %41, %46 : vector<16x128xf32>
    %48 = vector.extract_strided_slice %35 {offsets = [32, 0], sizes = [16, 32], strides = [1, 1]} : vector<64x32xbf16> to vector<16x32xbf16>
    %cst_24 = arith.constant dense<0.000000e+00> : vector<16x128xf32>
    %49 = tpu.matmul %48, %34, %cst_24 {dimension_numbers = #tpu.dot_dimension_numbers<[1], [0], [0], [1], [0, 0, 1, 1], [], []>} : vector<16x32xbf16>, vector<32x128xbf16>, vector<16x128xf32> -> vector<16x128xf32>
    %50 = arith.truncf %49 : vector<16x128xf32> to vector<16x128xbf16>
    %51 = vector.extract_strided_slice %36 {offsets = [256, 0], sizes = [128, 128], strides = [1, 1]} : vector<512x128xbf16> to vector<128x128xbf16>
    %cst_25 = arith.constant dense<0.000000e+00> : vector<16x128xf32>
    %52 = tpu.matmul %50, %51, %cst_25 {dimension_numbers = #tpu.dot_dimension_numbers<[1], [0], [0], [1], [0, 0, 1, 1], [], []>} : vector<16x128xbf16>, vector<128x128xbf16>, vector<16x128xf32> -> vector<16x128xf32>
    %53 = arith.addf %47, %52 : vector<16x128xf32>
    %54 = vector.extract_strided_slice %35 {offsets = [48, 0], sizes = [16, 32], strides = [1, 1]} : vector<64x32xbf16> to vector<16x32xbf16>
    %cst_26 = arith.constant dense<0.000000e+00> : vector<16x128xf32>
    %55 = tpu.matmul %54, %34, %cst_26 {dimension_numbers = #tpu.dot_dimension_numbers<[1], [0], [0], [1], [0, 0, 1, 1], [], []>} : vector<16x32xbf16>, vector<32x128xbf16>, vector<16x128xf32> -> vector<16x128xf32>
    %56 = arith.truncf %55 : vector<16x128xf32> to vector<16x128xbf16>
    %57 = vector.extract_strided_slice %36 {offsets = [384, 0], sizes = [128, 128], strides = [1, 1]} : vector<512x128xbf16> to vector<128x128xbf16>
    %cst_27 = arith.constant dense<0.000000e+00> : vector<16x128xf32>
    %58 = tpu.matmul %56, %57, %cst_27 {dimension_numbers = #tpu.dot_dimension_numbers<[1], [0], [0], [1], [0, 0, 1, 1], [], []>} : vector<16x128xbf16>, vector<128x128xbf16>, vector<16x128xf32> -> vector<16x128xf32>
    %59 = arith.addf %53, %58 : vector<16x128xf32>
    %c0_28 = arith.constant 0 : index
    %c0_29 = arith.constant 0 : index
    %60 = vector.load %arg8[%c0_28, %c0_29] : memref<1x128xf32, #tpu.memory_space<vmem>>, vector<1x128xf32>
    %61 = vector.broadcast %60 : vector<1x128xf32> to vector<16x128xf32>
    %62 = arith.addf %59, %61 : vector<16x128xf32>
    %cst_30 = arith.constant 0.000000e+00 : f32
    %63 = vector.broadcast %cst_30 : f32 to vector<16x128xf32>
    %64 = arith.cmpf oge, %62, %63 : vector<16x128xf32>
    %cst_31 = arith.constant 0.00999999977 : f32
    %65 = vector.broadcast %cst_31 : f32 to vector<16x128xf32>
    %66 = arith.mulf %65, %62 : vector<16x128xf32>
    %67 = arith.select %64, %62, %66 : vector<16x128xi1>, vector<16x128xf32>
    %68 = arith.truncf %67 : vector<16x128xf32> to vector<16x128xbf16>
    %c0_32 = arith.constant 0 : index
    %c0_33 = arith.constant 0 : index
    %69 = vector.load %arg9[%c0_32, %c0_33] : memref<32x16xbf16, #tpu.memory_space<vmem>>, vector<32x16xbf16>
    %c0_34 = arith.constant 0 : index
    %c0_35 = arith.constant 0 : index
    %70 = vector.load %arg10[%c0_34, %c0_35] : memref<512x128xbf16, #tpu.memory_space<vmem>>, vector<512x128xbf16>
    %71 = vector.extract_strided_slice %69 {offsets = [0, 0], sizes = [8, 16], strides = [1, 1]} : vector<32x16xbf16> to vector<8x16xbf16>
    %cst_36 = arith.constant dense<0.000000e+00> : vector<8x128xf32>
    %72 = tpu.matmul %71, %68, %cst_36 {dimension_numbers = #tpu.dot_dimension_numbers<[1], [0], [0], [1], [0, 0, 1, 1], [], []>} : vector<8x16xbf16>, vector<16x128xbf16>, vector<8x128xf32> -> vector<8x128xf32>
    %73 = arith.truncf %72 : vector<8x128xf32> to vector<8x128xbf16>
    %74 = vector.extract_strided_slice %70 {offsets = [0, 0], sizes = [128, 128], strides = [1, 1]} : vector<512x128xbf16> to vector<128x128xbf16>
    %cst_37 = arith.constant dense<0.000000e+00> : vector<8x128xf32>
    %75 = tpu.matmul %73, %74, %cst_37 {dimension_numbers = #tpu.dot_dimension_numbers<[1], [0], [0], [1], [0, 0, 1, 1], [], []>} : vector<8x128xbf16>, vector<128x128xbf16>, vector<8x128xf32> -> vector<8x128xf32>
    %76 = vector.extract_strided_slice %69 {offsets = [8, 0], sizes = [8, 16], strides = [1, 1]} : vector<32x16xbf16> to vector<8x16xbf16>
    %cst_38 = arith.constant dense<0.000000e+00> : vector<8x128xf32>
    %77 = tpu.matmul %76, %68, %cst_38 {dimension_numbers = #tpu.dot_dimension_numbers<[1], [0], [0], [1], [0, 0, 1, 1], [], []>} : vector<8x16xbf16>, vector<16x128xbf16>, vector<8x128xf32> -> vector<8x128xf32>
    %78 = arith.truncf %77 : vector<8x128xf32> to vector<8x128xbf16>
    %79 = vector.extract_strided_slice %70 {offsets = [128, 0], sizes = [128, 128], strides = [1, 1]} : vector<512x128xbf16> to vector<128x128xbf16>
    %cst_39 = arith.constant dense<0.000000e+00> : vector<8x128xf32>
    %80 = tpu.matmul %78, %79, %cst_39 {dimension_numbers = #tpu.dot_dimension_numbers<[1], [0], [0], [1], [0, 0, 1, 1], [], []>} : vector<8x128xbf16>, vector<128x128xbf16>, vector<8x128xf32> -> vector<8x128xf32>
    %81 = arith.addf %75, %80 : vector<8x128xf32>
    %82 = vector.extract_strided_slice %69 {offsets = [16, 0], sizes = [8, 16], strides = [1, 1]} : vector<32x16xbf16> to vector<8x16xbf16>
    %cst_40 = arith.constant dense<0.000000e+00> : vector<8x128xf32>
    %83 = tpu.matmul %82, %68, %cst_40 {dimension_numbers = #tpu.dot_dimension_numbers<[1], [0], [0], [1], [0, 0, 1, 1], [], []>} : vector<8x16xbf16>, vector<16x128xbf16>, vector<8x128xf32> -> vector<8x128xf32>
    %84 = arith.truncf %83 : vector<8x128xf32> to vector<8x128xbf16>
    %85 = vector.extract_strided_slice %70 {offsets = [256, 0], sizes = [128, 128], strides = [1, 1]} : vector<512x128xbf16> to vector<128x128xbf16>
    %cst_41 = arith.constant dense<0.000000e+00> : vector<8x128xf32>
    %86 = tpu.matmul %84, %85, %cst_41 {dimension_numbers = #tpu.dot_dimension_numbers<[1], [0], [0], [1], [0, 0, 1, 1], [], []>} : vector<8x128xbf16>, vector<128x128xbf16>, vector<8x128xf32> -> vector<8x128xf32>
    %87 = arith.addf %81, %86 : vector<8x128xf32>
    %88 = vector.extract_strided_slice %69 {offsets = [24, 0], sizes = [8, 16], strides = [1, 1]} : vector<32x16xbf16> to vector<8x16xbf16>
    %cst_42 = arith.constant dense<0.000000e+00> : vector<8x128xf32>
    %89 = tpu.matmul %88, %68, %cst_42 {dimension_numbers = #tpu.dot_dimension_numbers<[1], [0], [0], [1], [0, 0, 1, 1], [], []>} : vector<8x16xbf16>, vector<16x128xbf16>, vector<8x128xf32> -> vector<8x128xf32>
    %90 = arith.truncf %89 : vector<8x128xf32> to vector<8x128xbf16>
    %91 = vector.extract_strided_slice %70 {offsets = [384, 0], sizes = [128, 128], strides = [1, 1]} : vector<512x128xbf16> to vector<128x128xbf16>
    %cst_43 = arith.constant dense<0.000000e+00> : vector<8x128xf32>
    %92 = tpu.matmul %90, %91, %cst_43 {dimension_numbers = #tpu.dot_dimension_numbers<[1], [0], [0], [1], [0, 0, 1, 1], [], []>} : vector<8x128xbf16>, vector<128x128xbf16>, vector<8x128xf32> -> vector<8x128xf32>
    %93 = arith.addf %87, %92 : vector<8x128xf32>
    %c0_44 = arith.constant 0 : index
    %c0_45 = arith.constant 0 : index
    %94 = vector.load %arg11[%c0_44, %c0_45] : memref<1x128xf32, #tpu.memory_space<vmem>>, vector<1x128xf32>
    %95 = vector.broadcast %94 : vector<1x128xf32> to vector<8x128xf32>
    %96 = arith.addf %93, %95 : vector<8x128xf32>
    %cst_46 = arith.constant 0.000000e+00 : f32
    %97 = vector.broadcast %cst_46 : f32 to vector<8x128xf32>
    %98 = arith.cmpf oge, %96, %97 : vector<8x128xf32>
    %cst_47 = arith.constant 0.00999999977 : f32
    %99 = vector.broadcast %cst_47 : f32 to vector<8x128xf32>
    %100 = arith.mulf %99, %96 : vector<8x128xf32>
    %101 = arith.select %98, %96, %100 : vector<8x128xi1>, vector<8x128xf32>
    %102 = arith.truncf %101 : vector<8x128xf32> to vector<8x128xbf16>
    %c0_48 = arith.constant 0 : index
    %c0_49 = arith.constant 0 : index
    %103 = vector.load %arg12[%c0_48, %c0_49] : memref<512x256xbf16, #tpu.memory_space<vmem>>, vector<512x256xbf16>
    %104 = vector.extract_strided_slice %102 {offsets = [0, 0], sizes = [2, 128], strides = [1, 1]} : vector<8x128xbf16> to vector<2x128xbf16>
    %105 = vector.extract_strided_slice %103 {offsets = [0, 0], sizes = [128, 256], strides = [1, 1]} : vector<512x256xbf16> to vector<128x256xbf16>
    %cst_50 = arith.constant dense<0.000000e+00> : vector<2x256xf32>
    %106 = tpu.matmul %104, %105, %cst_50 {dimension_numbers = #tpu.dot_dimension_numbers<[1], [0], [0], [1], [0, 0, 1, 1], [], []>} : vector<2x128xbf16>, vector<128x256xbf16>, vector<2x256xf32> -> vector<2x256xf32>
    %107 = vector.extract_strided_slice %102 {offsets = [2, 0], sizes = [2, 128], strides = [1, 1]} : vector<8x128xbf16> to vector<2x128xbf16>
    %108 = vector.extract_strided_slice %103 {offsets = [128, 0], sizes = [128, 256], strides = [1, 1]} : vector<512x256xbf16> to vector<128x256xbf16>
    %cst_51 = arith.constant dense<0.000000e+00> : vector<2x256xf32>
    %109 = tpu.matmul %107, %108, %cst_51 {dimension_numbers = #tpu.dot_dimension_numbers<[1], [0], [0], [1], [0, 0, 1, 1], [], []>} : vector<2x128xbf16>, vector<128x256xbf16>, vector<2x256xf32> -> vector<2x256xf32>
    %110 = arith.addf %106, %109 : vector<2x256xf32>
    %111 = vector.extract_strided_slice %102 {offsets = [4, 0], sizes = [2, 128], strides = [1, 1]} : vector<8x128xbf16> to vector<2x128xbf16>
    %112 = vector.extract_strided_slice %103 {offsets = [256, 0], sizes = [128, 256], strides = [1, 1]} : vector<512x256xbf16> to vector<128x256xbf16>
    %cst_52 = arith.constant dense<0.000000e+00> : vector<2x256xf32>
    %113 = tpu.matmul %111, %112, %cst_52 {dimension_numbers = #tpu.dot_dimension_numbers<[1], [0], [0], [1], [0, 0, 1, 1], [], []>} : vector<2x128xbf16>, vector<128x256xbf16>, vector<2x256xf32> -> vector<2x256xf32>
    %114 = arith.addf %110, %113 : vector<2x256xf32>
    %115 = vector.extract_strided_slice %102 {offsets = [6, 0], sizes = [2, 128], strides = [1, 1]} : vector<8x128xbf16> to vector<2x128xbf16>
    %116 = vector.extract_strided_slice %103 {offsets = [384, 0], sizes = [128, 256], strides = [1, 1]} : vector<512x256xbf16> to vector<128x256xbf16>
    %cst_53 = arith.constant dense<0.000000e+00> : vector<2x256xf32>
    %117 = tpu.matmul %115, %116, %cst_53 {dimension_numbers = #tpu.dot_dimension_numbers<[1], [0], [0], [1], [0, 0, 1, 1], [], []>} : vector<2x128xbf16>, vector<128x256xbf16>, vector<2x256xf32> -> vector<2x256xf32>
    %118 = arith.addf %114, %117 : vector<2x256xf32>
    %c0_54 = arith.constant 0 : index
    %c0_55 = arith.constant 0 : index
    %119 = vector.load %arg13[%c0_54, %c0_55] : memref<1x256xf32, #tpu.memory_space<vmem>>, vector<1x256xf32>
    %120 = vector.broadcast %119 : vector<1x256xf32> to vector<2x256xf32>
    %121 = arith.addf %118, %120 : vector<2x256xf32>
    %cst_56 = arith.constant 0.000000e+00 : f32
    %122 = vector.broadcast %cst_56 : f32 to vector<2x256xf32>
    %123 = arith.cmpf oge, %121, %122 : vector<2x256xf32>
    %cst_57 = arith.constant 0.00999999977 : f32
    %124 = vector.broadcast %cst_57 : f32 to vector<2x256xf32>
    %125 = arith.mulf %124, %121 : vector<2x256xf32>
    %126 = arith.select %123, %121, %125 : vector<2x256xi1>, vector<2x256xf32>
    %127 = arith.truncf %126 : vector<2x256xf32> to vector<2x256xbf16>
    %c0_58 = arith.constant 0 : index
    %c0_59 = arith.constant 0 : index
    %128 = vector.load %arg14[%c0_58, %c0_59] : memref<256x128xbf16, #tpu.memory_space<vmem>>, vector<256x128xbf16>
    %cst_60 = arith.constant dense<0.000000e+00> : vector<2x128xf32>
    %129 = tpu.matmul %127, %128, %cst_60 {dimension_numbers = #tpu.dot_dimension_numbers<[1], [0], [0], [1], [0, 0, 1, 1], [], []>} : vector<2x256xbf16>, vector<256x128xbf16>, vector<2x128xf32> -> vector<2x128xf32>
    %c0_61 = arith.constant 0 : index
    %c0_62 = arith.constant 0 : index
    %130 = vector.load %arg15[%c0_61, %c0_62] : memref<1x128xf32, #tpu.memory_space<vmem>>, vector<1x128xf32>
    %131 = vector.broadcast %130 : vector<1x128xf32> to vector<2x128xf32>
    %132 = arith.addf %129, %131 : vector<2x128xf32>
    %cst_63 = arith.constant 0.000000e+00 : f32
    %133 = vector.broadcast %cst_63 : f32 to vector<2x128xf32>
    %134 = arith.cmpf oge, %132, %133 : vector<2x128xf32>
    %cst_64 = arith.constant 0.00999999977 : f32
    %135 = vector.broadcast %cst_64 : f32 to vector<2x128xf32>
    %136 = arith.mulf %135, %132 : vector<2x128xf32>
    %137 = arith.select %134, %132, %136 : vector<2x128xi1>, vector<2x128xf32>
    %138 = arith.truncf %137 : vector<2x128xf32> to vector<2x128xbf16>
    %c0_65 = arith.constant 0 : index
    %c0_66 = arith.constant 0 : index
    %139 = vector.load %arg16[%c0_65, %c0_66] : memref<128x256xbf16, #tpu.memory_space<vmem>>, vector<128x256xbf16>
    %cst_67 = arith.constant dense<0.000000e+00> : vector<2x256xf32>
    %140 = tpu.matmul %138, %139, %cst_67 {dimension_numbers = #tpu.dot_dimension_numbers<[1], [0], [0], [1], [0, 0, 1, 1], [], []>} : vector<2x128xbf16>, vector<128x256xbf16>, vector<2x256xf32> -> vector<2x256xf32>
    %c0_68 = arith.constant 0 : index
    %c0_69 = arith.constant 0 : index
    %141 = vector.load %arg17[%c0_68, %c0_69] : memref<1x256xf32, #tpu.memory_space<vmem>>, vector<1x256xf32>
    %142 = vector.broadcast %141 : vector<1x256xf32> to vector<2x256xf32>
    %143 = arith.addf %140, %142 : vector<2x256xf32>
    %c0_70 = arith.constant 0 : index
    %c0_71 = arith.constant 0 : index
    %144 = vector.load %arg33[%c0_70, %c0_71] : memref<2x256xf32, #tpu.memory_space<vmem>>, vector<2x256xf32>
    tpu.vector_store %arg33[%c0_70, %c0_71], %143 {strides = array<i32>} : memref<2x256xf32, #tpu.memory_space<vmem>>, vector<2x256xf32>,
    %145 = vector.extract_strided_slice %143 {offsets = [0, 0], sizes = [2, 10], strides = [1, 1]} : vector<2x256xf32> to vector<2x10xf32>
    %146 = vector.extract_strided_slice %143 {offsets = [0, 128], sizes = [2, 10], strides = [1, 1]} : vector<2x256xf32> to vector<2x10xf32>
    %c0_72 = arith.constant 0 : index
    %c0_73 = arith.constant 0 : index
    %147 = vector.load %arg2[%c0_72, %c0_73] : memref<2x10xf32, #tpu.memory_space<vmem>>, vector<2x10xf32>
    %cst_74 = arith.constant 5.000000e-01 : f32
    %148 = vector.broadcast %cst_74 : f32 to vector<2x10xf32>
    %149 = arith.mulf %148, %146 : vector<2x10xf32>
    %150 = math.exp %149 : vector<2x10xf32>
    %151 = arith.mulf %147, %150 : vector<2x10xf32>
    %152 = arith.addf %151, %145 : vector<2x10xf32>
    %153 = arith.truncf %152 : vector<2x10xf32> to vector<2x10xbf16>
    %c0_75 = arith.constant 0 : index
    %c0_76 = arith.constant 0 : index
    %154 = vector.load %arg18[%c0_75, %c0_76] : memref<10x128xbf16, #tpu.memory_space<vmem>>, vector<10x128xbf16>
    %cst_77 = arith.constant dense<0.000000e+00> : vector<2x128xf32>
    %155 = tpu.matmul %153, %154, %cst_77 {dimension_numbers = #tpu.dot_dimension_numbers<[1], [0], [0], [1], [0, 0, 1, 1], [], []>} : vector<2x10xbf16>, vector<10x128xbf16>, vector<2x128xf32> -> vector<2x128xf32>
    %c0_78 = arith.constant 0 : index
    %c0_79 = arith.constant 0 : index
    %156 = vector.load %arg19[%c0_78, %c0_79] : memref<1x128xf32, #tpu.memory_space<vmem>>, vector<1x128xf32>
    %157 = vector.broadcast %156 : vector<1x128xf32> to vector<2x128xf32>
    %158 = arith.addf %155, %157 : vector<2x128xf32>
    %cst_80 = arith.constant 0.000000e+00 : f32
    %159 = vector.broadcast %cst_80 : f32 to vector<2x128xf32>
    %160 = arith.cmpf oge, %158, %159 : vector<2x128xf32>
    %cst_81 = arith.constant 0.00999999977 : f32
    %161 = vector.broadcast %cst_81 : f32 to vector<2x128xf32>
    %162 = arith.mulf %161, %158 : vector<2x128xf32>
    %163 = arith.select %160, %158, %162 : vector<2x128xi1>, vector<2x128xf32>
    %164 = arith.truncf %163 : vector<2x128xf32> to vector<2x128xbf16>
    %c0_82 = arith.constant 0 : index
    %c0_83 = arith.constant 0 : index
    %165 = vector.load %arg20[%c0_82, %c0_83] : memref<128x256xbf16, #tpu.memory_space<vmem>>, vector<128x256xbf16>
    %cst_84 = arith.constant dense<0.000000e+00> : vector<2x256xf32>
    %166 = tpu.matmul %164, %165, %cst_84 {dimension_numbers = #tpu.dot_dimension_numbers<[1], [0], [0], [1], [0, 0, 1, 1], [], []>} : vector<2x128xbf16>, vector<128x256xbf16>, vector<2x256xf32> -> vector<2x256xf32>
    %c0_85 = arith.constant 0 : index
    %c0_86 = arith.constant 0 : index
    %167 = vector.load %arg21[%c0_85, %c0_86] : memref<1x256xf32, #tpu.memory_space<vmem>>, vector<1x256xf32>
    %168 = vector.broadcast %167 : vector<1x256xf32> to vector<2x256xf32>
    %169 = arith.addf %166, %168 : vector<2x256xf32>
    %cst_87 = arith.constant 0.000000e+00 : f32
    %170 = vector.broadcast %cst_87 : f32 to vector<2x256xf32>
    %171 = arith.cmpf oge, %169, %170 : vector<2x256xf32>
    %cst_88 = arith.constant 0.00999999977 : f32
    %172 = vector.broadcast %cst_88 : f32 to vector<2x256xf32>
    %173 = arith.mulf %172, %169 : vector<2x256xf32>
    %174 = arith.select %171, %169, %173 : vector<2x256xi1>, vector<2x256xf32>
    %175 = arith.truncf %174 : vector<2x256xf32> to vector<2x256xbf16>
    %c0_89 = arith.constant 0 : index
    %c0_90 = arith.constant 0 : index
    %176 = vector.load %arg22[%c0_89, %c0_90] : memref<256x512xbf16, #tpu.memory_space<vmem>>, vector<256x512xbf16>
    %cst_91 = arith.constant dense<0.000000e+00> : vector<2x512xf32>
    %177 = tpu.matmul %175, %176, %cst_91 {dimension_numbers = #tpu.dot_dimension_numbers<[1], [0], [0], [1], [0, 0, 1, 1], [], []>} : vector<2x256xbf16>, vector<256x512xbf16>, vector<2x512xf32> -> vector<2x512xf32>
    %c0_92 = arith.constant 0 : index
    %c0_93 = arith.constant 0 : index
    %178 = vector.load %arg23[%c0_92, %c0_93] : memref<1x512xf32, #tpu.memory_space<vmem>>, vector<1x512xf32>
    %179 = vector.broadcast %178 : vector<1x512xf32> to vector<2x512xf32>
    %180 = arith.addf %177, %179 : vector<2x512xf32>
    %181 = vector.extract_strided_slice %180 {offsets = [0, 0], sizes = [2, 128], strides = [1, 1]} : vector<2x512xf32> to vector<2x128xf32>
    %182 = arith.truncf %181 : vector<2x128xf32> to vector<2x128xbf16>
    %c0_94 = arith.constant 0 : index
    %c0_95 = arith.constant 0 : index
    %183 = vector.load %arg35[%c0_94, %c0_95] : memref<8x128xbf16, #tpu.memory_space<vmem>>, vector<2x128xbf16>
    tpu.vector_store %arg35[%c0_94, %c0_95], %182 {strides = array<i32>} : memref<8x128xbf16, #tpu.memory_space<vmem>>, vector<2x128xbf16>,
    %184 = vector.extract_strided_slice %180 {offsets = [0, 128], sizes = [2, 128], strides = [1, 1]} : vector<2x512xf32> to vector<2x128xf32>
    %185 = arith.truncf %184 : vector<2x128xf32> to vector<2x128xbf16>
    %c2 = arith.constant 2 : index
    %c0_96 = arith.constant 0 : index
    %186 = vector.load %arg35[%c2, %c0_96] : memref<8x128xbf16, #tpu.memory_space<vmem>>, vector<2x128xbf16>
    tpu.vector_store %arg35[%c2, %c0_96], %185 {strides = array<i32>} : memref<8x128xbf16, #tpu.memory_space<vmem>>, vector<2x128xbf16>,
    %187 = vector.extract_strided_slice %180 {offsets = [0, 256], sizes = [2, 128], strides = [1, 1]} : vector<2x512xf32> to vector<2x128xf32>
    %188 = arith.truncf %187 : vector<2x128xf32> to vector<2x128xbf16>
    %c4 = arith.constant 4 : index
    %c0_97 = arith.constant 0 : index
    %189 = vector.load %arg35[%c4, %c0_97] : memref<8x128xbf16, #tpu.memory_space<vmem>>, vector<2x128xbf16>
    tpu.vector_store %arg35[%c4, %c0_97], %188 {strides = array<i32>} : memref<8x128xbf16, #tpu.memory_space<vmem>>, vector<2x128xbf16>,
    %190 = vector.extract_strided_slice %180 {offsets = [0, 384], sizes = [2, 128], strides = [1, 1]} : vector<2x512xf32> to vector<2x128xf32>
    %191 = arith.truncf %190 : vector<2x128xf32> to vector<2x128xbf16>
    %c6 = arith.constant 6 : index
    %c0_98 = arith.constant 0 : index
    %192 = vector.load %arg35[%c6, %c0_98] : memref<8x128xbf16, #tpu.memory_space<vmem>>, vector<2x128xbf16>
    tpu.vector_store %arg35[%c6, %c0_98], %191 {strides = array<i32>} : memref<8x128xbf16, #tpu.memory_space<vmem>>, vector<2x128xbf16>,
    %c0_99 = arith.constant 0 : index
    %c0_100 = arith.constant 0 : index
    %193 = vector.load %arg35[%c0_99, %c0_100] : memref<8x128xbf16, #tpu.memory_space<vmem>>, vector<8x128xbf16>
    %c0_101 = arith.constant 0 : index
    %c0_102 = arith.constant 0 : index
    %194 = vector.load %arg24[%c0_101, %c0_102] : memref<64x8xbf16, #tpu.memory_space<vmem>>, vector<64x8xbf16>
    %c0_103 = arith.constant 0 : index
    %c0_104 = arith.constant 0 : index
    %195 = vector.load %arg25[%c0_103, %c0_104] : memref<512x128xbf16, #tpu.memory_space<vmem>>, vector<512x128xbf16>
    %196 = vector.extract_strided_slice %194 {offsets = [0, 0], sizes = [16, 8], strides = [1, 1]} : vector<64x8xbf16> to vector<16x8xbf16>
    %cst_105 = arith.constant dense<0.000000e+00> : vector<16x128xf32>
    %197 = tpu.matmul %196, %193, %cst_105 {dimension_numbers = #tpu.dot_dimension_numbers<[1], [0], [0], [1], [0, 0, 1, 1], [], []>} : vector<16x8xbf16>, vector<8x128xbf16>, vector<16x128xf32> -> vector<16x128xf32>
    %198 = arith.truncf %197 : vector<16x128xf32> to vector<16x128xbf16>
    %199 = vector.extract_strided_slice %195 {offsets = [0, 0], sizes = [128, 128], strides = [1, 1]} : vector<512x128xbf16> to vector<128x128xbf16>
    %cst_106 = arith.constant dense<0.000000e+00> : vector<16x128xf32>
    %200 = tpu.matmul %198, %199, %cst_106 {dimension_numbers = #tpu.dot_dimension_numbers<[1], [0], [0], [1], [0, 0, 1, 1], [], []>} : vector<16x128xbf16>, vector<128x128xbf16>, vector<16x128xf32> -> vector<16x128xf32>
    %201 = vector.extract_strided_slice %194 {offsets = [16, 0], sizes = [16, 8], strides = [1, 1]} : vector<64x8xbf16> to vector<16x8xbf16>
    %cst_107 = arith.constant dense<0.000000e+00> : vector<16x128xf32>
    %202 = tpu.matmul %201, %193, %cst_107 {dimension_numbers = #tpu.dot_dimension_numbers<[1], [0], [0], [1], [0, 0, 1, 1], [], []>} : vector<16x8xbf16>, vector<8x128xbf16>, vector<16x128xf32> -> vector<16x128xf32>
    %203 = arith.truncf %202 : vector<16x128xf32> to vector<16x128xbf16>
    %204 = vector.extract_strided_slice %195 {offsets = [128, 0], sizes = [128, 128], strides = [1, 1]} : vector<512x128xbf16> to vector<128x128xbf16>
    %cst_108 = arith.constant dense<0.000000e+00> : vector<16x128xf32>
    %205 = tpu.matmul %203, %204, %cst_108 {dimension_numbers = #tpu.dot_dimension_numbers<[1], [0], [0], [1], [0, 0, 1, 1], [], []>} : vector<16x128xbf16>, vector<128x128xbf16>, vector<16x128xf32> -> vector<16x128xf32>
    %206 = arith.addf %200, %205 : vector<16x128xf32>
    %207 = vector.extract_strided_slice %194 {offsets = [32, 0], sizes = [16, 8], strides = [1, 1]} : vector<64x8xbf16> to vector<16x8xbf16>
    %cst_109 = arith.constant dense<0.000000e+00> : vector<16x128xf32>
    %208 = tpu.matmul %207, %193, %cst_109 {dimension_numbers = #tpu.dot_dimension_numbers<[1], [0], [0], [1], [0, 0, 1, 1], [], []>} : vector<16x8xbf16>, vector<8x128xbf16>, vector<16x128xf32> -> vector<16x128xf32>
    %209 = arith.truncf %208 : vector<16x128xf32> to vector<16x128xbf16>
    %210 = vector.extract_strided_slice %195 {offsets = [256, 0], sizes = [128, 128], strides = [1, 1]} : vector<512x128xbf16> to vector<128x128xbf16>
    %cst_110 = arith.constant dense<0.000000e+00> : vector<16x128xf32>
    %211 = tpu.matmul %209, %210, %cst_110 {dimension_numbers = #tpu.dot_dimension_numbers<[1], [0], [0], [1], [0, 0, 1, 1], [], []>} : vector<16x128xbf16>, vector<128x128xbf16>, vector<16x128xf32> -> vector<16x128xf32>
    %212 = arith.addf %206, %211 : vector<16x128xf32>
    %213 = vector.extract_strided_slice %194 {offsets = [48, 0], sizes = [16, 8], strides = [1, 1]} : vector<64x8xbf16> to vector<16x8xbf16>
    %cst_111 = arith.constant dense<0.000000e+00> : vector<16x128xf32>
    %214 = tpu.matmul %213, %193, %cst_111 {dimension_numbers = #tpu.dot_dimension_numbers<[1], [0], [0], [1], [0, 0, 1, 1], [], []>} : vector<16x8xbf16>, vector<8x128xbf16>, vector<16x128xf32> -> vector<16x128xf32>
    %215 = arith.truncf %214 : vector<16x128xf32> to vector<16x128xbf16>
    %216 = vector.extract_strided_slice %195 {offsets = [384, 0], sizes = [128, 128], strides = [1, 1]} : vector<512x128xbf16> to vector<128x128xbf16>
    %cst_112 = arith.constant dense<0.000000e+00> : vector<16x128xf32>
    %217 = tpu.matmul %215, %216, %cst_112 {dimension_numbers = #tpu.dot_dimension_numbers<[1], [0], [0], [1], [0, 0, 1, 1], [], []>} : vector<16x128xbf16>, vector<128x128xbf16>, vector<16x128xf32> -> vector<16x128xf32>
    %218 = arith.addf %212, %217 : vector<16x128xf32>
    %c0_113 = arith.constant 0 : index
    %c0_114 = arith.constant 0 : index
    %219 = vector.load %arg26[%c0_113, %c0_114] : memref<1x128xf32, #tpu.memory_space<vmem>>, vector<1x128xf32>
    %220 = vector.broadcast %219 : vector<1x128xf32> to vector<16x128xf32>
    %221 = arith.addf %218, %220 : vector<16x128xf32>
    %cst_115 = arith.constant 0.000000e+00 : f32
    %222 = vector.broadcast %cst_115 : f32 to vector<16x128xf32>
    %223 = arith.cmpf oge, %221, %222 : vector<16x128xf32>
    %cst_116 = arith.constant 0.00999999977 : f32
    %224 = vector.broadcast %cst_116 : f32 to vector<16x128xf32>
    %225 = arith.mulf %224, %221 : vector<16x128xf32>
    %226 = arith.select %223, %221, %225 : vector<16x128xi1>, vector<16x128xf32>
    %227 = arith.truncf %226 : vector<16x128xf32> to vector<16x128xbf16>
    %c0_117 = arith.constant 0 : index
    %c0_118 = arith.constant 0 : index
    %228 = vector.load %arg27[%c0_117, %c0_118] : memref<128x16xbf16, #tpu.memory_space<vmem>>, vector<128x16xbf16>
    %c0_119 = arith.constant 0 : index
    %c0_120 = arith.constant 0 : index
    %229 = vector.load %arg28[%c0_119, %c0_120] : memref<512x128xbf16, #tpu.memory_space<vmem>>, vector<512x128xbf16>
    %230 = vector.extract_strided_slice %228 {offsets = [0, 0], sizes = [32, 16], strides = [1, 1]} : vector<128x16xbf16> to vector<32x16xbf16>
    %cst_121 = arith.constant dense<0.000000e+00> : vector<32x128xf32>
    %231 = tpu.matmul %230, %227, %cst_121 {dimension_numbers = #tpu.dot_dimension_numbers<[1], [0], [0], [1], [0, 0, 1, 1], [], []>} : vector<32x16xbf16>, vector<16x128xbf16>, vector<32x128xf32> -> vector<32x128xf32>
    %232 = arith.truncf %231 : vector<32x128xf32> to vector<32x128xbf16>
    %233 = vector.extract_strided_slice %229 {offsets = [0, 0], sizes = [128, 128], strides = [1, 1]} : vector<512x128xbf16> to vector<128x128xbf16>
    %cst_122 = arith.constant dense<0.000000e+00> : vector<32x128xf32>
    %234 = tpu.matmul %232, %233, %cst_122 {dimension_numbers = #tpu.dot_dimension_numbers<[1], [0], [0], [1], [0, 0, 1, 1], [], []>} : vector<32x128xbf16>, vector<128x128xbf16>, vector<32x128xf32> -> vector<32x128xf32>
    %235 = vector.extract_strided_slice %228 {offsets = [32, 0], sizes = [32, 16], strides = [1, 1]} : vector<128x16xbf16> to vector<32x16xbf16>
    %cst_123 = arith.constant dense<0.000000e+00> : vector<32x128xf32>
    %236 = tpu.matmul %235, %227, %cst_123 {dimension_numbers = #tpu.dot_dimension_numbers<[1], [0], [0], [1], [0, 0, 1, 1], [], []>} : vector<32x16xbf16>, vector<16x128xbf16>, vector<32x128xf32> -> vector<32x128xf32>
    %237 = arith.truncf %236 : vector<32x128xf32> to vector<32x128xbf16>
    %238 = vector.extract_strided_slice %229 {offsets = [128, 0], sizes = [128, 128], strides = [1, 1]} : vector<512x128xbf16> to vector<128x128xbf16>
    %cst_124 = arith.constant dense<0.000000e+00> : vector<32x128xf32>
    %239 = tpu.matmul %237, %238, %cst_124 {dimension_numbers = #tpu.dot_dimension_numbers<[1], [0], [0], [1], [0, 0, 1, 1], [], []>} : vector<32x128xbf16>, vector<128x128xbf16>, vector<32x128xf32> -> vector<32x128xf32>
    %240 = arith.addf %234, %239 : vector<32x128xf32>
    %241 = vector.extract_strided_slice %228 {offsets = [64, 0], sizes = [32, 16], strides = [1, 1]} : vector<128x16xbf16> to vector<32x16xbf16>
    %cst_125 = arith.constant dense<0.000000e+00> : vector<32x128xf32>
    %242 = tpu.matmul %241, %227, %cst_125 {dimension_numbers = #tpu.dot_dimension_numbers<[1], [0], [0], [1], [0, 0, 1, 1], [], []>} : vector<32x16xbf16>, vector<16x128xbf16>, vector<32x128xf32> -> vector<32x128xf32>
    %243 = arith.truncf %242 : vector<32x128xf32> to vector<32x128xbf16>
    %244 = vector.extract_strided_slice %229 {offsets = [256, 0], sizes = [128, 128], strides = [1, 1]} : vector<512x128xbf16> to vector<128x128xbf16>
    %cst_126 = arith.constant dense<0.000000e+00> : vector<32x128xf32>
    %245 = tpu.matmul %243, %244, %cst_126 {dimension_numbers = #tpu.dot_dimension_numbers<[1], [0], [0], [1], [0, 0, 1, 1], [], []>} : vector<32x128xbf16>, vector<128x128xbf16>, vector<32x128xf32> -> vector<32x128xf32>
    %246 = arith.addf %240, %245 : vector<32x128xf32>
    %247 = vector.extract_strided_slice %228 {offsets = [96, 0], sizes = [32, 16], strides = [1, 1]} : vector<128x16xbf16> to vector<32x16xbf16>
    %cst_127 = arith.constant dense<0.000000e+00> : vector<32x128xf32>
    %248 = tpu.matmul %247, %227, %cst_127 {dimension_numbers = #tpu.dot_dimension_numbers<[1], [0], [0], [1], [0, 0, 1, 1], [], []>} : vector<32x16xbf16>, vector<16x128xbf16>, vector<32x128xf32> -> vector<32x128xf32>
    %249 = arith.truncf %248 : vector<32x128xf32> to vector<32x128xbf16>
    %250 = vector.extract_strided_slice %229 {offsets = [384, 0], sizes = [128, 128], strides = [1, 1]} : vector<512x128xbf16> to vector<128x128xbf16>
    %cst_128 = arith.constant dense<0.000000e+00> : vector<32x128xf32>
    %251 = tpu.matmul %249, %250, %cst_128 {dimension_numbers = #tpu.dot_dimension_numbers<[1], [0], [0], [1], [0, 0, 1, 1], [], []>} : vector<32x128xbf16>, vector<128x128xbf16>, vector<32x128xf32> -> vector<32x128xf32>
    %252 = arith.addf %246, %251 : vector<32x128xf32>
    %c0_129 = arith.constant 0 : index
    %c0_130 = arith.constant 0 : index
    %253 = vector.load %arg29[%c0_129, %c0_130] : memref<1x128xf32, #tpu.memory_space<vmem>>, vector<1x128xf32>
    %254 = vector.broadcast %253 : vector<1x128xf32> to vector<32x128xf32>
    %255 = arith.addf %252, %254 : vector<32x128xf32>
    %cst_131 = arith.constant 0.000000e+00 : f32
    %256 = vector.broadcast %cst_131 : f32 to vector<32x128xf32>
    %257 = arith.cmpf oge, %255, %256 : vector<32x128xf32>
    %cst_132 = arith.constant 0.00999999977 : f32
    %258 = vector.broadcast %cst_132 : f32 to vector<32x128xf32>
    %259 = arith.mulf %258, %255 : vector<32x128xf32>
    %260 = arith.select %257, %255, %259 : vector<32x128xi1>, vector<32x128xf32>
    %261 = arith.truncf %260 : vector<32x128xf32> to vector<32x128xbf16>
    %c0_133 = arith.constant 0 : index
    %c0_134 = arith.constant 0 : index
    %262 = vector.load %arg30[%c0_133, %c0_134] : memref<256x32xbf16, #tpu.memory_space<vmem>>, vector<256x32xbf16>
    %c0_135 = arith.constant 0 : index
    %c0_136 = arith.constant 0 : index
    %263 = vector.load %arg31[%c0_135, %c0_136] : memref<512x96xbf16, #tpu.memory_space<vmem>>, vector<512x96xbf16>
    %264 = vector.extract_strided_slice %262 {offsets = [0, 0], sizes = [64, 32], strides = [1, 1]} : vector<256x32xbf16> to vector<64x32xbf16>
    %cst_137 = arith.constant dense<0.000000e+00> : vector<64x128xf32>
    %265 = tpu.matmul %264, %261, %cst_137 {dimension_numbers = #tpu.dot_dimension_numbers<[1], [0], [0], [1], [0, 0, 1, 1], [], []>} : vector<64x32xbf16>, vector<32x128xbf16>, vector<64x128xf32> -> vector<64x128xf32>
    %266 = arith.truncf %265 : vector<64x128xf32> to vector<64x128xbf16>
    %267 = vector.extract_strided_slice %263 {offsets = [0, 0], sizes = [128, 96], strides = [1, 1]} : vector<512x96xbf16> to vector<128x96xbf16>
    %cst_138 = arith.constant dense<0.000000e+00> : vector<64x96xf32>
    %268 = tpu.matmul %266, %267, %cst_138 {dimension_numbers = #tpu.dot_dimension_numbers<[1], [0], [0], [1], [0, 0, 1, 1], [], []>} : vector<64x128xbf16>, vector<128x96xbf16>, vector<64x96xf32> -> vector<64x96xf32>
    %269 = vector.extract_strided_slice %262 {offsets = [64, 0], sizes = [64, 32], strides = [1, 1]} : vector<256x32xbf16> to vector<64x32xbf16>
    %cst_139 = arith.constant dense<0.000000e+00> : vector<64x128xf32>
    %270 = tpu.matmul %269, %261, %cst_139 {dimension_numbers = #tpu.dot_dimension_numbers<[1], [0], [0], [1], [0, 0, 1, 1], [], []>} : vector<64x32xbf16>, vector<32x128xbf16>, vector<64x128xf32> -> vector<64x128xf32>
    %271 = arith.truncf %270 : vector<64x128xf32> to vector<64x128xbf16>
    %272 = vector.extract_strided_slice %263 {offsets = [128, 0], sizes = [128, 96], strides = [1, 1]} : vector<512x96xbf16> to vector<128x96xbf16>
    %cst_140 = arith.constant dense<0.000000e+00> : vector<64x96xf32>
    %273 = tpu.matmul %271, %272, %cst_140 {dimension_numbers = #tpu.dot_dimension_numbers<[1], [0], [0], [1], [0, 0, 1, 1], [], []>} : vector<64x128xbf16>, vector<128x96xbf16>, vector<64x96xf32> -> vector<64x96xf32>
    %274 = arith.addf %268, %273 : vector<64x96xf32>
    %275 = vector.extract_strided_slice %262 {offsets = [128, 0], sizes = [64, 32], strides = [1, 1]} : vector<256x32xbf16> to vector<64x32xbf16>
    %cst_141 = arith.constant dense<0.000000e+00> : vector<64x128xf32>
    %276 = tpu.matmul %275, %261, %cst_141 {dimension_numbers = #tpu.dot_dimension_numbers<[1], [0], [0], [1], [0, 0, 1, 1], [], []>} : vector<64x32xbf16>, vector<32x128xbf16>, vector<64x128xf32> -> vector<64x128xf32>
    %277 = arith.truncf %276 : vector<64x128xf32> to vector<64x128xbf16>
    %278 = vector.extract_strided_slice %263 {offsets = [256, 0], sizes = [128, 96], strides = [1, 1]} : vector<512x96xbf16> to vector<128x96xbf16>
    %cst_142 = arith.constant dense<0.000000e+00> : vector<64x96xf32>
    %279 = tpu.matmul %277, %278, %cst_142 {dimension_numbers = #tpu.dot_dimension_numbers<[1], [0], [0], [1], [0, 0, 1, 1], [], []>} : vector<64x128xbf16>, vector<128x96xbf16>, vector<64x96xf32> -> vector<64x96xf32>
    %280 = arith.addf %274, %279 : vector<64x96xf32>
    %281 = vector.extract_strided_slice %262 {offsets = [192, 0], sizes = [64, 32], strides = [1, 1]} : vector<256x32xbf16> to vector<64x32xbf16>
    %cst_143 = arith.constant dense<0.000000e+00> : vector<64x128xf32>
    %282 = tpu.matmul %281, %261, %cst_143 {dimension_numbers = #tpu.dot_dimension_numbers<[1], [0], [0], [1], [0, 0, 1, 1], [], []>} : vector<64x32xbf16>, vector<32x128xbf16>, vector<64x128xf32> -> vector<64x128xf32>
    %283 = arith.truncf %282 : vector<64x128xf32> to vector<64x128xbf16>
    %284 = vector.extract_strided_slice %263 {offsets = [384, 0], sizes = [128, 96], strides = [1, 1]} : vector<512x96xbf16> to vector<128x96xbf16>
    %cst_144 = arith.constant dense<0.000000e+00> : vector<64x96xf32>
    %285 = tpu.matmul %283, %284, %cst_144 {dimension_numbers = #tpu.dot_dimension_numbers<[1], [0], [0], [1], [0, 0, 1, 1], [], []>} : vector<64x128xbf16>, vector<128x96xbf16>, vector<64x96xf32> -> vector<64x96xf32>
    %286 = arith.addf %280, %285 : vector<64x96xf32>
    %c0_145 = arith.constant 0 : index
    %c0_146 = arith.constant 0 : index
    %287 = vector.load %arg32[%c0_145, %c0_146] : memref<1x96xf32, #tpu.memory_space<vmem>>, vector<1x96xf32>
    %288 = vector.broadcast %287 : vector<1x96xf32> to vector<64x96xf32>
    %289 = arith.addf %286, %288 : vector<64x96xf32>
    %cst_147 = arith.constant 0.000000e+00 : f32
    %290 = vector.broadcast %cst_147 : f32 to vector<64x96xf32>
    %291 = arith.subf %290, %289 : vector<64x96xf32>
    %292 = math.exp %291 : vector<64x96xf32>
    %cst_148 = arith.constant 1.000000e+00 : f32
    %293 = vector.broadcast %cst_148 : f32 to vector<64x96xf32>
    %294 = arith.addf %293, %292 : vector<64x96xf32>
    %cst_149 = arith.constant 1.000000e+00 : f32
    %295 = vector.broadcast %cst_149 : f32 to vector<64x96xf32>
    %296 = arith.divf %295, %294 : vector<64x96xf32>
    %c0_150 = arith.constant 0 : index
    %c0_151 = arith.constant 0 : index
    %297 = vector.load %arg34[%c0_150, %c0_151] : memref<64x96xf32, #tpu.memory_space<vmem>>, vector<64x96xf32>
    tpu.vector_store %arg34[%c0_150, %c0_151], %296 {strides = array<i32>} : memref<64x96xf32, #tpu.memory_space<vmem>>, vector<64x96xf32>,
    return
  }
  func.func @transform_0(%arg0: i32) -> (i32, i32) {
    %c0_i32 = arith.constant 0 : i32
    %c0_i32_0 = arith.constant 0 : i32
    %c0_i32_1 = arith.constant 0 : i32
    return %c0_i32, %c0_i32_0 : i32, i32
  }
  func.func @transform_1(%arg0: i32) -> (i32, i32) {
    %c0_i32 = arith.constant 0 : i32
    %c0_i32_0 = arith.constant 0 : i32
    %c0_i32_1 = arith.constant 0 : i32
    return %c0_i32, %c0_i32_0 : i32, i32
  }
  func.func @transform_2(%arg0: i32) -> (i32, i32) {
    %c0_i32 = arith.constant 0 : i32
    %c0_i32_0 = arith.constant 0 : i32
    %c0_i32_1 = arith.constant 0 : i32
    return %c0_i32, %c0_i32_0 : i32, i32
  }
  func.func @transform_3(%arg0: i32) -> (i32, i32) {
    %c0_i32 = arith.constant 0 : i32
    %c0_i32_0 = arith.constant 0 : i32
    %c0_i32_1 = arith.constant 0 : i32
    return %c0_i32, %c0_i32_0 : i32, i32
  }
  func.func @transform_4(%arg0: i32) -> (i32, i32) {
    %c0_i32 = arith.constant 0 : i32
    %c0_i32_0 = arith.constant 0 : i32
    %c0_i32_1 = arith.constant 0 : i32
    return %c0_i32, %c0_i32_0 : i32, i32
  }
  func.func @transform_5(%arg0: i32) -> (i32, i32) {
    %c0_i32 = arith.constant 0 : i32
    %c0_i32_0 = arith.constant 0 : i32
    %c0_i32_1 = arith.constant 0 : i32
    return %c0_i32, %c0_i32_0 : i32, i32
  }
  func.func @transform_6(%arg0: i32) -> (i32, i32) {
    %c0_i32 = arith.constant 0 : i32
    %c0_i32_0 = arith.constant 0 : i32
    %c0_i32_1 = arith.constant 0 : i32
    return %c0_i32, %c0_i32_0 : i32, i32
  }
  func.func @transform_7(%arg0: i32) -> (i32, i32) {
    %c0_i32 = arith.constant 0 : i32
    %c0_i32_0 = arith.constant 0 : i32
    %c0_i32_1 = arith.constant 0 : i32
    return %c0_i32, %c0_i32_0 : i32, i32
  }
  func.func @transform_8(%arg0: i32) -> (i32, i32) {
    %c0_i32 = arith.constant 0 : i32
    %c0_i32_0 = arith.constant 0 : i32
    %c0_i32_1 = arith.constant 0 : i32
    return %c0_i32, %c0_i32_0 : i32, i32
  }
  func.func @transform_9(%arg0: i32) -> (i32, i32) {
    %c0_i32 = arith.constant 0 : i32
    %c0_i32_0 = arith.constant 0 : i32
    %c0_i32_1 = arith.constant 0 : i32
    return %c0_i32, %c0_i32_0 : i32, i32
  }
  func.func @transform_10(%arg0: i32) -> (i32, i32) {
    %c0_i32 = arith.constant 0 : i32
    %c0_i32_0 = arith.constant 0 : i32
    %c0_i32_1 = arith.constant 0 : i32
    return %c0_i32, %c0_i32_0 : i32, i32
  }
  func.func @transform_11(%arg0: i32) -> (i32, i32) {
    %c0_i32 = arith.constant 0 : i32
    %c0_i32_0 = arith.constant 0 : i32
    %c0_i32_1 = arith.constant 0 : i32
    return %c0_i32, %c0_i32_0 : i32, i32
  }
  func.func @transform_12(%arg0: i32) -> (i32, i32) {
    %c0_i32 = arith.constant 0 : i32
    %c0_i32_0 = arith.constant 0 : i32
    %c0_i32_1 = arith.constant 0 : i32
    return %c0_i32, %c0_i32_0 : i32, i32
  }
  func.func @transform_13(%arg0: i32) -> (i32, i32) {
    %c0_i32 = arith.constant 0 : i32
    %c0_i32_0 = arith.constant 0 : i32
    %c0_i32_1 = arith.constant 0 : i32
    return %c0_i32, %c0_i32_0 : i32, i32
  }
  func.func @transform_14(%arg0: i32) -> (i32, i32) {
    %c0_i32 = arith.constant 0 : i32
    %c0_i32_0 = arith.constant 0 : i32
    %c0_i32_1 = arith.constant 0 : i32
    return %c0_i32, %c0_i32_0 : i32, i32
  }
  func.func @transform_15(%arg0: i32) -> (i32, i32) {
    %c0_i32 = arith.constant 0 : i32
    %c0_i32_0 = arith.constant 0 : i32
    %c0_i32_1 = arith.constant 0 : i32
    return %c0_i32, %c0_i32_0 : i32, i32
  }
  func.func @transform_16(%arg0: i32) -> (i32, i32) {
    %c0_i32 = arith.constant 0 : i32
    %c0_i32_0 = arith.constant 0 : i32
    %c0_i32_1 = arith.constant 0 : i32
    return %c0_i32, %c0_i32_0 : i32, i32
  }
  func.func @transform_17(%arg0: i32) -> (i32, i32) {
    %c0_i32 = arith.constant 0 : i32
    %c0_i32_0 = arith.constant 0 : i32
    %c0_i32_1 = arith.constant 0 : i32
    return %c0_i32, %c0_i32_0 : i32, i32
  }
  func.func @transform_18(%arg0: i32) -> (i32, i32) {
    %c0_i32 = arith.constant 0 : i32
    %c0_i32_0 = arith.constant 0 : i32
    %c0_i32_1 = arith.constant 0 : i32
    return %c0_i32, %c0_i32_0 : i32, i32
  }
  func.func @transform_19(%arg0: i32) -> (i32, i32) {
    %c0_i32 = arith.constant 0 : i32
    %c0_i32_0 = arith.constant 0 : i32
    %c0_i32_1 = arith.constant 0 : i32
    return %c0_i32, %c0_i32_0 : i32, i32
  }
  func.func @transform_20(%arg0: i32) -> (i32, i32) {
    %c0_i32 = arith.constant 0 : i32
    %c0_i32_0 = arith.constant 0 : i32
    %c0_i32_1 = arith.constant 0 : i32
    return %c0_i32, %c0_i32_0 : i32, i32
  }
  func.func @transform_21(%arg0: i32) -> (i32, i32) {
    %c0_i32 = arith.constant 0 : i32
    %c0_i32_0 = arith.constant 0 : i32
    %c0_i32_1 = arith.constant 0 : i32
    return %c0_i32, %c0_i32_0 : i32, i32
  }
  func.func @transform_22(%arg0: i32) -> (i32, i32) {
    %c0_i32 = arith.constant 0 : i32
    %c0_i32_0 = arith.constant 0 : i32
    %c0_i32_1 = arith.constant 0 : i32
    return %c0_i32, %c0_i32_0 : i32, i32
  }
  func.func @transform_23(%arg0: i32) -> (i32, i32) {
    %c0_i32 = arith.constant 0 : i32
    %c0_i32_0 = arith.constant 0 : i32
    %c0_i32_1 = arith.constant 0 : i32
    return %c0_i32, %c0_i32_0 : i32, i32
  }
  func.func @transform_24(%arg0: i32) -> (i32, i32) {
    %c0_i32 = arith.constant 0 : i32
    %c0_i32_0 = arith.constant 0 : i32
    %c0_i32_1 = arith.constant 0 : i32
    return %c0_i32, %c0_i32_0 : i32, i32
  }
  func.func @transform_25(%arg0: i32) -> (i32, i32) {
    %c0_i32 = arith.constant 0 : i32
    %c0_i32_0 = arith.constant 0 : i32
    %c0_i32_1 = arith.constant 0 : i32
    return %c0_i32, %c0_i32_0 : i32, i32
  }
  func.func @transform_26(%arg0: i32) -> (i32, i32) {
    %c0_i32 = arith.constant 0 : i32
    %c0_i32_0 = arith.constant 0 : i32
    %c0_i32_1 = arith.constant 0 : i32
    return %c0_i32, %c0_i32_0 : i32, i32
  }
  func.func @transform_27(%arg0: i32) -> (i32, i32) {
    %c0_i32 = arith.constant 0 : i32
    %c0_i32_0 = arith.constant 0 : i32
    %c0_i32_1 = arith.constant 0 : i32
    return %c0_i32, %c0_i32_0 : i32, i32
  }
  func.func @transform_28(%arg0: i32) -> (i32, i32) {
    %c0_i32 = arith.constant 0 : i32
    %c0_i32_0 = arith.constant 0 : i32
    %c0_i32_1 = arith.constant 0 : i32
    return %c0_i32, %c0_i32_0 : i32, i32
  }
  func.func @transform_29(%arg0: i32) -> (i32, i32) {
    %c0_i32 = arith.constant 0 : i32
    %c0_i32_0 = arith.constant 0 : i32
    %c0_i32_1 = arith.constant 0 : i32
    return %c0_i32, %c0_i32_0 : i32, i32
  }
  func.func @transform_30(%arg0: i32) -> (i32, i32) {
    %c0_i32 = arith.constant 0 : i32
    %c0_i32_0 = arith.constant 0 : i32
    %c0_i32_1 = arith.constant 0 : i32
    return %c0_i32, %c0_i32_0 : i32, i32
  }
  func.func @transform_31(%arg0: i32) -> (i32, i32) {
    %c0_i32 = arith.constant 0 : i32
    %c0_i32_0 = arith.constant 0 : i32
    %c0_i32_1 = arith.constant 0 : i32
    return %c0_i32, %c0_i32_0 : i32, i32
  }
  func.func @transform_32(%arg0: i32) -> (i32, i32) {
    %c0_i32 = arith.constant 0 : i32
    %c0_i32_0 = arith.constant 0 : i32
    %c0_i32_1 = arith.constant 0 : i32
    return %c0_i32, %c0_i32_0 : i32, i32
  }
  func.func @transform_33(%arg0: i32) -> (i32, i32) {
    %c0_i32 = arith.constant 0 : i32
    %c0_i32_0 = arith.constant 0 : i32
    %c0_i32_1 = arith.constant 0 : i32
    return %c0_i32, %c0_i32_0 : i32, i32
  }
}

</mosaic_0001>

<bundles_post_ra>
// kernel: diag_conv_vae_forward.1
= control target key start
LH: loop header
LB: loop body
LE: loop exit
PB: predicated region body
PF: predicated region fallthrough
CT: control target
= control target key end

     0   :  { %s8428_s6 = smov 2   ;;  %s8429_s10 = smov 3   ;;  %vm244_vm0 = vcmask 523264   ;;  %vm405_vm1 = vcmask 785408   ;;  %vm8432_vm2 = vmmov 0   ;;  %vm978_vm7 = vcmask 261120   ;;  %s9334_s0 = inlined_call_operand.smem [shape: u32[34], index: -1, kind: input, shape index: {}] }
   0x1   :  { %s1_s5 = sld [smem:[%s9334_s0]]   ;;  %s8431_s14 = smov 5   ;;  %vm1618_vm10 = vcmask 130048   ;;  %vm3107_vm15 = vcmask 1044480  }
   0x2   :  { %s8475_s9 = sld [smem:[%s9334_s0 + %s8428_s6]]   ;;  %s8433_s18 = smov 6  }
   0x3   :  { %s8482_s13 = sld [smem:[%s9334_s0 + %s8429_s10]]   ;;  %s8434_s22 = smov 4  }
   0x4   :  { %s8575_s17 = sld [smem:[%s9334_s0 + %s8431_s14]]   ;;  %s8435_s26 = smov 9  }
   0x5   :  { %s8584_s21 = sld [smem:[%s9334_s0 + %s8433_s18]]   ;;  %s8436_s30 = smov 7  }
   0x6   :  { %s6296_s25 = sld [smem:[%s9334_s0 + %s8434_s22]]   ;;  %s8437_s4 = smov 8  }
   0x7   :  { %v8477_v0 = vld [vmem:[%s1_s5] sm:$0xff]   ;;  %v8484_v1 = vld [vmem:[%s1_s5 + $0x8] sm:$0xff]   ;;  %v8489_v2 = vld [vmem:[%s1_s5 + $0x10] sm:$0xff]   ;;  %s8700_s29 = sld [smem:[%s9334_s0 + %s8435_s26]]   ;;  %s8438_s8 = smov 11  }
   0x8   :  { %7151 = vmatprep.subr.bf16.mxu1 %v8477_v0  ;;  %7139 = vmatprep.subr.bf16.mxu0 %v8477_v0  ;;  %v7913_v3 = vld [vmem:[%s8475_s9 + $0x10] sm:$0xff]   ;;  %v8499_v4 = vld [vmem:[%s1_s5 + $0x18] sm:$0xff]   ;;  %v7918_v5 = vld [vmem:[%s8475_s9] sm:$0xff]   ;;  %s6299_s3 = sld [smem:[%s9334_s0 + %s8436_s30]]   ;;  %s8440_s12 = smov 10  }
   0x9   :  { %7152 = vmatpush3.bf16.msra.mxu1 %v8477_v0  ;;  %7140 = vmatpush3.bf16.msra.mxu0 %v8477_v0  ;;  %v7915_v6 = vld [vmem:[%s8482_s13 + $0x30] sm:$0xff]   ;;  %v7914_v7 = vld [vmem:[%s8475_s9 + $0x18] sm:$0xff]   ;;  %v7919_v8 = vld [vmem:[%s8475_s9 + $0x8] sm:$0xff]   ;;  %s8722_s7 = sld [smem:[%s9334_s0 + %s8437_s4]]   ;;  %s8441_s16 = smov 13  }
   0xa   :  { %7153 = vmatprep.subr.bf16.mxu1 %v8484_v1  ;;  %7141 = vmatprep.subr.bf16.mxu0 %v8484_v1  ;;  %v7916_v9 = vld [vmem:[%s8482_s13 + $0x38] sm:$0xff]   ;;  %v7917_v10 = vld [vmem:[%s8482_s13 + $0x40] sm:$0xff]   ;;  %v7920_v11 = vld [vmem:[%s8482_s13 + $0x48] sm:$0xff]   ;;  %s8805_s11 = sld [smem:[%s9334_s0 + %s8438_s8]]   ;;  %s8442_s20 = smov 15  }
   0xb   :  { %7159 = vmatprep.mubr.msk.bf16.mxu1 %vm244_vm0, %v7913_v3  ;;  %7147 = vmatprep.mubr.msk.bf16.mxu0 %vm244_vm0, %v7918_v5  ;;  %v7921_v12 = vld [vmem:[%s8482_s13 + $0x50] sm:$0xff]   ;;  %v7922_v13 = vld [vmem:[%s8482_s13 + $0x58] sm:$0xff]   ;;  %v7927_v14 = vld [vmem:[%s8482_s13] sm:$0xff]   ;;  %s6302_s15 = sld [smem:[%s9334_s0 + %s8440_s12]]   ;;  %s8443_s24 = smov 12  }
   0xc   :  { %v7928_v15 = vld [vmem:[%s8482_s13 + $0x8] sm:$0xff]   ;;  %v7929_v16 = vld [vmem:[%s8482_s13 + $0x10] sm:$0xff]   ;;  %v7930_v17 = vld [vmem:[%s8482_s13 + $0x18] sm:$0xff]   ;;  %s6305_s19 = sld [smem:[%s9334_s0 + %s8441_s16]]   ;;  %s8444_s28 = smov 14  }
   0xd   :  { %7154 = vmatpush3.bf16.msra.mxu1 %v8484_v1  ;;  %7142 = vmatpush3.bf16.msra.mxu0 %v8484_v1  ;;  %v7931_v18 = vld [vmem:[%s8482_s13 + $0x20] sm:$0xff]   ;;  %v7932_v19 = vld [vmem:[%s8482_s13 + $0x28] sm:$0xff]   ;;  %v7925_v35 = vld [vmem:[%s8475_s9 + $0x30] sm:$0xff]   ;;  %s8895_s23 = sld [smem:[%s9334_s0 + %s8442_s20]]   ;;  %s8445_s2 = smov 17  }
   0xe   :  { %7155 = vmatprep.subr.bf16.mxu1 %v8489_v2  ;;  %7143 = vmatprep.subr.bf16.mxu0 %v8489_v2  ;;  %v7933_v20 = vld [vmem:[%s8482_s13 + $0x60] sm:$0xff]   ;;  %v7924_v34 = vld [vmem:[%s8475_s9 + $0x28] sm:$0xff]   ;;  %v7926_v36 = vld [vmem:[%s8475_s9 + $0x38] sm:$0xff]   ;;  %s6304_s27 = sld [smem:[%s9334_s0 + %s8443_s24]]   ;;  %s8446_s6 = smov 19  }
   0xf   :  { %v7923_v32 = vld [vmem:[%s8475_s9 + $0x20] sm:$0xff]   ;;  %v7934_v37 = vld [vmem:[%s8482_s13 + $0x68] sm:$0xff]   ;;  %v7935_v38 = vld [vmem:[%s8482_s13 + $0x70] sm:$0xff]   ;;  %s6306_s1 = sld [smem:[%s9334_s0 + %s8444_s28]]   ;;  %s8447_s10 = smov 16  }
  0x10   :  { %v7936_v39 = vld [vmem:[%s8482_s13 + $0x78] sm:$0xff]   ;;  %v7937_v40 = vld [vmem:[%s8482_s13 + $0x80] sm:$0xff]   ;;  %v7938_v41 = vld [vmem:[%s8482_s13 + $0x88] sm:$0xff]   ;;  %s6309_s5 = sld [smem:[%s9334_s0 + %s8445_s2]]   ;;  %s8448_s14 = smov 32  }
  0x11   :  { %7156 = vmatpush3.bf16.msra.mxu1 %v8489_v2  ;;  %7144 = vmatpush3.bf16.msra.mxu0 %v8489_v2  ;;  %v7939_v42 = vld [vmem:[%s8482_s13 + $0x90] sm:$0xff]   ;;  %v7940_v53 = vld [vmem:[%s8482_s13 + $0x98] sm:$0xff]   ;;  %v7941_v54 = vld [vmem:[%s8482_s13 + $0xa0] sm:$0xff]   ;;  %s8937_s9 = sld [smem:[%s9334_s0 + %s8446_s6]]   ;;  %s8449_s18 = smov 1  }
  0x12   :  { %7157 = vmatprep.subr.bf16.mxu1 %v8499_v4  ;;  %7145 = vmatprep.subr.bf16.mxu0 %v8499_v4  ;;  %v7942_v55 = vld [vmem:[%s8482_s13 + $0xa8] sm:$0xff]   ;;  %v7943_v58 = vld [vmem:[%s8482_s13 + $0xb0] sm:$0xff]   ;;  %v7944_v63 = vld [vmem:[%s8482_s13 + $0xb8] sm:$0xff]   ;;  %s6308_s13 = sld [smem:[%s9334_s0 + %s8447_s10]]   ;;  %s8450_s22 = smov 21  }
  0x13   :  { %s8451_s26 = smov 18   ;;  %s8452_s30 = smov 20  }
  0x14   :  { %s8453_s4 = smov 23   ;;  %s8454_s8 = smov 24  }
  0x15   :  { %7158 = vmatpush3.bf16.msra.mxu1 %v8499_v4  ;;  %7146 = vmatpush3.bf16.msra.mxu0 %v8499_v4  ;;  %s8455_s12 = smov 22   ;;  %s8456_s16 = smov 26  }
  0x16   :  { %7163 = vmatprep.subr.bf16.mxu1 %v7915_v6  ;;  %7179 = vmatprep.subr.bf16.mxu0 %v7927_v14  ;;  %s8457_s20 = smov 27   ;;  %s8458_s24 = smov 25  }
  0x17   :  { %s8459_s28 = smov 29   ;;  %s8460_s2 = smov 30  }
  0x18   :  { %7160 = vmatmul.mubr.msk.bf16.vlgmr.msra.gmra.mrb[0].mxu1 %vm244_vm0, %v7914_v7  ;;  %7148 = vmatmul.mubr.msk.bf16.vlgmr.msra.gmra.mrb[0].mxu0 %vm244_vm0, %v7919_v8  ;;  %s8461_s6 = smov 28   ;;  %s8462_s10 = smov 31  }
  0x19   :  { %7164 = vmatpush3.bf16.msra.mxu1 %v7915_v6  ;;  %7180 = vmatpush3.bf16.msra.mxu0 %v7927_v14 }
  0x1a   :  { %7165 = vmatprep.subr.bf16.mxu1 %v7916_v9  ;;  %7181 = vmatprep.subr.bf16.mxu0 %v7928_v15 }
  0x1d   :  { %7166 = vmatpush3.bf16.msra.mxu1 %v7916_v9  ;;  %7182 = vmatpush3.bf16.msra.mxu0 %v7928_v15 }
  0x1e   :  { %7167 = vmatprep.subr.bf16.mxu1 %v7917_v10  ;;  %7183 = vmatprep.subr.bf16.mxu0 %v7929_v16 }
  0x21   :  { %7168 = vmatpush3.bf16.msra.mxu1 %v7917_v10  ;;  %7184 = vmatpush3.bf16.msra.mxu0 %v7929_v16 }
  0x22   :  { %7169 = vmatprep.subr.bf16.mxu1 %v7920_v11  ;;  %7185 = vmatprep.subr.bf16.mxu0 %v7930_v17 }
  0x25   :  { %7170 = vmatpush3.bf16.msra.mxu1 %v7920_v11  ;;  %7186 = vmatpush3.bf16.msra.mxu0 %v7930_v17 }
  0x26   :  { %7171 = vmatprep.subr.bf16.mxu1 %v7921_v12  ;;  %7187 = vmatprep.subr.bf16.mxu0 %v7931_v18 }
  0x29   :  { %7172 = vmatpush3.bf16.msra.mxu1 %v7921_v12  ;;  %7188 = vmatpush3.bf16.msra.mxu0 %v7931_v18 }
  0x2a   :  { %7173 = vmatprep.subr.bf16.mxu1 %v7922_v13  ;;  %7189 = vmatprep.subr.bf16.mxu0 %v7932_v19 }
  0x2d   :  { %7174 = vmatpush3.bf16.msra.mxu1 %v7922_v13  ;;  %7190 = vmatpush3.bf16.msra.mxu0 %v7932_v19 }
  0x2e   :  { %7195 = vmatprep.subr.bf16.mxu1 %v8477_v0  ;;  %7207 = vmatprep.subr.bf16.mxu0 %v7933_v20 }
  0xeb   :  { %v7161_v21 = vpop.f32.mrb[0].mxu1  ;;  %v7149_v22 = vpop.f32.mrb[0].mxu0 }
  0xec   :  { %v352_v23 = vpop.f32.mrb[1].mxu1  ;;  %v285_v24 = vpop.f32.mrb[1].mxu0 }
  0xed   :  { %v7162_v25 = vpop.f32.mrb[2].mxu1  ;;  %v7150_v26 = vpop.f32.mrb[2].mxu0 }
  0xee   :  { %v368_v27 = vpack.c.bf16 %v7162_v25, %v7161_v21  ;;  %v355_v28 = vpop.f32.mrb[3].mxu1  ;;  %v301_v29 = vpack.c.bf16 %v7150_v26, %v7149_v22  ;;  %v288_v30 = vpop.f32.mrb[3].mxu0  ;;  %v7947_v25 = vld [vmem:[%s8575_s17 + $0x10] sm:$0xff]   ;;  %v7946_v26 = vld [vmem:[%s8575_s17 + $0x8] sm:$0xff]  }
  0xef   :  { %v367_v31 = vpack.c.bf16 %v355_v28, %v352_v23  ;;  %v300_v33 = vpack.c.bf16 %v288_v30, %v285_v24  ;;  %v7945_v24 = vld [vmem:[%s8575_s17] sm:$0xff]   ;;  %v7949_v28 = vld [vmem:[%s8584_s21 + $0x48] sm:$0xff]   ;;  %v7951_v30 = vld [vmem:[%s8584_s21 + $0x58] sm:$0xff]  }
  0xf1   :  { %7175 = vmatprep.mubr.msk.bf16.mxu1 %vm405_vm1, %v367_v31  ;;  %7191 = vmatprep.mubr.msk.bf16.mxu0 %vm405_vm1, %v300_v33  ;;  %v7952_v31 = vld [vmem:[%s8584_s21 + $0x60] sm:$0xff]   ;;  %v7954_v33 = vld [vmem:[%s8584_s21 + $0x70] sm:$0xff]  }
  0xf2   :  { %7176 = vmatmul.mubr.msk.bf16.vlgmr.msra.gmra.mrb[4].mxu1 %vm405_vm1, %v368_v27  ;;  %7192 = vmatmul.mubr.msk.bf16.vlgmr.msra.gmra.mrb[4].mxu0 %vm405_vm1, %v301_v29  ;;  %v7948_v27 = vld [vmem:[%s8584_s21 + $0x40] sm:$0xff]   ;;  %v7950_v29 = vld [vmem:[%s8584_s21 + $0x50] sm:$0xff]  }
  0xf3   :  { %7196 = vmatpush3.bf16.msra.mxu1 %v8477_v0  ;;  %7203 = vmatprep.mubr.msk.bf16.mxu1 %vm244_vm0, %v7923_v32  ;;  %v7953_v32 = vld [vmem:[%s8584_s21 + $0x68] sm:$0xff]  }
  0xf4   :  { %7197 = vmatprep.subr.bf16.mxu1 %v8484_v1  ;;  %7208 = vmatpush3.bf16.msra.mxu0 %v7933_v20 }
  0xf5   :  { %7209 = vmatprep.subr.bf16.mxu0 %v7934_v37 }
  0xf7   :  { %7198 = vmatpush3.bf16.msra.mxu1 %v8484_v1 }
  0xf8   :  { %7199 = vmatprep.subr.bf16.mxu1 %v8489_v2  ;;  %7210 = vmatpush3.bf16.msra.mxu0 %v7934_v37  ;;  %v7961_v37 = vld [vmem:[%s8584_s21 + $0x90] sm:$0xff]  }
  0xf9   :  { %7211 = vmatprep.subr.bf16.mxu0 %v7935_v38 }
  0xfb   :  { %7200 = vmatpush3.bf16.msra.mxu1 %v8489_v2 }
  0xfc   :  { %7201 = vmatprep.subr.bf16.mxu1 %v8499_v4  ;;  %7212 = vmatpush3.bf16.msra.mxu0 %v7935_v38  ;;  %v7963_v38 = vld [vmem:[%s8584_s21 + $0x98] sm:$0xff]  }
  0xfd   :  { %7213 = vmatprep.subr.bf16.mxu0 %v7936_v39 }
  0xff   :  { %7202 = vmatpush3.bf16.msra.mxu1 %v8499_v4 }
 0x100   :  { %7223 = vmatprep.subr.bf16.mxu1 %v8477_v0  ;;  %7214 = vmatpush3.bf16.msra.mxu0 %v7936_v39  ;;  %v7965_v39 = vld [vmem:[%s8584_s21 + $0xa0] sm:$0xff]  }
 0x101   :  { %7215 = vmatprep.subr.bf16.mxu0 %v7937_v40 }
 0x102   :  { %7204 = vmatmul.mubr.msk.bf16.vlgmr.msra.gmra.mrb[8].mxu1 %vm244_vm0, %v7924_v34  ;;  %v7955_v34 = vld [vmem:[%s8584_s21 + $0x78] sm:$0xff]  }
 0x103   :  { %7224 = vmatpush3.bf16.msra.mxu1 %v8477_v0  ;;  %7231 = vmatprep.mubr.msk.bf16.mxu1 %vm244_vm0, %v7925_v35  ;;  %v8430_v0 = vmov 0.0   ;;  %v7957_v35 = vld [vmem:[%s8584_s21 + $0x80] sm:$0xff]  }
 0x104   :  { %7225 = vmatprep.subr.bf16.mxu1 %v8484_v1  ;;  %7216 = vmatpush3.bf16.msra.mxu0 %v7937_v40  ;;  %v7967_v40 = vld [vmem:[%s8584_s21 + $0xa8] sm:$0xff]  }
 0x105   :  { %7217 = vmatprep.subr.bf16.mxu0 %v7938_v41 }
 0x107   :  { %7226 = vmatpush3.bf16.msra.mxu1 %v8484_v1 }
 0x108   :  { %7227 = vmatprep.subr.bf16.mxu1 %v8489_v2  ;;  %7218 = vmatpush3.bf16.msra.mxu0 %v7938_v41  ;;  %v7969_v41 = vld [vmem:[%s8584_s21 + $0xb0] sm:$0xff]  }
 0x109   :  { %7235 = vmatprep.subr.bf16.mxu0 %v7939_v42 }
 0x10b   :  { %7228 = vmatpush3.bf16.msra.mxu1 %v8489_v2  ;;  %v6378_v2 = vld [vmem:[%s6296_s25] ss:$0 sm:$0xff]  ;;  %s8970_s25 = sld [smem:[%s9334_s0 + %s8450_s22]]  }
 0x10c   :  { %7229 = vmatprep.subr.bf16.mxu1 %v8499_v4 }
 0x10f   :  { %7230 = vmatpush3.bf16.msra.mxu1 %v8499_v4 }
 0x110   :  { %7251 = vmatprep.subr.bf16.mxu1 %v8430_v0 }
 0x112   :  { %7232 = vmatmul.mubr.msk.bf16.vlgmr.msra.gmra.mrb[12].mxu1 %vm244_vm0, %v7926_v36  ;;  %v7959_v36 = vld [vmem:[%s8584_s21 + $0x88] sm:$0xff]   ;;  %vm3103_vm0 = vcmask 80896  }
 0x113   :  { %7255 = vmatprep.mubr.msk.bf16.mxu1 %vm8432_vm2, %v8430_v0 }
 0x1c5   :  { %v7177_v43 = vpop.f32.mrb[4].mxu1 }
 0x1c6   :  { %v446_v44 = vpop.f32.mrb[5].mxu1 }
 0x1c7   :  { %v7178_v45 = vpop.f32.mrb[6].mxu1 }
 0x1c8   :  { %v449_v46 = vpop.f32.mrb[7].mxu1 }
 0x1d5   :  { %v7205_v47 = vpop.f32.mrb[8].mxu1 }
 0x1d6   :  { %v602_v48 = vpop.f32.mrb[9].mxu1 }
 0x1d7   :  { %v7206_v49 = vpop.f32.mrb[10].mxu1 }
 0x1d8   :  { %v618_v50 = vpack.c.bf16 %v7206_v49, %v7205_v47  ;;  %v605_v51 = vpop.f32.mrb[11].mxu1 }
 0x1d9   :  { %v617_v52 = vpack.c.bf16 %v605_v51, %v602_v48 }
 0x1db   :  { %7219 = vmatprep.mubr.msk.bf16.mxu0 %vm405_vm1, %v617_v52 }
 0x1dc   :  { %7220 = vmatmul.mubr.msk.bf16.vlgmr.msra.gmra.mrb[4].mxu0 %vm405_vm1, %v618_v50 }
 0x1dd   :  { %7236 = vmatpush3.bf16.msra.mxu0 %v7939_v42  ;;  %v7971_v42 = vld [vmem:[%s8584_s21 + $0xb8] sm:$0xff]  }
 0x1de   :  { %7237 = vmatprep.subr.bf16.mxu0 %v7940_v53 }
 0x1e1   :  { %7238 = vmatpush3.bf16.msra.mxu0 %v7940_v53 }
 0x1e2   :  { %7239 = vmatprep.subr.bf16.mxu0 %v7941_v54 }
 0x1e5   :  { %7240 = vmatpush3.bf16.msra.mxu0 %v7941_v54  ;;  %v7233_v56 = vpop.f32.mrb[12].mxu1 }
 0x1e6   :  { %7241 = vmatprep.subr.bf16.mxu0 %v7942_v55  ;;  %v764_v57 = vpop.f32.mrb[13].mxu1 }
 0x1e7   :  { %v7234_v59 = vpop.f32.mrb[14].mxu1 }
 0x1e8   :  { %v780_v60 = vpack.c.bf16 %v7234_v59, %v7233_v56  ;;  %v767_v61 = vpop.f32.mrb[15].mxu1  ;;  %v7956_v56 = vld [vmem:[%s8584_s21] sm:$0xff]   ;;  %v7958_v59 = vld [vmem:[%s8584_s21 + $0x8] sm:$0xff]  }
 0x1e9   :  { %7242 = vmatpush3.bf16.msra.mxu0 %v7942_v55  ;;  %v779_v62 = vpack.c.bf16 %v767_v61, %v764_v57  ;;  %v7962_v61 = vld [vmem:[%s8584_s21 + $0x18] sm:$0xff]  }
 0x1ea   :  { %7243 = vmatprep.subr.bf16.mxu0 %v7943_v58 }
 0x1eb   :  { %7247 = vmatprep.mubr.msk.bf16.mxu0 %vm405_vm1, %v779_v62  ;;  %v7964_v62 = vld [vmem:[%s8584_s21 + $0x20] sm:$0xff]  }
 0x1ed   :  { %7244 = vmatpush3.bf16.msra.mxu0 %v7943_v58 }
 0x1ee   :  { %7245 = vmatprep.subr.bf16.mxu0 %v7944_v63 }
 0x1f1   :  { %7246 = vmatpush3.bf16.msra.mxu0 %v7944_v63  ;;  %v7966_v63 = vld [vmem:[%s8584_s21 + $0x28] sm:$0xff]  }
 0x1f2   :  { %7307 = vmatprep.subr.bf16.mxu0 %v8430_v0 }
 0x1f4   :  { %7248 = vmatmul.mubr.msk.bf16.vlgmr.msra.gmra.mrb[4].mxu0 %vm405_vm1, %v780_v60  ;;  %v7960_v60 = vld [vmem:[%s8584_s21 + $0x10] sm:$0xff]  }
 0x1f5   :  { %7311 = vmatprep.mubr.msk.bf16.mxu0 %vm8432_vm2, %v8430_v0 }
 0x2c7   :  { %v7249_v1 = vpop.f32.mrb[4].mxu0 }
 0x2c8   :  { %v7825_v3 = vadd.f32 %v7249_v1, %v7177_v43  ;;  %v857_v4 = vpop.f32.mrb[5].mxu0  ;;  %v7968_v1 = vld [vmem:[%s8584_s21 + $0x30] sm:$0xff]  }
 0x2c9   :  { %v7826_v5 = vadd.f32 %v857_v4, %v446_v44  ;;  %v7250_v6 = vpop.f32.mrb[6].mxu0  ;;  %v7973_v4 = vld [vmem:[%s8584_s21 + $0xc0] sm:$0xff]  }
 0x2ca   :  { %v885_v7 = vadd.f32 %v7825_v3, %v6378_v2  ;;  %v7827_v8 = vadd.f32 %v7250_v6, %v7178_v45  ;;  %v860_v9 = vpop.f32.mrb[7].mxu0  ;;  %v7972_v3 = vld [vmem:[%s8575_s17 + $0x18] sm:$0xff]   ;;  %v7975_v6 = vld [vmem:[%s8584_s21 + $0xd0] sm:$0xff]   ;;  %s6324_s17 = sld [smem:[%s9334_s0 + %s8448_s14]]   ;;  %s8463_s14 = smov 33  }
 0x2cb   :  { %v883_v10 = vadd.f32 %v7826_v5, %v6378_v2  ;;  %v7828_v11 = vadd.f32 %v860_v9, %v449_v46  ;;  %v7974_v5 = vld [vmem:[%s8584_s21 + $0xc8] sm:$0xff]  }
 0x2cc   :  { %v893_v12 = vmul.f32 0.01, %v885_v7  ;;  %v886_v13 = vadd.f32 %v7827_v8, %v6378_v2  ;;  %vm889_vm3 = vcmp.ge.f32.partialorder %v885_v7, 0.0  ;;  %v7977_v8 = vld [vmem:[%s8584_s21 + $0xe0] sm:$0xff]   ;;  %v7978_v9 = vld [vmem:[%s8584_s21 + $0xe8] sm:$0xff]  }
 0x2cd   :  { %v891_v14 = vmul.f32 0.01, %v883_v10  ;;  %v884_v15 = vadd.f32 %v7828_v11, %v6378_v2  ;;  %vm887_vm4 = vcmp.ge.f32.partialorder %v883_v10, 0.0  ;;  %v7970_v2 = vld [vmem:[%s8584_s21 + $0x38] sm:$0xff]  }
 0x2ce   :  { %vm890_vm5 = vcmp.ge.f32.partialorder %v886_v13, 0.0  ;;  %v894_v16 = vmul.f32 0.01, %v886_v13  ;;  %v897_v18 = vsel %vm889_vm3, %v885_v7, %v893_v12  ;;  %v7976_v7 = vld [vmem:[%s8584_s21 + $0xd8] sm:$0xff]  }
 0x2cf   :  { %vm888_vm6 = vcmp.ge.f32.partialorder %v884_v15, 0.0  ;;  %v892_v17 = vmul.f32 0.01, %v884_v15  ;;  %v895_v20 = vsel %vm887_vm4, %v883_v10, %v891_v14  ;;  %v7979_v10 = vld [vmem:[%s8584_s21 + $0xf0] sm:$0xff]   ;;  %v7980_v11 = vld [vmem:[%s8584_s21 + $0xf8] sm:$0xff]   ;;  %s6293_s21 = sld [smem:[%s9334_s0 + %s8449_s18]]  }
 0x2d0   :  { %v898_v19 = vsel %vm890_vm5, %v886_v13, %v894_v16 }
 0x2d1   :  { %v896_v21 = vsel %vm888_vm6, %v884_v15, %v892_v17  ;;  %v8589_v22 = vpack.c.bf16 %v898_v19, %v897_v18  ;;  %vm3905_vm6 = vcmask 1043456  }
 0x2d2   :  { %v8591_v23 = vpack.c.bf16 %v896_v21, %v895_v20 }
 0x2d4   :  { %7252 = vmatpush3.bf16.msra.mxu1 %v8591_v23  ;;  %7308 = vmatpush3.bf16.msra.mxu0 %v8591_v23 }
 0x2d5   :  { %7253 = vmatprep.subr.bf16.mxu1 %v8430_v0  ;;  %7309 = vmatprep.subr.bf16.mxu0 %v8430_v0 }
 0x2d8   :  { %7254 = vmatpush3.bf16.msra.mxu1 %v8589_v22  ;;  %7310 = vmatpush3.bf16.msra.mxu0 %v8589_v22 }
 0x2d9   :  { %7259 = vmatprep.subr.bf16.mxu1 %v8430_v0  ;;  %7315 = vmatprep.subr.bf16.mxu0 %v8430_v0 }
 0x2db   :  { %7256 = vmatmul.mubr.msk.bf16.vlgmr.msra.gmra.mrb[16].mxu1 %vm978_vm7, %v7945_v24  ;;  %7312 = vmatmul.mubr.msk.bf16.vlgmr.msra.gmra.mrb[8].mxu0 %vm978_vm7, %v7947_v25 }
 0x2dc   :  { %7260 = vmatpush3.bf16.msra.mxu1 %v8591_v23  ;;  %7263 = vmatprep.mubr.msk.bf16.mxu1 %vm8432_vm2, %v8430_v0 }
 0x2dd   :  { %7261 = vmatprep.subr.bf16.mxu1 %v8430_v0  ;;  %7331 = vmatprep.mubr.msk.bf16.mxu0 %vm8432_vm2, %v8430_v0 }
 0x2de   :  { %7316 = vmatpush3.bf16.msra.mxu0 %v7957_v35  ;;  %v7984_v35 = vld [vmem:[%s8700_s29 + $0x10] sm:$0xff]  }
 0x2df   :  { %7317 = vmatprep.subr.bf16.mxu0 %v8430_v0 }
 0x2e0   :  { %7262 = vmatpush3.bf16.msra.mxu1 %v8589_v22 }
 0x2e1   :  { %7267 = vmatprep.subr.bf16.mxu1 %v8430_v0 }
 0x2e2   :  { %7318 = vmatpush3.bf16.msra.mxu0 %v7959_v36  ;;  %v7986_v36 = vld [vmem:[%s8700_s29 + $0x18] sm:$0xff]  }
 0x2e3   :  { %7264 = vmatmul.mubr.msk.bf16.vlgmr.msra.gmra.mrb[20].mxu1 %vm978_vm7, %v7946_v26  ;;  %7319 = vmatprep.subr.bf16.mxu0 %v8430_v0 }
 0x2e4   :  { %7268 = vmatpush3.bf16.msra.mxu1 %v7948_v27  ;;  %7283 = vmatprep.mubr.msk.bf16.mxu1 %vm8432_vm2, %v8430_v0 }
 0x2e5   :  { %7269 = vmatprep.subr.bf16.mxu1 %v8430_v0 }
 0x2e6   :  { %7320 = vmatpush3.bf16.msra.mxu0 %v7961_v37  ;;  %v7988_v37 = vld [vmem:[%s8700_s29 + $0x20] sm:$0xff]  }
 0x2e7   :  { %7321 = vmatprep.subr.bf16.mxu0 %v8430_v0 }
 0x2e8   :  { %7270 = vmatpush3.bf16.msra.mxu1 %v7949_v28 }
 0x2e9   :  { %7271 = vmatprep.subr.bf16.mxu1 %v8430_v0 }
 0x2ea   :  { %7322 = vmatpush3.bf16.msra.mxu0 %v7963_v38  ;;  %v7990_v38 = vld [vmem:[%s8700_s29 + $0x28] sm:$0xff]  }
 0x2eb   :  { %7323 = vmatprep.subr.bf16.mxu0 %v8430_v0 }
 0x2ec   :  { %7272 = vmatpush3.bf16.msra.mxu1 %v7950_v29 }
 0x2ed   :  { %7273 = vmatprep.subr.bf16.mxu1 %v8430_v0 }
 0x2ee   :  { %7324 = vmatpush3.bf16.msra.mxu0 %v7965_v39  ;;  %v7992_v39 = vld [vmem:[%s8700_s29 + $0x30] sm:$0xff]  }
 0x2ef   :  { %7325 = vmatprep.subr.bf16.mxu0 %v8430_v0 }
 0x2f0   :  { %7274 = vmatpush3.bf16.msra.mxu1 %v7951_v30 }
 0x2f1   :  { %7275 = vmatprep.subr.bf16.mxu1 %v8430_v0 }
 0x2f2   :  { %7326 = vmatpush3.bf16.msra.mxu0 %v7967_v40 }
 0x2f3   :  { %7327 = vmatprep.subr.bf16.mxu0 %v8430_v0 }
 0x2f4   :  { %7276 = vmatpush3.bf16.msra.mxu1 %v7952_v31 }
 0x2f5   :  { %7277 = vmatprep.subr.bf16.mxu1 %v8430_v0 }
 0x2f6   :  { %7328 = vmatpush3.bf16.msra.mxu0 %v7969_v41  ;;  %v6419_v41 = vld [vmem:[%s6299_s3] ss:$0 sm:$0xff]  ;;  %s6312_s3 = sld [smem:[%s9334_s0 + %s8452_s30]]  }
 0x2f7   :  { %7329 = vmatprep.subr.bf16.mxu0 %v8430_v0 }
 0x2f8   :  { %7278 = vmatpush3.bf16.msra.mxu1 %v7953_v32 }
 0x2f9   :  { %7279 = vmatprep.subr.bf16.mxu1 %v8430_v0 }
 0x2fa   :  { %7330 = vmatpush3.bf16.msra.mxu0 %v7971_v42 }
 0x2fb   :  { %7363 = vmatprep.subr.bf16.mxu0 %v8430_v0 }
 0x2fc   :  { %7280 = vmatpush3.bf16.msra.mxu1 %v7954_v33  ;;  %v7981_v33 = vld [vmem:[%s8700_s29] sm:$0xff]  }
 0x2fd   :  { %7281 = vmatprep.subr.bf16.mxu1 %v8430_v0 }
 0x300   :  { %7282 = vmatpush3.bf16.msra.mxu1 %v7955_v34  ;;  %v7982_v34 = vld [vmem:[%s8700_s29 + $0x8] sm:$0xff]  }
 0x301   :  { %7287 = vmatprep.subr.bf16.mxu1 %v8430_v0 }
 0x3ae   :  { %v1016_v43 = vpop.f32.mrb[16].mxu1  ;;  %v1294_v44 = vpop.f32.mrb[8].mxu0 }
 0x3af   :  { %v7257_v45 = vpop.f32.mrb[17].mxu1  ;;  %v7313_v46 = vpop.f32.mrb[9].mxu0 }
 0x3b0   :  { %v1019_v47 = vpop.f32.mrb[18].mxu1  ;;  %v1297_v48 = vpop.f32.mrb[10].mxu0 }
 0x3b1   :  { %v1023_v49 = vpack.c.bf16 %v1019_v47, %v1016_v43  ;;  %v7258_v50 = vpop.f32.mrb[19].mxu1  ;;  %v1301_v51 = vpack.c.bf16 %v1297_v48, %v1294_v44  ;;  %v7314_v52 = vpop.f32.mrb[11].mxu0 }
 0x3b3   :  { %7332 = vmatmul.mubr.bf16.vlgmr.msra.gmra.mrb[12].mxu0 %v1301_v51 }
 0x3b4   :  { %7365 = vmatprep.mubr.msk.bf16.mxu0 %vm8432_vm2, %v8430_v0 }
 0x3b6   :  { %v1066_v53 = vpop.f32.mrb[20].mxu1 }
 0x3b7   :  { %v7265_v54 = vpop.f32.mrb[21].mxu1 }
 0x3b8   :  { %v1069_v55 = vpop.f32.mrb[22].mxu1  ;;  %v1550_v54 = vld [vmem:[%s8722_s7] sm:$0xf] }
 0x3b9   :  { %v1073_v57 = vpack.c.bf16 %v1069_v55, %v1066_v53  ;;  %v7266_v58 = vpop.f32.mrb[23].mxu1  ;;  %v1551_v55 = vld [vmem:[%s8722_s7 + $0x4] sm:$0xf] }
 0x3ba   :  { %v7987_v58 = vld [vmem:[%s8700_s29 + $0x50] sm:$0xff]  }
 0x3bb   :  { %7284 = vmatmul.mubr.bf16.vlgmr.msra.gmra.mrb[24].mxu1 %v1073_v57  ;;  %v7985_v57 = vld [vmem:[%s8700_s29 + $0x48] sm:$0xff]  }
 0x3bc   :  { %7288 = vmatpush3.bf16.msra.mxu1 %v7956_v56  ;;  %7303 = vmatprep.mubr.msk.bf16.mxu1 %vm8432_vm2, %v8430_v0  ;;  %v7983_v56 = vld [vmem:[%s8700_s29 + $0x40] sm:$0xff]  }
 0x3bd   :  { %7289 = vmatprep.subr.bf16.mxu1 %v8430_v0 }
 0x3c0   :  { %7290 = vmatpush3.bf16.msra.mxu1 %v7958_v59  ;;  %v7989_v59 = vld [vmem:[%s8700_s29 + $0x58] sm:$0xff]  }
 0x3c1   :  { %7291 = vmatprep.subr.bf16.mxu1 %v8430_v0 }
 0x3c4   :  { %7292 = vmatpush3.bf16.msra.mxu1 %v7960_v60  ;;  %v7991_v60 = vld [vmem:[%s8700_s29 + $0x60] sm:$0xff]  }
 0x3c5   :  { %7293 = vmatprep.subr.bf16.mxu1 %v8430_v0 }
 0x3c8   :  { %7294 = vmatpush3.bf16.msra.mxu1 %v7962_v61  ;;  %v7993_v61 = vld [vmem:[%s8700_s29 + $0x68] sm:$0xff]  }
 0x3c9   :  { %7295 = vmatprep.subr.bf16.mxu1 %v8430_v0 }
 0x3cc   :  { %7296 = vmatpush3.bf16.msra.mxu1 %v7964_v62  ;;  %v7994_v62 = vld [vmem:[%s8700_s29 + $0x38] sm:$0xff]  }
 0x3cd   :  { %7297 = vmatprep.subr.bf16.mxu1 %v8430_v0 }
 0x3d0   :  { %7298 = vmatpush3.bf16.msra.mxu1 %v7966_v63  ;;  %v7995_v63 = vld [vmem:[%s8700_s29 + $0x70] sm:$0xff]  }
 0x3d1   :  { %7299 = vmatprep.subr.bf16.mxu1 %v8430_v0 }
 0x3d4   :  { %7300 = vmatpush3.bf16.msra.mxu1 %v7968_v1  ;;  %v7996_v1 = vld [vmem:[%s8700_s29 + $0x78] sm:$0xff]  }
 0x3d5   :  { %7301 = vmatprep.subr.bf16.mxu1 %v8430_v0 }
 0x3d8   :  { %7302 = vmatpush3.bf16.msra.mxu1 %v7970_v2 }
 0x3d9   :  { %7335 = vmatprep.subr.bf16.mxu1 %v8430_v0 }
 0x3db   :  { %7304 = vmatmul.mubr.bf16.vlgmr.msra.gmra.mrb[28].mxu1 %v1023_v49 }
 0x3dc   :  { %7336 = vmatpush3.bf16.msra.mxu1 %v8591_v23  ;;  %7339 = vmatprep.mubr.msk.bf16.mxu1 %vm8432_vm2, %v8430_v0 }
 0x3dd   :  { %7337 = vmatprep.subr.bf16.mxu1 %v8430_v0 }
 0x3e0   :  { %7338 = vmatpush3.bf16.msra.mxu1 %v8589_v22 }
 0x3e1   :  { %7343 = vmatprep.subr.bf16.mxu1 %v8430_v0 }
 0x3e3   :  { %7340 = vmatmul.mubr.msk.bf16.vlgmr.msra.gmra.mrb[32].mxu1 %vm978_vm7, %v7972_v3  ;;  %v7997_v3 = vld [vmem:[%s8700_s29 + $0x80] sm:$0xff]  }
 0x3e4   :  { %7359 = vmatprep.mubr.msk.bf16.mxu1 %vm8432_vm2, %v8430_v0  ;;  %7344 = vmatpush3.bf16.msra.mxu1 %v7973_v4 }
 0x3e5   :  { %7345 = vmatprep.subr.bf16.mxu1 %v8430_v0 }
 0x3e8   :  { %7346 = vmatpush3.bf16.msra.mxu1 %v7974_v5 }
 0x3e9   :  { %7347 = vmatprep.subr.bf16.mxu1 %v8430_v0 }
 0x3ec   :  { %7348 = vmatpush3.bf16.msra.mxu1 %v7975_v6 }
 0x3ed   :  { %7349 = vmatprep.subr.bf16.mxu1 %v8430_v0 }
 0x3f0   :  { %7350 = vmatpush3.bf16.msra.mxu1 %v7976_v7 }
 0x3f1   :  { %7351 = vmatprep.subr.bf16.mxu1 %v8430_v0 }
 0x3f4   :  { %7352 = vmatpush3.bf16.msra.mxu1 %v7977_v8  ;;  %v7998_v8 = vld [vmem:[%s8700_s29 + $0x88] sm:$0xff]  }
 0x3f5   :  { %7353 = vmatprep.subr.bf16.mxu1 %v8430_v0 }
 0x3f8   :  { %7354 = vmatpush3.bf16.msra.mxu1 %v7978_v9 }
 0x3f9   :  { %7355 = vmatprep.subr.bf16.mxu1 %v8430_v0 }
 0x3fc   :  { %7356 = vmatpush3.bf16.msra.mxu1 %v7979_v10 }
 0x3fd   :  { %7357 = vmatprep.subr.bf16.mxu1 %v8430_v0 }
 0x400   :  { %7358 = vmatpush3.bf16.msra.mxu1 %v7980_v11 }
 0x401   :  { %7395 = vmatprep.subr.bf16.mxu1 %v8430_v0 }
 0x486   :  { %v1384_v12 = vpop.f32.mrb[12].mxu0 }
 0x487   :  { %v7333_v13 = vpop.f32.mrb[13].mxu0 }
 0x488   :  { %v1387_v14 = vpop.f32.mrb[14].mxu0 }
 0x489   :  { %v7334_v15 = vpop.f32.mrb[15].mxu0 }
 0x48a   :  { %v1552_v15 = vld [vmem:[%s8722_s7 + $0x8] sm:$0xf] }
 0x48e   :  { %v1156_v16 = vpop.f32.mrb[24].mxu1 }
 0x48f   :  { %v7285_v17 = vpop.f32.mrb[25].mxu1 }
 0x490   :  { %v1159_v18 = vpop.f32.mrb[26].mxu1  ;;  %v8000_v17 = vld [vmem:[%s8700_s29 + $0xc0] sm:$0xff]  }
 0x491   :  { %v7286_v19 = vpop.f32.mrb[27].mxu1 }
 0x492   :  { %v8002_v19 = vld [vmem:[%s8700_s29 + $0xc8] sm:$0xff]  }
 0x4ae   :  { %v1245_v20 = vpop.f32.mrb[28].mxu1 }
 0x4af   :  { %v1246_v21 = vadd.f32 %v1245_v20, %v1156_v16  ;;  %v7305_v22 = vpop.f32.mrb[29].mxu1  ;;  %v1553_v16 = vld [vmem:[%s8722_s7 + $0xc] sm:$0xf]  ;;  %v8003_v20 = vld [vmem:[%s8700_s29 + $0xa0] sm:$0xff]   ;;  %s9053_s7 = sld [smem:[%s9334_s0 + %s8453_s4]]  }
 0x4b0   :  { %v1248_v23 = vpop.f32.mrb[30].mxu1  ;;  %v8005_v22 = vld [vmem:[%s8700_s29 + $0xa8] sm:$0xff]  }
 0x4b1   :  { %v1249_v24 = vadd.f32 %v1248_v23, %v1159_v18  ;;  %v1391_v25 = vadd.f32 %v1384_v12, %v1246_v21  ;;  %v7306_v26 = vpop.f32.mrb[31].mxu1  ;;  %v7999_v12 = vld [vmem:[%s8700_s29 + $0x90] sm:$0xff]   ;;  %v8001_v18 = vld [vmem:[%s8700_s29 + $0x98] sm:$0xff]  }
 0x4b2   :  { %v8004_v21 = vld [vmem:[%s8700_s29 + $0xd0] sm:$0xff]   ;;  %v8006_v23 = vld [vmem:[%s8700_s29 + $0xd8] sm:$0xff]  }
 0x4b3   :  { %v1392_v27 = vadd.f32 %v1387_v14, %v1249_v24  ;;  %v8007_v24 = vld [vmem:[%s8700_s29 + $0xb0] sm:$0xff]   ;;  %v8009_v26 = vld [vmem:[%s8700_s29 + $0xb8] sm:$0xff]  }
 0x4b6   :  { %v1435_v28 = vpop.f32.mrb[32].mxu1 }
 0x4b7   :  { %v7341_v29 = vpop.f32.mrb[33].mxu1 }
 0x4b8   :  { %v1438_v30 = vpop.f32.mrb[34].mxu1  ;;  %v8012_v29 = vld [vmem:[%s8700_s29 + $0xf8] sm:$0xff]  }
 0x4b9   :  { %v1442_v31 = vpack.c.bf16 %v1438_v30, %v1435_v28  ;;  %v7342_v32 = vpop.f32.mrb[35].mxu1  ;;  %v8011_v28 = vld [vmem:[%s8700_s29 + $0xf0] sm:$0xff]   ;;  %v8015_v30 = vld [vmem:[%s8805_s11 + $0x4] ss:$8 sps:$4 sm:$0xff]  }
 0x4bb   :  { %7360 = vmatmul.mubr.bf16.vlgmr.msra.gmra.mrb[36].mxu1 %v1442_v31  ;;  %v8018_v31 = vld [vmem:[%s8805_s11 + $0x84] ss:$8 sps:$4 sm:$0xff]  }
 0x4bc   :  { %7411 = vmatprep.mubr.msk.bf16.mxu1 %vm8432_vm2, %v8430_v0  ;;  %7396 = vmatpush3.bf16.msra.mxu1 %v7981_v33 }
 0x4bd   :  { %7397 = vmatprep.subr.bf16.mxu1 %v8430_v0 }
 0x4c0   :  { %7398 = vmatpush3.bf16.msra.mxu1 %v7982_v34 }
 0x4c1   :  { %7399 = vmatprep.subr.bf16.mxu1 %v8430_v0 }
 0x4c4   :  { %7400 = vmatpush3.bf16.msra.mxu1 %v7984_v35 }
 0x4c5   :  { %7401 = vmatprep.subr.bf16.mxu1 %v8430_v0 }
 0x4c8   :  { %7402 = vmatpush3.bf16.msra.mxu1 %v7986_v36 }
 0x4c9   :  { %7403 = vmatprep.subr.bf16.mxu1 %v8430_v0 }
 0x4cc   :  { %7404 = vmatpush3.bf16.msra.mxu1 %v7988_v37 }
 0x4cd   :  { %7405 = vmatprep.subr.bf16.mxu1 %v8430_v0 }
 0x4d0   :  { %7406 = vmatpush3.bf16.msra.mxu1 %v7990_v38 }
 0x4d1   :  { %7407 = vmatprep.subr.bf16.mxu1 %v8430_v0 }
 0x4d4   :  { %7408 = vmatpush3.bf16.msra.mxu1 %v7992_v39 }
 0x4d5   :  { %7409 = vmatprep.subr.bf16.mxu1 %v8430_v0 }
 0x4d8   :  { %7410 = vmatpush3.bf16.msra.mxu1 %v7994_v62  ;;  %v8025_v62 = vld [vmem:[%s8805_s11 + $0x20] ss:$8 sps:$4 sm:$0xff]  }
 0x4d9   :  { %7421 = vmatprep.subr.bf16.mxu1 %v8430_v0 }
 0x58e   :  { %v1525_v40 = vpop.f32.mrb[36].mxu1 }
 0x58f   :  { %v1532_v42 = vadd.f32 %v1525_v40, %v1391_v25  ;;  %v7361_v43 = vpop.f32.mrb[37].mxu1  ;;  %v8008_v25 = vld [vmem:[%s8700_s29 + $0xe0] sm:$0xff]  }
 0x590   :  { %v1528_v44 = vpop.f32.mrb[38].mxu1 }
 0x591   :  { %v1541_v45 = vadd.f32 %v6419_v41, %v1532_v42  ;;  %v1533_v46 = vadd.f32 %v1528_v44, %v1392_v27  ;;  %v7362_v47 = vpop.f32.mrb[39].mxu1  ;;  %v8010_v27 = vld [vmem:[%s8700_s29 + $0xe8] sm:$0xff]   ;;  %s6310_s29 = sld [smem:[%s9334_s0 + %s8451_s26]]  }
 0x592   :  { %v8016_v42 = vld [vmem:[%s8805_s11 + $0x80] ss:$8 sps:$4 sm:$0xff]  }
 0x593   :  { %v1545_v48 = vmul.f32 0.01, %v1541_v45  ;;  %v1542_v49 = vadd.f32 %v6419_v41, %v1533_v46  ;;  %vm1543_vm8 = vcmp.ge.f32.partialorder %v1541_v45, 0.0 }
 0x595   :  { %vm1544_vm9 = vcmp.ge.f32.partialorder %v1542_v49, 0.0  ;;  %v1546_v50 = vmul.f32 0.01, %v1542_v49  ;;  %v1547_v51 = vsel %vm1543_vm8, %v1541_v45, %v1545_v48  ;;  %v8024_v45 = vld [vmem:[%s8805_s11 + $0x94] ss:$8 sps:$4 sm:$0xff]   ;;  %vm3901_vm8 = vcmask 64512  }
 0x596   :  { %v8022_v48 = vld [vmem:[%s8805_s11 + $0x90] ss:$8 sps:$4 sm:$0xff]  }
 0x597   :  { %v1548_v52 = vsel %vm1544_vm9, %v1542_v49, %v1546_v50  ;;  %v8030_v49 = vld [vmem:[%s8805_s11 + $0xa4] ss:$8 sps:$4 sm:$0xff]  }
 0x598   :  { %v8724_v53 = vpack.c.bf16 %v1548_v52, %v1547_v51  ;;  %v8013_v51 = vld [vmem:[%s8805_s11] ss:$8 sps:$4 sm:$0xff]  }
 0x599   :  { %v8028_v52 = vld [vmem:[%s8805_s11 + $0xa0] ss:$8 sps:$4 sm:$0xff]  }
 0x59a   :  { %7364 = vmatpush3.bf16.msra.mxu0 %v8724_v53 }
 0x59b   :  { %7369 = vmatprep.subr.bf16.mxu0 %v8430_v0 }
 0x59d   :  { %7366 = vmatmul.mubr.msk.bf16.vlgmr.msra.gmra.mrb[16].mxu0 %vm1618_vm10, %v1550_v54 }
 0x59e   :  { %7370 = vmatpush3.bf16.msra.mxu0 %v8724_v53  ;;  %7371 = vmatprep.mubr.msk.bf16.mxu0 %vm8432_vm2, %v8430_v0 }
 0x59f   :  { %7375 = vmatprep.subr.bf16.mxu0 %v8430_v0 }
 0x5a5   :  { %7372 = vmatmul.mubr.msk.bf16.vlgmr.msra.gmra.mrb[20].mxu0 %vm1618_vm10, %v1551_v55  ;;  %v8021_v55 = vld [vmem:[%s8805_s11 + $0x14] ss:$8 sps:$4 sm:$0xff]  }
 0x5a6   :  { %7376 = vmatpush3.bf16.msra.mxu0 %v7983_v56  ;;  %7391 = vmatprep.mubr.msk.bf16.mxu0 %vm8432_vm2, %v8430_v0  ;;  %v8036_v56 = vld [vmem:[%s8805_s11 + $0xb4] ss:$8 sps:$4 sm:$0xff]  }
 0x5a7   :  { %7377 = vmatprep.subr.bf16.mxu0 %v8430_v0 }
 0x5aa   :  { %7378 = vmatpush3.bf16.msra.mxu0 %v7985_v57 }
 0x5ab   :  { %7379 = vmatprep.subr.bf16.mxu0 %v8430_v0 }
 0x5ae   :  { %7380 = vmatpush3.bf16.msra.mxu0 %v7987_v58 }
 0x5af   :  { %7381 = vmatprep.subr.bf16.mxu0 %v8430_v0 }
 0x5b2   :  { %7382 = vmatpush3.bf16.msra.mxu0 %v7989_v59  ;;  %v8019_v59 = vld [vmem:[%s8805_s11 + $0x10] ss:$8 sps:$4 sm:$0xff]  }
 0x5b3   :  { %7383 = vmatprep.subr.bf16.mxu0 %v8430_v0 }
 0x5b6   :  { %7384 = vmatpush3.bf16.msra.mxu0 %v7991_v60  ;;  %v8034_v60 = vld [vmem:[%s8805_s11 + $0xb0] ss:$8 sps:$4 sm:$0xff]  }
 0x5b7   :  { %7385 = vmatprep.subr.bf16.mxu0 %v8430_v0 }
 0x5ba   :  { %7386 = vmatpush3.bf16.msra.mxu0 %v7993_v61  ;;  %v8027_v61 = vld [vmem:[%s8805_s11 + $0x24] ss:$8 sps:$4 sm:$0xff]  }
 0x5bb   :  { %7387 = vmatprep.subr.bf16.mxu0 %v8430_v0 }
 0x5be   :  { %7388 = vmatpush3.bf16.msra.mxu0 %v7995_v63  ;;  %v8033_v63 = vld [vmem:[%s8805_s11 + $0x34] ss:$8 sps:$4 sm:$0xff]  }
 0x5bf   :  { %7389 = vmatprep.subr.bf16.mxu0 %v8430_v0 }
 0x5c2   :  { %7390 = vmatpush3.bf16.msra.mxu0 %v7996_v1  ;;  %v8031_v1 = vld [vmem:[%s8805_s11 + $0x30] ss:$8 sps:$4 sm:$0xff]  }
 0x5c3   :  { %7415 = vmatprep.subr.bf16.mxu0 %v8430_v0 }
 0x670   :  { %v1656_v2 = vpop.f32.mrb[16].mxu0 }
 0x671   :  { %v1662_v4 = vpack.c.bf16 %v1656_v2, %v1656_v2  ;;  %v7367_v5 = vpop.f32.mrb[17].mxu0  ;;  %v8039_v2 = vld [vmem:[%s8805_s11 + $0x44] ss:$8 sps:$4 sm:$0xff]  }
 0x672   :  { %v1659_v6 = vpop.f32.mrb[18].mxu0  ;;  %v8040_v5 = vld [vmem:[%s8805_s11 + $0xc0] ss:$8 sps:$4 sm:$0xff]  }
 0x673   :  { %v7368_v7 = vpop.f32.mrb[19].mxu0  ;;  %7412 = vmatmul.mubr.bf16.vlgmr.msra.gmra.mrb[40].mxu1 %v1662_v4  ;;  %v8042_v4 = vld [vmem:[%s8805_s11 + $0xc4] ss:$8 sps:$4 sm:$0xff]   ;;  %v8043_v6 = vld [vmem:[%s8805_s11 + $0x50] ss:$8 sps:$4 sm:$0xff]  }
 0x674   :  { %7422 = vmatpush3.bf16.msra.mxu1 %v7997_v3  ;;  %7437 = vmatprep.mubr.msk.bf16.mxu1 %vm8432_vm2, %v8430_v0  ;;  %v8037_v3 = vld [vmem:[%s8805_s11 + $0x40] ss:$8 sps:$4 sm:$0xff]   ;;  %v8045_v7 = vld [vmem:[%s8805_s11 + $0x54] ss:$8 sps:$4 sm:$0xff]  }
 0x675   :  { %7423 = vmatprep.subr.bf16.mxu1 %v8430_v0 }
 0x678   :  { %v1700_v9 = vpop.f32.mrb[20].mxu0  ;;  %7424 = vmatpush3.bf16.msra.mxu1 %v7998_v8  ;;  %v8048_v8 = vld [vmem:[%s8805_s11 + $0xd4] ss:$8 sps:$4 sm:$0xff]  }
 0x679   :  { %v1706_v10 = vpack.c.bf16 %v1700_v9, %v1700_v9  ;;  %v7373_v11 = vpop.f32.mrb[21].mxu0  ;;  %7425 = vmatprep.subr.bf16.mxu1 %v8430_v0  ;;  %v8046_v9 = vld [vmem:[%s8805_s11 + $0xd0] ss:$8 sps:$4 sm:$0xff]  }
 0x67a   :  { %v1703_v13 = vpop.f32.mrb[22].mxu0  ;;  %v8049_v11 = vld [vmem:[%s8805_s11 + $0x60] ss:$8 sps:$4 sm:$0xff]  }
 0x67b   :  { %v7374_v14 = vpop.f32.mrb[23].mxu0  ;;  %7392 = vmatmul.mubr.bf16.vlgmr.msra.gmra.mrb[24].mxu0 %v1706_v10  ;;  %v8051_v10 = vld [vmem:[%s8805_s11 + $0x64] ss:$8 sps:$4 sm:$0xff]   ;;  %v8052_v13 = vld [vmem:[%s8805_s11 + $0xe0] ss:$8 sps:$4 sm:$0xff]  }
 0x67c   :  { %7416 = vmatpush3.bf16.msra.mxu0 %v8724_v53  ;;  %7417 = vmatprep.mubr.msk.bf16.mxu0 %vm8432_vm2, %v8430_v0  ;;  %v8057_v14 = vld [vmem:[%s8805_s11 + $0x74] ss:$8 sps:$4 sm:$0xff]  }
 0x67d   :  { %7441 = vmatprep.subr.bf16.mxu0 %v8430_v0  ;;  %7426 = vmatpush3.bf16.msra.mxu1 %v7999_v12  ;;  %v8054_v12 = vld [vmem:[%s8805_s11 + $0xe4] ss:$8 sps:$4 sm:$0xff]  }
 0x67e   :  { %7427 = vmatprep.subr.bf16.mxu1 %v8430_v0 }
 0x681   :  { %7428 = vmatpush3.bf16.msra.mxu1 %v8001_v18  ;;  %v8063_v18 = vld [vmem:[%s8805_s11 + $0x184] ss:$8 sps:$4 sm:$0xff]  }
 0x682   :  { %7429 = vmatprep.subr.bf16.mxu1 %v8430_v0 }
 0x683   :  { %7418 = vmatmul.mubr.msk.bf16.vlgmr.msra.gmra.mrb[28].mxu0 %vm1618_vm10, %v1552_v15  ;;  %v8055_v15 = vld [vmem:[%s8805_s11 + $0x70] ss:$8 sps:$4 sm:$0xff]  }
 0x684   :  { %7442 = vmatpush3.bf16.msra.mxu0 %v8724_v53  ;;  %7443 = vmatprep.mubr.msk.bf16.mxu0 %vm8432_vm2, %v8430_v0 }
 0x685   :  { %7447 = vmatprep.subr.bf16.mxu0 %v8430_v0  ;;  %7430 = vmatpush3.bf16.msra.mxu1 %v8003_v20  ;;  %v8066_v20 = vld [vmem:[%s8805_s11 + $0x104] ss:$8 sps:$4 sm:$0xff]  }
 0x686   :  { %7431 = vmatprep.subr.bf16.mxu1 %v8430_v0 }
 0x689   :  { %7432 = vmatpush3.bf16.msra.mxu1 %v8005_v22 }
 0x68a   :  { %7433 = vmatprep.subr.bf16.mxu1 %v8430_v0 }
 0x68b   :  { %7444 = vmatmul.mubr.msk.bf16.vlgmr.msra.gmra.mrb[32].mxu0 %vm1618_vm10, %v1553_v16  ;;  %v8060_v16 = vld [vmem:[%s8805_s11 + $0xf4] ss:$8 sps:$4 sm:$0xff]  }
 0x68c   :  { %7448 = vmatpush3.bf16.msra.mxu0 %v8000_v17  ;;  %7463 = vmatprep.mubr.msk.bf16.mxu0 %vm8432_vm2, %v8430_v0  ;;  %v8058_v17 = vld [vmem:[%s8805_s11 + $0xf0] ss:$8 sps:$4 sm:$0xff]  }
 0x68d   :  { %7449 = vmatprep.subr.bf16.mxu0 %v8430_v0  ;;  %7434 = vmatpush3.bf16.msra.mxu1 %v8007_v24 }
 0x68e   :  { %7435 = vmatprep.subr.bf16.mxu1 %v8430_v0 }
 0x690   :  { %7450 = vmatpush3.bf16.msra.mxu0 %v8002_v19  ;;  %v8439_v19 = vmov 0  }
 0x691   :  { %7451 = vmatprep.subr.bf16.mxu0 %v8430_v0  ;;  %7436 = vmatpush3.bf16.msra.mxu1 %v8009_v26 }
 0x692   :  { %2308 = vmatprep.subr.bf16.mxu1 %v8018_v31 }
 0x694   :  { %7452 = vmatpush3.bf16.msra.mxu0 %v8004_v21 }
 0x695   :  { %7453 = vmatprep.subr.bf16.mxu0 %v8430_v0 }
 0x698   :  { %7454 = vmatpush3.bf16.msra.mxu0 %v8006_v23 }
 0x699   :  { %7455 = vmatprep.subr.bf16.mxu0 %v8430_v0 }
 0x69c   :  { %7456 = vmatpush3.bf16.msra.mxu0 %v8008_v25 }
 0x69d   :  { %7457 = vmatprep.subr.bf16.mxu0 %v8430_v0 }
 0x6a0   :  { %7458 = vmatpush3.bf16.msra.mxu0 %v8010_v27  ;;  %v6456_v27 = vld [vmem:[%s6302_s15] ss:$0 sm:$0xff]  ;;  %s6314_s15 = sld [smem:[%s9334_s0 + %s8455_s12]]  }
 0x6a1   :  { %7459 = vmatprep.subr.bf16.mxu0 %v8430_v0 }
 0x6a4   :  { %7460 = vmatpush3.bf16.msra.mxu0 %v8011_v28 }
 0x6a5   :  { %7461 = vmatprep.subr.bf16.mxu0 %v8430_v0 }
 0x6a8   :  { %7462 = vmatpush3.bf16.msra.mxu0 %v8012_v29 }
 0x6a9   :  { %2429 = vmatprep.subr.bf16.mxu0 %v8015_v30 }
 0x746   :  { %v1877_v32 = vpop.f32.mrb[40].mxu1 }
 0x747   :  { %v7413_v33 = vpop.f32.mrb[41].mxu1 }
 0x748   :  { %v1880_v34 = vpop.f32.mrb[42].mxu1 }
 0x749   :  { %v7414_v35 = vpop.f32.mrb[43].mxu1 }
 0x74a   :  { %v8061_v35 = vld [vmem:[%s8805_s11 + $0x180] ss:$8 sps:$4 sm:$0xff]  }
 0x74e   :  { %v1789_v36 = vpop.f32.mrb[24].mxu0 }
 0x74f   :  { %v8809_v37 = vadd.f32 %v1877_v32, %v1789_v36  ;;  %v7393_v38 = vpop.f32.mrb[25].mxu0 }
 0x750   :  { %v1792_v39 = vpop.f32.mrb[26].mxu0  ;;  %v8064_v38 = vld [vmem:[%s8805_s11 + $0x100] ss:$8 sps:$4 sm:$0xff]  }
 0x751   :  { %v7394_v40 = vpop.f32.mrb[27].mxu0 }
 0x752   :  { %v8072_v40 = vld [vmem:[%s8805_s11 + $0x114] ss:$8 sps:$4 sm:$0xff]  }
 0x756   :  { %v1920_v41 = vpop.f32.mrb[28].mxu0 }
 0x757   :  { %v1926_v43 = vpack.c.bf16 %v1920_v41, %v1920_v41  ;;  %v7419_v44 = vpop.f32.mrb[29].mxu0  ;;  %v8067_v41 = vld [vmem:[%s8805_s11 + $0x190] ss:$8 sps:$4 sm:$0xff]  }
 0x758   :  { %v1923_v46 = vpop.f32.mrb[30].mxu0  ;;  %v8078_v44 = vld [vmem:[%s8805_s11 + $0x124] ss:$8 sps:$4 sm:$0xff]  }
 0x759   :  { %v7420_v47 = vpop.f32.mrb[31].mxu0  ;;  %7438 = vmatmul.mubr.bf16.vlgmr.msra.gmra.mrb[44].mxu1 %v1926_v43  ;;  %v8070_v43 = vld [vmem:[%s8805_s11 + $0x110] ss:$8 sps:$4 sm:$0xff]   ;;  %v8081_v46 = vld [vmem:[%s8805_s11 + $0x1b4] ss:$8 sps:$4 sm:$0xff]  }
 0x75a   :  { %2309 = vmatpush1.bf16.msra.mxu1 %v8016_v42  ;;  %2340 = vmatprep.mubr.bf16.mxu1 %v8439_v19  ;;  %v8075_v42 = vld [vmem:[%s8805_s11 + $0x1a4] ss:$8 sps:$4 sm:$0xff]   ;;  %v8076_v47 = vld [vmem:[%s8805_s11 + $0x120] ss:$8 sps:$4 sm:$0xff]  }
 0x75b   :  { %2310 = vmatprep.subr.bf16.mxu1 %v8024_v45  ;;  %v8073_v45 = vld [vmem:[%s8805_s11 + $0x1a0] ss:$8 sps:$4 sm:$0xff]  }
 0x75e   :  { %v2053_v50 = vpop.f32.mrb[32].mxu0  ;;  %2311 = vmatpush1.bf16.msra.mxu1 %v8022_v48  ;;  %v8084_v48 = vld [vmem:[%s8805_s11 + $0x134] ss:$8 sps:$4 sm:$0xff]  }
 0x75f   :  { %v2059_v53 = vpack.c.bf16 %v2053_v50, %v2053_v50  ;;  %v7445_v54 = vpop.f32.mrb[33].mxu0  ;;  %2312 = vmatprep.subr.bf16.mxu1 %v8030_v49  ;;  %v8079_v49 = vld [vmem:[%s8805_s11 + $0x1b0] ss:$8 sps:$4 sm:$0xff]   ;;  %v8087_v50 = vld [vmem:[%s8805_s11 + $0x1c4] ss:$8 sps:$4 sm:$0xff]  }
 0x760   :  { %v2056_v57 = vpop.f32.mrb[34].mxu0  ;;  %v8093_v54 = vld [vmem:[%s8805_s11 + $0x1d4] ss:$8 sps:$4 sm:$0xff]  }
 0x761   :  { %v7446_v58 = vpop.f32.mrb[35].mxu0  ;;  %7464 = vmatmul.mubr.bf16.vlgmr.msra.gmra.mrb[36].mxu0 %v2059_v53  ;;  %v8085_v53 = vld [vmem:[%s8805_s11 + $0x1c0] ss:$8 sps:$4 sm:$0xff]   ;;  %v8091_v57 = vld [vmem:[%s8805_s11 + $0x1d0] ss:$8 sps:$4 sm:$0xff]  }
 0x762   :  { %2430 = vmatpush1.bf16.msra.mxu0 %v8013_v51  ;;  %2313 = vmatpush1.bf16.msra.mxu1 %v8028_v52  ;;  %v8082_v51 = vld [vmem:[%s8805_s11 + $0x130] ss:$8 sps:$4 sm:$0xff]   ;;  %v8090_v52 = vld [vmem:[%s8805_s11 + $0x144] ss:$8 sps:$4 sm:$0xff]  }
 0x763   :  { %2431 = vmatprep.subr.bf16.mxu0 %v8021_v55  ;;  %2314 = vmatprep.subr.bf16.mxu1 %v8036_v56  ;;  %v8088_v55 = vld [vmem:[%s8805_s11 + $0x140] ss:$8 sps:$4 sm:$0xff]   ;;  %v8096_v56 = vld [vmem:[%s8805_s11 + $0x154] ss:$8 sps:$4 sm:$0xff]   ;;  %v8099_v58 = vld [vmem:[%s8805_s11 + $0x1e4] ss:$8 sps:$4 sm:$0xff]  }
 0x764   :  { %2461 = vmatprep.mubr.bf16.mxu0 %v8439_v19 }
 0x766   :  { %2432 = vmatpush1.bf16.msra.mxu0 %v8019_v59  ;;  %2315 = vmatpush1.bf16.msra.mxu1 %v8034_v60  ;;  %v8094_v59 = vld [vmem:[%s8805_s11 + $0x150] ss:$8 sps:$4 sm:$0xff]   ;;  %v8102_v60 = vld [vmem:[%s8805_s11 + $0x164] ss:$8 sps:$4 sm:$0xff]  }
 0x767   :  { %2433 = vmatprep.subr.bf16.mxu0 %v8027_v61  ;;  %2316 = vmatprep.subr.bf16.mxu1 %v8042_v4  ;;  %v8097_v61 = vld [vmem:[%s8805_s11 + $0x1e0] ss:$8 sps:$4 sm:$0xff]  }
 0x76a   :  { %2434 = vmatpush1.bf16.msra.mxu0 %v8025_v62  ;;  %2317 = vmatpush1.bf16.msra.mxu1 %v8040_v5  ;;  %v8105_v62 = vld [vmem:[%s8805_s11 + $0x1f4] ss:$8 sps:$4 sm:$0xff]  }
 0x76b   :  { %2435 = vmatprep.subr.bf16.mxu0 %v8033_v63  ;;  %2318 = vmatprep.subr.bf16.mxu1 %v8048_v8  ;;  %v8100_v63 = vld [vmem:[%s8805_s11 + $0x160] ss:$8 sps:$4 sm:$0xff]  }
 0x76c   :  { %v8111_v8 = vld [vmem:[%s6305_s19 + $0x48] sm:$0xff]  }
 0x76e   :  { %2436 = vmatpush1.bf16.msra.mxu0 %v8031_v1  ;;  %2319 = vmatpush1.bf16.msra.mxu1 %v8046_v9  ;;  %v8108_v1 = vld [vmem:[%s8805_s11 + $0x174] ss:$8 sps:$4 sm:$0xff]   ;;  %v8112_v9 = vld [vmem:[%s6305_s19 + $0x8] sm:$0xff]  }
 0x76f   :  { %2437 = vmatprep.subr.bf16.mxu0 %v8039_v2  ;;  %2320 = vmatprep.subr.bf16.mxu1 %v8054_v12  ;;  %v8103_v2 = vld [vmem:[%s8805_s11 + $0x1f0] ss:$8 sps:$4 sm:$0xff]  }
 0x770   :  { %v8115_v12 = vld [vmem:[%s6305_s19 + $0x58] sm:$0xff]  }
 0x772   :  { %2438 = vmatpush1.bf16.msra.mxu0 %v8037_v3  ;;  %2321 = vmatpush1.bf16.msra.mxu1 %v8052_v13  ;;  %v8106_v3 = vld [vmem:[%s8805_s11 + $0x170] ss:$8 sps:$4 sm:$0xff]  }
 0x773   :  { %2439 = vmatprep.subr.bf16.mxu0 %v8045_v7  ;;  %2322 = vmatprep.subr.bf16.mxu1 %v8060_v16  ;;  %v8110_v7 = vld [vmem:[%s6305_s19] sm:$0xff]   ;;  %v8116_v13 = vld [vmem:[%s6305_s19 + $0x18] sm:$0xff]   ;;  %v8119_v16 = vld [vmem:[%s6305_s19 + $0x68] sm:$0xff]  }
 0x776   :  { %2440 = vmatpush1.bf16.msra.mxu0 %v8043_v6  ;;  %2323 = vmatpush1.bf16.msra.mxu1 %v8058_v17  ;;  %v8109_v6 = vld [vmem:[%s6305_s19 + $0x40] sm:$0xff]   ;;  %v8120_v17 = vld [vmem:[%s6305_s19 + $0x28] sm:$0xff]  }
 0x777   :  { %2441 = vmatprep.subr.bf16.mxu0 %v8051_v10  ;;  %2552 = vmatprep.subr.bf16.mxu1 %v8066_v20  ;;  %v8113_v10 = vld [vmem:[%s6305_s19 + $0x50] sm:$0xff]  }
 0x778   :  { %v8122_v20 = vld [vmem:[%s6305_s19 + $0x30] sm:$0xff]  }
 0x77a   :  { %2442 = vmatpush1.bf16.msra.mxu0 %v8049_v11  ;;  %v8114_v11 = vld [vmem:[%s6305_s19 + $0x10] sm:$0xff]  }
 0x77b   :  { %2443 = vmatprep.subr.bf16.mxu0 %v8057_v14  ;;  %v8117_v14 = vld [vmem:[%s6305_s19 + $0x60] sm:$0xff]  }
 0x77e   :  { %2444 = vmatpush1.bf16.msra.mxu0 %v8055_v15  ;;  %v8118_v15 = vld [vmem:[%s6305_s19 + $0x20] sm:$0xff]  }
 0x77f   :  { %2677 = vmatprep.subr.bf16.mxu0 %v8063_v18  ;;  %v8121_v18 = vld [vmem:[%s6305_s19 + $0x70] sm:$0xff]  }
 0x82c   :  { %v2009_v21 = vpop.f32.mrb[44].mxu1 }
 0x82d   :  { %v2015_v22 = vadd.f32 %v2009_v21, %v8809_v37  ;;  %v7439_v23 = vpop.f32.mrb[45].mxu1  ;;  %v8069_v37 = vld [vmem:[%s8805_s11 + $0x194] ss:$8 sps:$4 sm:$0xff]   ;;  %s9058_s11 = sld [smem:[%s9334_s0 + %s8454_s8]]  }
 0x82e   :  { %v2012_v24 = vpop.f32.mrb[46].mxu1  ;;  %v8123_v21 = vld [vmem:[%s6305_s19 + $0x78] sm:$0xff]   ;;  %v8125_v23 = vld [vmem:[%s8895_s23] ss:$8 sps:$4 sm:$0xff]  }
 0x82f   :  { %v7440_v25 = vpop.f32.mrb[47].mxu1  ;;  %v8127_v24 = vld [vmem:[%s8895_s23 + $0x4] ss:$8 sps:$4 sm:$0xff]  }
 0x830   :  { %v8130_v25 = vld [vmem:[%s8895_s23 + $0x14] ss:$8 sps:$4 sm:$0xff]  }
 0x834   :  { %v2142_v26 = vpop.f32.mrb[36].mxu0 }
 0x835   :  { %v2148_v28 = vadd.f32 %v2142_v26, %v2015_v22  ;;  %v7465_v29 = vpop.f32.mrb[37].mxu0  ;;  %v8124_v22 = vld [vmem:[%s6305_s19 + $0x38] sm:$0xff]   ;;  %s9156_s19 = sld [smem:[%s9334_s0 + %s8456_s16]]  }
 0x836   :  { %v2145_v30 = vpop.f32.mrb[38].mxu0  ;;  %v8128_v26 = vld [vmem:[%s8895_s23 + $0x10] ss:$8 sps:$4 sm:$0xff]   ;;  %v8136_v29 = vld [vmem:[%s8895_s23 + $0x34] ss:$8 sps:$4 sm:$0xff]  }
 0x837   :  { %v2156_v31 = vadd.f32 %v6456_v27, %v2148_v28  ;;  %v7466_v32 = vpop.f32.mrb[39].mxu0  ;;  %v8133_v27 = vld [vmem:[%s8895_s23 + $0x24] ss:$8 sps:$4 sm:$0xff]   ;;  %v8131_v28 = vld [vmem:[%s8895_s23 + $0x20] ss:$8 sps:$4 sm:$0xff]  }
 0x838   :  { %v8134_v30 = vld [vmem:[%s8895_s23 + $0x30] ss:$8 sps:$4 sm:$0xff]   ;;  %v8137_v32 = vld [vmem:[%s8895_s23 + $0x40] ss:$8 sps:$4 sm:$0xff]  }
 0x839   :  { %vm2157_vm11 = vcmp.ge.f32.partialorder %v2156_v31, 0.0  ;;  %v2158_v33 = vmul.f32 0.01, %v2156_v31 }
 0x83b   :  { %v2159_v34 = vsel %vm2157_vm11, %v2156_v31, %v2158_v33  ;;  %v8139_v31 = vld [vmem:[%s8895_s23 + $0x44] ss:$8 sps:$4 sm:$0xff]   ;;  %v8142_v33 = vld [vmem:[%s8895_s23 + $0x54] ss:$8 sps:$4 sm:$0xff]  }
 0x83c   :  { %v8850_v36 = vpack.c.bf16 %v2159_v34, %v2159_v34  ;;  %v8140_v34 = vld [vmem:[%s8895_s23 + $0x50] ss:$8 sps:$4 sm:$0xff]  }
 0x83e   :  { %2462 = vmatmul.mubr.bf16.vlgmr.msra.gmra.mrb[40].mxu0 %v8850_v36  ;;  %v2226_v39 = vrot.slane %v8850_v36, 1  ;;  %v2595_v4 = vrot.slane %v8850_v36, 3  ;;  %v2470_v5 = vrot.slane %v8850_v36, 2 }
 0x83f   :  { %2678 = vmatpush1.bf16.msra.mxu0 %v8061_v35  ;;  %2709 = vmatprep.mubr.bf16.mxu0 %v8439_v19 }
 0x840   :  { %2341 = vmatmul.mubr.bf16.vlgmr.msra.gmra.mrb[48].mxu1 %v2226_v39  ;;  %2679 = vmatprep.subr.bf16.mxu0 %v8069_v37 }
 0x841   :  { %2553 = vmatpush1.bf16.msra.mxu1 %v8064_v38  ;;  %2584 = vmatprep.mubr.bf16.mxu1 %v8439_v19 }
 0x842   :  { %2554 = vmatprep.subr.bf16.mxu1 %v8072_v40 }
 0x843   :  { %2680 = vmatpush1.bf16.msra.mxu0 %v8067_v41 }
 0x844   :  { %2681 = vmatprep.subr.bf16.mxu0 %v8075_v42 }
 0x845   :  { %2555 = vmatpush1.bf16.msra.mxu1 %v8070_v43 }
 0x846   :  { %2556 = vmatprep.subr.bf16.mxu1 %v8078_v44 }
 0x847   :  { %2682 = vmatpush1.bf16.msra.mxu0 %v8073_v45  ;;  %v2722_v45 = vlaneseq }
 0x848   :  { %2683 = vmatprep.subr.bf16.mxu0 %v8081_v46 }
 0x849   :  { %2557 = vmatpush1.bf16.msra.mxu1 %v8076_v47  ;;  %v8912_v46 = vshrl.u32 %v2722_v45, 7  ;;  %v8155_v45 = vld [vmem:[%s8937_s9 + $0x14] ss:$8 sps:$4 sm:$0xff]  }
 0x84a   :  { %2558 = vmatprep.subr.bf16.mxu1 %v8084_v48 }
 0x84b   :  { %2684 = vmatpush1.bf16.msra.mxu0 %v8079_v49  ;;  %v8915_v47 = vsub.s32 0, %v8912_v46  ;;  %v2720_v49 = vld [vmem:[%s6304_s27] sm:$0x3]  ;;  %s6317_s27 = sld [smem:[%s9334_s0 + %s8458_s24]]  }
 0x84c   :  { %2685 = vmatprep.subr.bf16.mxu0 %v8087_v50  ;;  %v8918_v50 = vsub.s32 1, %v8912_v46 }
 0x84d   :  { %2559 = vmatpush1.bf16.msra.mxu1 %v8082_v51 }
 0x84e   :  { %2560 = vmatprep.subr.bf16.mxu1 %v8090_v52 }
 0x84f   :  { %2686 = vmatpush1.bf16.msra.mxu0 %v8085_v53 }
 0x850   :  { %2687 = vmatprep.subr.bf16.mxu0 %v8093_v54 }
 0x851   :  { %2561 = vmatpush1.bf16.msra.mxu1 %v8088_v55  ;;  %v2725_v55 = vrot.slane %v2720_v49, %v8915_v47 }
 0x852   :  { %2562 = vmatprep.subr.bf16.mxu1 %v8096_v56 }
 0x853   :  { %2688 = vmatpush1.bf16.msra.mxu0 %v8091_v57 }
 0x854   :  { %2689 = vmatprep.subr.bf16.mxu0 %v8099_v58 }
 0x855   :  { %2563 = vmatpush1.bf16.msra.mxu1 %v8094_v59  ;;  %v2729_v59 = vrot.slane %v2720_v49, %v8918_v50  ;;  %v8158_v49 = vld [vmem:[%s8937_s9 + $0x24] ss:$8 sps:$4 sm:$0xff]  }
 0x856   :  { %2564 = vmatprep.subr.bf16.mxu1 %v8102_v60 }
 0x857   :  { %2690 = vmatpush1.bf16.msra.mxu0 %v8097_v61 }
 0x858   :  { %2691 = vmatprep.subr.bf16.mxu0 %v8105_v62 }
 0x859   :  { %2565 = vmatpush1.bf16.msra.mxu1 %v8100_v63 }
 0x85a   :  { %2566 = vmatprep.subr.bf16.mxu1 %v8108_v1 }
 0x85b   :  { %2692 = vmatpush1.bf16.msra.mxu0 %v8103_v2 }
 0x85c   :  { %3029 = vmatprep.subr.bf16.mxu0 %v8127_v24  ;;  %v8149_v24 = vld [vmem:[%s6309_s5] sm:$0x1f]   ;;  %s9233_s5 = sld [smem:[%s9334_s0 + %s8460_s2]]  }
 0x85d   :  { %2567 = vmatpush1.bf16.msra.mxu1 %v8106_v3 }
 0x85e   :  { %2710 = vmatmul.mubr.bf16.vlgmr.msra.gmra.mrb[44].mxu0 %v2595_v4  ;;  %6947 = vmatprep.subr.bf16.mxu1 %v8109_v6 }
 0x85f   :  { %3061 = vmatprep.mubr.bf16.mxu0 %v8439_v19  ;;  %3030 = vmatpush1.bf16.msra.mxu0 %v8125_v23 }
 0x860   :  { %2585 = vmatmul.mubr.bf16.vlgmr.msra.gmra.mrb[52].mxu1 %v2470_v5  ;;  %3031 = vmatprep.subr.bf16.mxu0 %v8130_v25  ;;  %v3109_v25 = vsel %vm3107_vm15, %v8149_v24, 0  ;;  %v8248_v24 = vld [vmem:[%s8970_s25 + $0x184] ss:$16 sps:$4 sm:$0xff]  }
 0x861   :  { %6948 = vmatpush3.bf16.msra.mxu1 %v8110_v7 }
 0x862   :  { %6949 = vmatprep.subr.bf16.mxu1 %v8111_v8 }
 0x863   :  { %3032 = vmatpush1.bf16.msra.mxu0 %v8128_v26  ;;  %v8152_v26 = vld [vmem:[%s8937_s9 + $0x4] ss:$8 sps:$4 sm:$0xff]  }
 0x864   :  { %3033 = vmatprep.subr.bf16.mxu0 %v8133_v27  ;;  %v2937_v27 = vld [vmem:[%s6308_s13] sm:$0x3]  ;;  %s6323_s13 = sld [smem:[%s9334_s0 + %s8462_s10]]  }
 0x865   :  { %6950 = vmatpush3.bf16.msra.mxu1 %v8112_v9  ;;  %v8145_v9 = vld [vmem:[%s8895_s23 + $0x64] ss:$8 sps:$4 sm:$0xff]  }
 0x866   :  { %6951 = vmatprep.subr.bf16.mxu1 %v8113_v10  ;;  %v8143_v10 = vld [vmem:[%s8895_s23 + $0x60] ss:$8 sps:$4 sm:$0xff]  }
 0x867   :  { %3034 = vmatpush1.bf16.msra.mxu0 %v8131_v28  ;;  %v2942_v28 = vrot.slane %v2937_v27, %v8915_v47 }
 0x868   :  { %3035 = vmatprep.subr.bf16.mxu0 %v8136_v29  ;;  %v2946_v29 = vrot.slane %v2937_v27, %v8918_v50  ;;  %v8252_v27 = vld [vmem:[%s8970_s25 + $0x1a0] ss:$16 sps:$4 sm:$0xff]  }
 0x869   :  { %6952 = vmatpush3.bf16.msra.mxu1 %v8114_v11  ;;  %v8148_v11 = vld [vmem:[%s8895_s23 + $0x74] ss:$8 sps:$4 sm:$0xff]  }
 0x86a   :  { %6953 = vmatprep.subr.bf16.mxu1 %v8115_v12  ;;  %v8146_v12 = vld [vmem:[%s8895_s23 + $0x70] ss:$8 sps:$4 sm:$0xff]   ;;  %s9163_s23 = sld [smem:[%s9334_s0 + %s8457_s20]]  }
 0x86b   :  { %3036 = vmatpush1.bf16.msra.mxu0 %v8134_v30 }
 0x86c   :  { %3037 = vmatprep.subr.bf16.mxu0 %v8139_v31 }
 0x86d   :  { %6954 = vmatpush3.bf16.msra.mxu1 %v8116_v13 }
 0x86e   :  { %6955 = vmatprep.subr.bf16.mxu1 %v8117_v14  ;;  %v6521_v14 = vld [vmem:[%s6306_s1] ss:$0 sm:$0xff]  ;;  %s9226_s1 = sld [smem:[%s9334_s0 + %s8459_s28]]  }
 0x86f   :  { %3038 = vmatpush1.bf16.msra.mxu0 %v8137_v32 }
 0x870   :  { %3039 = vmatprep.subr.bf16.mxu0 %v8142_v33 }
 0x871   :  { %6956 = vmatpush3.bf16.msra.mxu1 %v8118_v15 }
 0x872   :  { %6957 = vmatprep.subr.bf16.mxu1 %v8119_v16 }
 0x873   :  { %3040 = vmatpush1.bf16.msra.mxu0 %v8140_v34 }
 0x874   :  { %3041 = vmatprep.subr.bf16.mxu0 %v8145_v9  ;;  %v8206_v9 = vld [vmem:[%s8970_s25 + $0xa4] ss:$16 sps:$4 sm:$0xff]  }
 0x875   :  { %6958 = vmatpush3.bf16.msra.mxu1 %v8120_v17 }
 0x876   :  { %6959 = vmatprep.subr.bf16.mxu1 %v8121_v18 }
 0x877   :  { %3042 = vmatpush1.bf16.msra.mxu0 %v8143_v10  ;;  %v8204_v10 = vld [vmem:[%s8970_s25 + $0xa0] ss:$16 sps:$4 sm:$0xff]  }
 0x878   :  { %3043 = vmatprep.subr.bf16.mxu0 %v8148_v11  ;;  %v8212_v11 = vld [vmem:[%s8970_s25 + $0xc4] ss:$16 sps:$4 sm:$0xff]  }
 0x879   :  { %6960 = vmatpush3.bf16.msra.mxu1 %v8122_v20 }
 0x87a   :  { %6961 = vmatprep.subr.bf16.mxu1 %v8123_v21 }
 0x87b   :  { %3044 = vmatpush1.bf16.msra.mxu0 %v8146_v12  ;;  %v8210_v12 = vld [vmem:[%s8970_s25 + $0xc0] ss:$16 sps:$4 sm:$0xff]  }
 0x87d   :  { %6962 = vmatpush3.bf16.msra.mxu1 %v8124_v22 }
 0x87e   :  { %7467 = vmatprep.subr.bf16.mxu1 %v8430_v0 }
 0x911   :  { %v2463_v35 = vpop.f32.mrb[40].mxu0 }
 0x912   :  { %v2465_v36 = vpop.f32.mrb[41].mxu0 }
 0x913   :  { %v2342_v37 = vpop.f32.mrb[48].mxu1  ;;  %v2467_v38 = vpop.f32.mrb[42].mxu0 }
 0x914   :  { %v2464_v39 = vadd.f32 %v2463_v35, %v2342_v37  ;;  %v2344_v40 = vpop.f32.mrb[49].mxu1  ;;  %v2468_v41 = vpop.f32.mrb[43].mxu0 }
 0x915   :  { %v2466_v42 = vadd.f32 %v2465_v36, %v2344_v40  ;;  %v2346_v43 = vpop.f32.mrb[50].mxu1 }
 0x916   :  { %v2347_v44 = vpop.f32.mrb[51].mxu1  ;;  %v8150_v43 = vld [vmem:[%s8937_s9] ss:$8 sps:$4 sm:$0xff]  }
 0x931   :  { %v2711_v48 = vpop.f32.mrb[44].mxu0 }
 0x932   :  { %v2713_v51 = vpop.f32.mrb[45].mxu0 }
 0x933   :  { %v2586_v52 = vpop.f32.mrb[52].mxu1  ;;  %v2715_v53 = vpop.f32.mrb[46].mxu0 }
 0x934   :  { %v2593_v54 = vadd.f32 %v2586_v52, %v2464_v39  ;;  %v2588_v56 = vpop.f32.mrb[53].mxu1  ;;  %v2716_v57 = vpop.f32.mrb[47].mxu0  ;;  %v3082_v39 = vld [vmem:[%s6293_s21] sm:$0x3]  ;;  %v8161_v52 = vld [vmem:[%s8937_s9 + $0x34] ss:$8 sps:$4 sm:$0xff]  }
 0x935   :  { %v2594_v58 = vadd.f32 %v2588_v56, %v2466_v42  ;;  %v2590_v60 = vpop.f32.mrb[54].mxu1  ;;  %v8159_v53 = vld [vmem:[%s8937_s9 + $0x30] ss:$8 sps:$4 sm:$0xff]   ;;  %v8167_v56 = vld [vmem:[%s8937_s9 + $0x54] ss:$8 sps:$4 sm:$0xff]  }
 0x936   :  { %v2718_v61 = vadd.f32 %v2711_v48, %v2593_v54  ;;  %v2591_v62 = vpop.f32.mrb[55].mxu1  ;;  %v8153_v48 = vld [vmem:[%s8937_s9 + $0x10] ss:$8 sps:$4 sm:$0xff]   ;;  %v8164_v54 = vld [vmem:[%s8937_s9 + $0x44] ss:$8 sps:$4 sm:$0xff]  }
 0x937   :  { %v2719_v63 = vadd.f32 %v2713_v51, %v2594_v58  ;;  %v8156_v51 = vld [vmem:[%s8937_s9 + $0x20] ss:$8 sps:$4 sm:$0xff]   ;;  %v8170_v57 = vld [vmem:[%s8937_s9 + $0x64] ss:$8 sps:$4 sm:$0xff]   ;;  %v8171_v60 = vld [vmem:[%s8937_s9 + $0x70] ss:$8 sps:$4 sm:$0xff]  }
 0x938   :  { %v2732_v1 = vadd.f32 %v2725_v55, %v2718_v61  ;;  %v8162_v55 = vld [vmem:[%s8937_s9 + $0x40] ss:$8 sps:$4 sm:$0xff]   ;;  %v8176_v62 = vld [vmem:[%s8970_s25 + $0x4] ss:$16 sps:$4 sm:$0xff]  }
 0x939   :  { %v2733_v2 = vadd.f32 %v2729_v59, %v2719_v63  ;;  %v8168_v58 = vld [vmem:[%s8937_s9 + $0x60] ss:$8 sps:$4 sm:$0xff]   ;;  %v8173_v59 = vld [vmem:[%s8937_s9 + $0x74] ss:$8 sps:$4 sm:$0xff]   ;;  %3718 = vmatprep.subr.bf16.mxu0 %v8176_v62 }
 0x93a   :  { %vm2734_vm12 = vcmp.ge.f32.partialorder %v2732_v1, 0.0  ;;  %v2736_v3 = vmul.f32 0.01, %v2732_v1  ;;  %v8174_v61 = vld [vmem:[%s8970_s25] ss:$16 sps:$4 sm:$0xff]  }
 0x93b   :  { %vm2735_vm13 = vcmp.ge.f32.partialorder %v2733_v2, 0.0  ;;  %v2737_v4 = vmul.f32 0.01, %v2733_v2  ;;  %v8179_v63 = vld [vmem:[%s8970_s25 + $0xc] ss:$16 sps:$4 sm:$0xff]  }
 0x93c   :  { %v2738_v5 = vsel %vm2734_vm12, %v2732_v1, %v2736_v3  ;;  %v8182_v1 = vld [vmem:[%s8970_s25 + $0x24] ss:$16 sps:$4 sm:$0xff]   ;;  %v8251_v62 = vld [vmem:[%s8970_s25 + $0x18c] ss:$16 sps:$4 sm:$0xff]  }
 0x93d   :  { %v2739_v6 = vsel %vm2735_vm13, %v2733_v2, %v2737_v4  ;;  %v2740_v8 = vpack.c.bf16 %v2738_v5, %v2738_v5  ;;  %v8180_v2 = vld [vmem:[%s8970_s25 + $0x20] ss:$16 sps:$4 sm:$0xff]   ;;  %v8188_v3 = vld [vmem:[%s8970_s25 + $0x44] ss:$16 sps:$4 sm:$0xff]  }
 0x93e   :  { %v2741_v7 = vpack.c.bf16 %v2739_v6, %v2739_v6  ;;  %v8186_v4 = vld [vmem:[%s8970_s25 + $0x40] ss:$16 sps:$4 sm:$0xff]   ;;  %v8194_v5 = vld [vmem:[%s8970_s25 + $0x64] ss:$16 sps:$4 sm:$0xff]  }
 0x93f   :  { %v8192_v6 = vld [vmem:[%s8970_s25 + $0x60] ss:$16 sps:$4 sm:$0xff]  }
 0x940   :  { %2909 = vmatprep.mubr.bf16.mxu1 %v2741_v7  ;;  %v8200_v7 = vld [vmem:[%s8970_s25 + $0x84] ss:$16 sps:$4 sm:$0xff]  }
 0x941   :  { %2910 = vmatmul.mubr.bf16.vlgmr.msra.gmra.mrb[56].mxu1 %v2740_v8  ;;  %v8198_v8 = vld [vmem:[%s8970_s25 + $0x80] ss:$16 sps:$4 sm:$0xff]  }
 0x942   :  { %7469 = vmatprep.mubr.msk.bf16.mxu1 %vm8432_vm2, %v8430_v0  ;;  %7468 = vmatpush3.bf16.msra.mxu1 %v3109_v25  ;;  %v8246_v25 = vld [vmem:[%s8970_s25 + $0x180] ss:$16 sps:$4 sm:$0xff]  }
 0x943   :  { %3263 = vmatprep.subr.bf16.mxu1 %v8152_v26  ;;  %v8254_v26 = vld [vmem:[%s8970_s25 + $0x1a4] ss:$16 sps:$4 sm:$0xff]  }
 0xa14   :  { %v6963_v13 = vpop.f32.mrb[56].mxu1 }
 0xa15   :  { %v6964_v15 = vpop.f32.mrb[57].mxu1 }
 0xa16   :  { %v6965_v16 = vadd.f32 %v6964_v15, %v6963_v13  ;;  %v6966_v17 = vpop.f32.mrb[58].mxu1  ;;  %v8218_v13 = vld [vmem:[%s8970_s25 + $0xe4] ss:$16 sps:$4 sm:$0xff]  }
 0xa17   :  { %v6967_v18 = vpop.f32.mrb[59].mxu1  ;;  %v8224_v15 = vld [vmem:[%s8970_s25 + $0x104] ss:$16 sps:$4 sm:$0xff]  }
 0xa18   :  { %v2912_v20 = vadd.f32 %v6965_v16, %v6521_v14  ;;  %v8216_v14 = vld [vmem:[%s8970_s25 + $0xe0] ss:$16 sps:$4 sm:$0xff]   ;;  %v8230_v17 = vld [vmem:[%s8970_s25 + $0x124] ss:$16 sps:$4 sm:$0xff]  }
 0xa19   :  { %v8222_v16 = vld [vmem:[%s8970_s25 + $0x100] ss:$16 sps:$4 sm:$0xff]  }
 0xa1a   :  { %vm2917_vm14 = vcmp.ge.f32.partialorder %v2912_v20, 0.0  ;;  %v2918_v21 = vmul.f32 0.01, %v2912_v20  ;;  %v8228_v18 = vld [vmem:[%s8970_s25 + $0x120] ss:$16 sps:$4 sm:$0xff]  }
 0xa1c   :  { %v2919_v22 = vsel %vm2917_vm14, %v2912_v20, %v2918_v21  ;;  %v8236_v20 = vld [vmem:[%s8970_s25 + $0x144] ss:$16 sps:$4 sm:$0xff]   ;;  %v8234_v21 = vld [vmem:[%s8970_s25 + $0x140] ss:$16 sps:$4 sm:$0xff]  }
 0xa1d   :  { %v2920_v23 = vpack.c.bf16 %v2919_v22, %v2919_v22  ;;  %v8242_v22 = vld [vmem:[%s8970_s25 + $0x164] ss:$16 sps:$4 sm:$0xff]  }
 0xa1f   :  { %3062 = vmatmul.mubr.bf16.vlgmr.msra.gmra.mrb[48].mxu0 %v2920_v23  ;;  %v8240_v23 = vld [vmem:[%s8970_s25 + $0x160] ss:$16 sps:$4 sm:$0xff]  }
 0xa20   :  { %3719 = vmatpush1.bf16.msra.mxu0 %v8174_v61  ;;  %v8243_v61 = vld [vmem:[%s8970_s25 + $0x168] ss:$16 sps:$4 sm:$0xff]  }
 0xa21   :  { %3720 = vmatprep.subr.bf16.mxu0 %v8182_v1  ;;  %v8257_v1 = vld [vmem:[%s8970_s25 + $0x1ac] ss:$16 sps:$4 sm:$0xff]  }
 0xa24   :  { %3721 = vmatpush1.bf16.msra.mxu0 %v8180_v2  ;;  %v8255_v2 = vld [vmem:[%s8970_s25 + $0x1a8] ss:$16 sps:$4 sm:$0xff]  }
 0xa25   :  { %3722 = vmatprep.subr.bf16.mxu0 %v8188_v3  ;;  %v8260_v3 = vld [vmem:[%s8970_s25 + $0x1c4] ss:$16 sps:$4 sm:$0xff]  }
 0xa28   :  { %3723 = vmatpush1.bf16.msra.mxu0 %v8186_v4  ;;  %v8263_v4 = vld [vmem:[%s8970_s25 + $0x1cc] ss:$16 sps:$4 sm:$0xff]  }
 0xa29   :  { %3724 = vmatprep.subr.bf16.mxu0 %v8194_v5  ;;  %v8258_v5 = vld [vmem:[%s8970_s25 + $0x1c0] ss:$16 sps:$4 sm:$0xff]  }
 0xa2c   :  { %3725 = vmatpush1.bf16.msra.mxu0 %v8192_v6  ;;  %v8261_v6 = vld [vmem:[%s8970_s25 + $0x1c8] ss:$16 sps:$4 sm:$0xff]  }
 0xa2d   :  { %3726 = vmatprep.subr.bf16.mxu0 %v8200_v7  ;;  %v8266_v7 = vld [vmem:[%s8970_s25 + $0x1e4] ss:$16 sps:$4 sm:$0xff]  }
 0xa30   :  { %3727 = vmatpush1.bf16.msra.mxu0 %v8198_v8  ;;  %v8269_v8 = vld [vmem:[%s8970_s25 + $0x1ec] ss:$16 sps:$4 sm:$0xff]  }
 0xa31   :  { %3728 = vmatprep.subr.bf16.mxu0 %v8206_v9  ;;  %v8264_v9 = vld [vmem:[%s8970_s25 + $0x1e0] ss:$16 sps:$4 sm:$0xff]  }
 0xa34   :  { %3729 = vmatpush1.bf16.msra.mxu0 %v8204_v10  ;;  %v8267_v10 = vld [vmem:[%s8970_s25 + $0x1e8] ss:$16 sps:$4 sm:$0xff]  }
 0xa35   :  { %3730 = vmatprep.subr.bf16.mxu0 %v8212_v11  ;;  %v3171_v11 = vld [vmem:[%s6312_s3] sm:$0x3] }
 0xa38   :  { %3731 = vmatpush1.bf16.msra.mxu0 %v8210_v12  ;;  %v3176_v12 = vrot.slane %v3171_v11, %v8915_v47 }
 0xa39   :  { %3732 = vmatprep.subr.bf16.mxu0 %v8218_v13  ;;  %v3180_v13 = vrot.slane %v3171_v11, %v8918_v50 }
 0xa3c   :  { %3733 = vmatpush1.bf16.msra.mxu0 %v8216_v14 }
 0xa3d   :  { %3734 = vmatprep.subr.bf16.mxu0 %v8224_v15 }
 0xa40   :  { %3735 = vmatpush1.bf16.msra.mxu0 %v8222_v16 }
 0xa41   :  { %3736 = vmatprep.subr.bf16.mxu0 %v8230_v17 }
 0xa44   :  { %3737 = vmatpush1.bf16.msra.mxu0 %v8228_v18 }
 0xa45   :  { %3738 = vmatprep.subr.bf16.mxu0 %v8236_v20 }
 0xa48   :  { %3739 = vmatpush1.bf16.msra.mxu0 %v8234_v21 }
 0xa49   :  { %3740 = vmatprep.subr.bf16.mxu0 %v8242_v22 }
 0xa4c   :  { %3741 = vmatpush1.bf16.msra.mxu0 %v8240_v23 }
 0xa4d   :  { %3742 = vmatprep.subr.bf16.mxu0 %v8248_v24 }
 0xa50   :  { %3743 = vmatpush1.bf16.msra.mxu0 %v8246_v25 }
 0xa51   :  { %3744 = vmatprep.subr.bf16.mxu0 %v8254_v26 }
 0xa54   :  { %3745 = vmatpush1.bf16.msra.mxu0 %v8252_v27  ;;  %v8272_v27 = vld [vmem:[%s9058_s11] sm:$0xff]  }
 0xa55   :  { %3746 = vmatprep.subr.bf16.mxu0 %v8260_v3  ;;  %v8280_v3 = vld [vmem:[%s9058_s11 + $0x58] sm:$0xff]  }
 0xa58   :  { %3747 = vmatpush1.bf16.msra.mxu0 %v8258_v5  ;;  %v8284_v5 = vld [vmem:[%s9058_s11 + $0x68] sm:$0xff]  }
 0xa59   :  { %3748 = vmatprep.subr.bf16.mxu0 %v8266_v7  ;;  %v8286_v7 = vld [vmem:[%s9058_s11 + $0x70] sm:$0xff]  }
 0xa5c   :  { %3749 = vmatpush1.bf16.msra.mxu0 %v8264_v9 }
 0xa5d   :  { %7473 = vmatprep.subr.bf16.mxu0 %v8430_v0 }
 0xaf2   :  { %v3063_v30 = vpop.f32.mrb[48].mxu0 }
 0xaf3   :  { %v3064_v31 = vadd.f32 %v3063_v30, %v2942_v28  ;;  %v3065_v32 = vpop.f32.mrb[49].mxu0  ;;  %v6555_v28 = vld [vmem:[%s6310_s29] ss:$0 sm:$0xff] }
 0xaf4   :  { %v3066_v33 = vadd.f32 %v3065_v32, %v2946_v29  ;;  %v3067_v34 = vpop.f32.mrb[50].mxu0 }
 0xaf5   :  { %v3068_v35 = vpop.f32.mrb[51].mxu0 }
 0xaf6   :  { %v3072_v36 = vcombine.low %v3064_v31, %v3066_v33  ;;  %v3083_v37 = vmul.f32 0.5, %v3066_v33 }
 0xaf8   :  { %6554 = vst.sshfl [vmem:[%s6324_s17] sm:$0x33 pattern:$0x76325410] %v3072_v36  ;;  %v3084_v38 = vmul.f32 1.442695, %v3083_v37  ;;  %s6325_s17 = sld [smem:[%s9334_s0 + %s8463_s14]]  }
 0xaf9   :  { %v8177_v36 = vld [vmem:[%s8970_s25 + $0x8] ss:$16 sps:$4 sm:$0xff]  }
 0xafa   :  { %8394 = vpow2.f32 %v3084_v38  ;;  %v8185_v38 = vld [vmem:[%s8970_s25 + $0x2c] ss:$16 sps:$4 sm:$0xff]  }
 0xb04   :  { %v8395_v40 = vpop.eup %8394 }
 0xb05   :  { %v3086_v41 = vmul.f32 %v8395_v40, %v3082_v39  ;;  %v8183_v39 = vld [vmem:[%s8970_s25 + $0x28] ss:$16 sps:$4 sm:$0xff]   ;;  %v8191_v40 = vld [vmem:[%s8970_s25 + $0x4c] ss:$16 sps:$4 sm:$0xff]  }
 0xb07   :  { %v3087_v42 = vadd.f32 %v3086_v41, %v3064_v31  ;;  %v8189_v41 = vld [vmem:[%s8970_s25 + $0x48] ss:$16 sps:$4 sm:$0xff]  }
 0xb09   :  { %v3088_v44 = vpack.c.bf16 %v3087_v42, %v3087_v42  ;;  %v8197_v42 = vld [vmem:[%s8970_s25 + $0x6c] ss:$16 sps:$4 sm:$0xff]  }
 0xb0b   :  { %7470 = vmatmul.mubr.msk.bf16.vlgmr.msra.gmra.mrb[60].mxu1 %vm3103_vm0, %v3088_v44  ;;  %v8203_v44 = vld [vmem:[%s8970_s25 + $0x8c] ss:$16 sps:$4 sm:$0xff]  }
 0xb0c   :  { %3264 = vmatpush1.bf16.msra.mxu1 %v8150_v43  ;;  %3295 = vmatprep.mubr.bf16.mxu1 %v8439_v19  ;;  %v8165_v19 = vld [vmem:[%s8937_s9 + $0x50] ss:$8 sps:$4 sm:$0xff]   ;;  %s6320_s9 = sld [smem:[%s9334_s0 + %s8461_s6]]  }
 0xb0d   :  { %3265 = vmatprep.subr.bf16.mxu1 %v8155_v45  ;;  %v8195_v43 = vld [vmem:[%s8970_s25 + $0x68] ss:$16 sps:$4 sm:$0xff]  }
 0xb0e   :  { %v8201_v45 = vld [vmem:[%s8970_s25 + $0x88] ss:$16 sps:$4 sm:$0xff]  }
 0xb10   :  { %3266 = vmatpush1.bf16.msra.mxu1 %v8153_v48  ;;  %v8209_v48 = vld [vmem:[%s8970_s25 + $0xac] ss:$16 sps:$4 sm:$0xff]  }
 0xb11   :  { %3267 = vmatprep.subr.bf16.mxu1 %v8158_v49  ;;  %v8207_v49 = vld [vmem:[%s8970_s25 + $0xa8] ss:$16 sps:$4 sm:$0xff]  }
 0xb14   :  { %3268 = vmatpush1.bf16.msra.mxu1 %v8156_v51  ;;  %v8215_v51 = vld [vmem:[%s8970_s25 + $0xcc] ss:$16 sps:$4 sm:$0xff]  }
 0xb15   :  { %3269 = vmatprep.subr.bf16.mxu1 %v8161_v52  ;;  %v8213_v52 = vld [vmem:[%s8970_s25 + $0xc8] ss:$16 sps:$4 sm:$0xff]  }
 0xb18   :  { %3270 = vmatpush1.bf16.msra.mxu1 %v8159_v53  ;;  %v8221_v53 = vld [vmem:[%s8970_s25 + $0xec] ss:$16 sps:$4 sm:$0xff]  }
 0xb19   :  { %3271 = vmatprep.subr.bf16.mxu1 %v8164_v54  ;;  %v8219_v54 = vld [vmem:[%s8970_s25 + $0xe8] ss:$16 sps:$4 sm:$0xff]  }
 0xb1c   :  { %3272 = vmatpush1.bf16.msra.mxu1 %v8162_v55  ;;  %v8227_v55 = vld [vmem:[%s8970_s25 + $0x10c] ss:$16 sps:$4 sm:$0xff]  }
 0xb1d   :  { %3273 = vmatprep.subr.bf16.mxu1 %v8167_v56  ;;  %v8225_v56 = vld [vmem:[%s8970_s25 + $0x108] ss:$16 sps:$4 sm:$0xff]  }
 0xb20   :  { %3274 = vmatpush1.bf16.msra.mxu1 %v8165_v19  ;;  %v8233_v19 = vld [vmem:[%s8970_s25 + $0x12c] ss:$16 sps:$4 sm:$0xff]  }
 0xb21   :  { %3275 = vmatprep.subr.bf16.mxu1 %v8170_v57  ;;  %v8231_v57 = vld [vmem:[%s8970_s25 + $0x128] ss:$16 sps:$4 sm:$0xff]  }
 0xb24   :  { %3276 = vmatpush1.bf16.msra.mxu1 %v8168_v58  ;;  %v8239_v58 = vld [vmem:[%s8970_s25 + $0x14c] ss:$16 sps:$4 sm:$0xff]  }
 0xb25   :  { %3277 = vmatprep.subr.bf16.mxu1 %v8173_v59  ;;  %v8237_v59 = vld [vmem:[%s8970_s25 + $0x148] ss:$16 sps:$4 sm:$0xff]  }
 0xb28   :  { %3278 = vmatpush1.bf16.msra.mxu1 %v8171_v60  ;;  %v8245_v60 = vld [vmem:[%s8970_s25 + $0x16c] ss:$16 sps:$4 sm:$0xff]  }
 0xb29   :  { %3759 = vmatprep.subr.bf16.mxu1 %v8179_v63  ;;  %v8249_v63 = vld [vmem:[%s8970_s25 + $0x188] ss:$16 sps:$4 sm:$0xff]  }
 0xbde   :  { %v3145_v29 = vpop.f32.mrb[60].mxu1 }
 0xbdf   :  { %v3146_v30 = vadd.f32 %v6555_v28, %v3145_v29  ;;  %v7471_v31 = vpop.f32.mrb[61].mxu1  ;;  %v8273_v28 = vld [vmem:[%s9058_s11 + $0x8] sm:$0xff]   ;;  %v8275_v29 = vld [vmem:[%s9058_s11 + $0x10] sm:$0xff]  }
 0xbe0   :  { %v3148_v32 = vpop.f32.mrb[62].mxu1  ;;  %v8279_v31 = vld [vmem:[%s9058_s11 + $0x20] sm:$0xff]  }
 0xbe1   :  { %vm3151_vm3 = vcmp.ge.f32.partialorder %v3146_v30, 0.0  ;;  %v3152_v33 = vmul.f32 0.01, %v3146_v30  ;;  %v7472_v34 = vpop.f32.mrb[63].mxu1  ;;  %v8281_v32 = vld [vmem:[%s9058_s11 + $0x28] sm:$0xff]  }
 0xbe2   :  { %v3388_v34 = vsub.s32 2, %v8912_v46 }
 0xbe3   :  { %v3153_v35 = vsel %vm3151_vm3, %v3146_v30, %v3152_v33  ;;  %v8277_v30 = vld [vmem:[%s9058_s11 + $0x18] sm:$0xff]   ;;  %v8283_v33 = vld [vmem:[%s9058_s11 + $0x30] sm:$0xff]  }
 0xbe4   :  { %v3154_v37 = vpack.c.bf16 %v3153_v35, %v3153_v35  ;;  %v3376_v35 = vld [vmem:[%s6314_s15] sm:$0xf] }
 0xbe6   :  { %3296 = vmatmul.mubr.bf16.vlgmr.msra.gmra.mrb[64].mxu1 %v3154_v37  ;;  %v3381_v37 = vrot.slane %v3376_v35, %v8915_v47 }
 0xbe7   :  { %3760 = vmatpush1.bf16.msra.mxu1 %v8177_v36  ;;  %v3392_v36 = vsub.s32 3, %v8912_v46 }
 0xbe8   :  { %3761 = vmatprep.subr.bf16.mxu1 %v8185_v38  ;;  %v3389_v38 = vrot.slane %v3376_v35, %v3388_v34  ;;  %v8302_v34 = vld [vmem:[%s9058_s11 + $0xf0] sm:$0xff]  }
 0xbeb   :  { %3762 = vmatpush1.bf16.msra.mxu1 %v8183_v39  ;;  %v3385_v39 = vrot.slane %v3376_v35, %v8918_v50 }
 0xbec   :  { %3763 = vmatprep.subr.bf16.mxu1 %v8191_v40  ;;  %v3393_v40 = vrot.slane %v3376_v35, %v3392_v36  ;;  %v8303_v35 = vld [vmem:[%s9058_s11 + $0xb0] sm:$0xff]   ;;  %v8304_v36 = vld [vmem:[%s9058_s11 + $0xf8] sm:$0xff]  }
 0xbef   :  { %3764 = vmatpush1.bf16.msra.mxu1 %v8189_v41 }
 0xbf0   :  { %3765 = vmatprep.subr.bf16.mxu1 %v8197_v42 }
 0xbf3   :  { %3766 = vmatpush1.bf16.msra.mxu1 %v8195_v43 }
 0xbf4   :  { %3767 = vmatprep.subr.bf16.mxu1 %v8203_v44 }
 0xbf7   :  { %3768 = vmatpush1.bf16.msra.mxu1 %v8201_v45 }
 0xbf8   :  { %3769 = vmatprep.subr.bf16.mxu1 %v8209_v48 }
 0xbfb   :  { %3770 = vmatpush1.bf16.msra.mxu1 %v8207_v49 }
 0xbfc   :  { %3771 = vmatprep.subr.bf16.mxu1 %v8215_v51 }
 0xbff   :  { %3772 = vmatpush1.bf16.msra.mxu1 %v8213_v52 }
 0xc00   :  { %3773 = vmatprep.subr.bf16.mxu1 %v8221_v53 }
 0xc03   :  { %3774 = vmatpush1.bf16.msra.mxu1 %v8219_v54 }
 0xc04   :  { %3775 = vmatprep.subr.bf16.mxu1 %v8227_v55 }
 0xc07   :  { %3776 = vmatpush1.bf16.msra.mxu1 %v8225_v56 }
 0xc08   :  { %3777 = vmatprep.subr.bf16.mxu1 %v8233_v19 }
 0xc0b   :  { %3778 = vmatpush1.bf16.msra.mxu1 %v8231_v57 }
 0xc0c   :  { %3779 = vmatprep.subr.bf16.mxu1 %v8239_v58 }
 0xc0f   :  { %3780 = vmatpush1.bf16.msra.mxu1 %v8237_v59 }
 0xc10   :  { %3781 = vmatprep.subr.bf16.mxu1 %v8245_v60 }
 0xc13   :  { %3782 = vmatpush1.bf16.msra.mxu1 %v8243_v61  ;;  %v8270_v61 = vld [vmem:[%s9053_s7] sm:$0xff]  }
 0xc14   :  { %3783 = vmatprep.subr.bf16.mxu1 %v8251_v62  ;;  %v8271_v62 = vld [vmem:[%s9053_s7 + $0x8] sm:$0xff]  }
 0xc17   :  { %3784 = vmatpush1.bf16.msra.mxu1 %v8249_v63  ;;  %v8274_v63 = vld [vmem:[%s9058_s11 + $0x40] sm:$0xff]  }
 0xc18   :  { %3785 = vmatprep.subr.bf16.mxu1 %v8257_v1  ;;  %v8276_v1 = vld [vmem:[%s9058_s11 + $0x48] sm:$0xff]  }
 0xc1b   :  { %3786 = vmatpush1.bf16.msra.mxu1 %v8255_v2  ;;  %v8278_v2 = vld [vmem:[%s9058_s11 + $0x50] sm:$0xff]  }
 0xc1c   :  { %3787 = vmatprep.subr.bf16.mxu1 %v8263_v4  ;;  %v8282_v4 = vld [vmem:[%s9058_s11 + $0x60] sm:$0xff]  }
 0xc1f   :  { %3788 = vmatpush1.bf16.msra.mxu1 %v8261_v6  ;;  %v8285_v6 = vld [vmem:[%s9058_s11 + $0x38] sm:$0xff]  }
 0xc20   :  { %3789 = vmatprep.subr.bf16.mxu1 %v8269_v8  ;;  %v8287_v8 = vld [vmem:[%s9058_s11 + $0x78] sm:$0xff]  }
 0xc23   :  { %3790 = vmatpush1.bf16.msra.mxu1 %v8267_v10 }
 0xc24   :  { %7505 = vmatprep.subr.bf16.mxu1 %v8430_v0 }
 0xcb9   :  { %v3297_v14 = vpop.f32.mrb[64].mxu1 }
 0xcba   :  { %v3298_v15 = vadd.f32 %v3297_v14, %v3176_v12  ;;  %v3299_v16 = vpop.f32.mrb[65].mxu1 }
 0xcbb   :  { %v3300_v17 = vadd.f32 %v3299_v16, %v3180_v13  ;;  %v3301_v18 = vpop.f32.mrb[66].mxu1  ;;  %v8288_v16 = vld [vmem:[%s9053_s7 + $0x18] sm:$0xff]  }
 0xcbc   :  { %vm3304_vm4 = vcmp.ge.f32.partialorder %v3298_v15, 0.0  ;;  %v3306_v20 = vmul.f32 0.01, %v3298_v15  ;;  %v3302_v21 = vpop.f32.mrb[67].mxu1 }
 0xcbd   :  { %vm3305_vm5 = vcmp.ge.f32.partialorder %v3300_v17, 0.0  ;;  %v3307_v22 = vmul.f32 0.01, %v3300_v17  ;;  %v8290_v21 = vld [vmem:[%s9058_s11 + $0xc0] sm:$0xff]  }
 0xcbe   :  { %v3308_v23 = vsel %vm3304_vm4, %v3298_v15, %v3306_v20 }
 0xcbf   :  { %v3309_v24 = vsel %vm3305_vm5, %v3300_v17, %v3307_v22  ;;  %v3310_v26 = vpack.c.bf16 %v3308_v23, %v3308_v23  ;;  %v8292_v22 = vld [vmem:[%s9058_s11 + $0xc8] sm:$0xff]   ;;  %v8289_v23 = vld [vmem:[%s9053_s7 + $0x10] sm:$0xff]  }
 0xcc0   :  { %v3311_v25 = vpack.c.bf16 %v3309_v24, %v3309_v24  ;;  %v8291_v24 = vld [vmem:[%s9058_s11 + $0x80] sm:$0xff]  }
 0xcc2   :  { %3750 = vmatprep.mubr.bf16.mxu0 %v3311_v25  ;;  %3791 = vmatprep.mubr.bf16.mxu1 %v3311_v25  ;;  %v8294_v25 = vld [vmem:[%s9058_s11 + $0xd0] sm:$0xff]  }
 0xcc3   :  { %3751 = vmatmul.mubr.bf16.vlgmr.msra.gmra.mrb[52].mxu0 %v3310_v26  ;;  %3792 = vmatmul.mubr.bf16.vlgmr.msra.gmra.mrb[68].mxu1 %v3310_v26  ;;  %v8293_v26 = vld [vmem:[%s9058_s11 + $0x88] sm:$0xff]  }
 0xcc4   :  { %7475 = vmatprep.mubr.msk.bf16.mxu0 %vm8432_vm2, %v8430_v0  ;;  %7521 = vmatprep.mubr.msk.bf16.mxu1 %vm8432_vm2, %v8430_v0 }
 0xcc5   :  { %7506 = vmatpush3.bf16.msra.mxu1 %v8272_v27  ;;  %v8296_v27 = vld [vmem:[%s9058_s11 + $0xd8] sm:$0xff]  }
 0xcc6   :  { %7507 = vmatprep.subr.bf16.mxu1 %v8430_v0 }
 0xcc9   :  { %7508 = vmatpush3.bf16.msra.mxu1 %v8273_v28  ;;  %v8295_v28 = vld [vmem:[%s9058_s11 + $0x90] sm:$0xff]  }
 0xcca   :  { %7509 = vmatprep.subr.bf16.mxu1 %v8430_v0 }
 0xccd   :  { %7510 = vmatpush3.bf16.msra.mxu1 %v8275_v29  ;;  %v8297_v29 = vld [vmem:[%s9058_s11 + $0x98] sm:$0xff]  }
 0xcce   :  { %7511 = vmatprep.subr.bf16.mxu1 %v8430_v0 }
 0xcd1   :  { %7512 = vmatpush3.bf16.msra.mxu1 %v8277_v30  ;;  %v8298_v30 = vld [vmem:[%s9058_s11 + $0xe0] sm:$0xff]  }
 0xcd2   :  { %7513 = vmatprep.subr.bf16.mxu1 %v8430_v0 }
 0xcd5   :  { %7514 = vmatpush3.bf16.msra.mxu1 %v8279_v31  ;;  %v8299_v31 = vld [vmem:[%s9058_s11 + $0xa0] sm:$0xff]  }
 0xcd6   :  { %7515 = vmatprep.subr.bf16.mxu1 %v8430_v0 }
 0xcd9   :  { %7516 = vmatpush3.bf16.msra.mxu1 %v8281_v32  ;;  %v8300_v32 = vld [vmem:[%s9058_s11 + $0xe8] sm:$0xff]  }
 0xcda   :  { %7517 = vmatprep.subr.bf16.mxu1 %v8430_v0 }
 0xcdd   :  { %7518 = vmatpush3.bf16.msra.mxu1 %v8283_v33  ;;  %v8301_v33 = vld [vmem:[%s9058_s11 + $0xa8] sm:$0xff]  }
 0xcde   :  { %7519 = vmatprep.subr.bf16.mxu1 %v8430_v0 }
 0xce1   :  { %7520 = vmatpush3.bf16.msra.mxu1 %v8285_v6  ;;  %v6681_v6 = vld [vmem:[%s6317_s27] ss:$0 sm:$0xff] }
 0xce2   :  { %7551 = vmatprep.subr.bf16.mxu1 %v8430_v0 }
 0xd96   :  { %v3752_v41 = vpop.f32.mrb[52].mxu0  ;;  %v3793_v42 = vpop.f32.mrb[68].mxu1 }
 0xd97   :  { %v3753_v43 = vadd.f32 %v3752_v41, %v3381_v37  ;;  %v3794_v44 = vadd.f32 %v3793_v42, %v3389_v38  ;;  %v3754_v45 = vpop.f32.mrb[53].mxu0  ;;  %v3795_v48 = vpop.f32.mrb[69].mxu1  ;;  %v8305_v37 = vld [vmem:[%s9058_s11 + $0xb8] sm:$0xff]  }
 0xd98   :  { %v3755_v49 = vadd.f32 %v3754_v45, %v3385_v39  ;;  %v3796_v51 = vadd.f32 %v3795_v48, %v3393_v40  ;;  %v3756_v52 = vpop.f32.mrb[54].mxu0  ;;  %v3797_v53 = vpop.f32.mrb[70].mxu1 }
 0xd99   :  { %v3800_v54 = vpack.c.bf16 %v3753_v43, %v3753_v43  ;;  %v6797_v55 = vpack.c.bf16 %v3794_v44, %v3794_v44  ;;  %v3757_v46 = vpop.f32.mrb[55].mxu0  ;;  %v3798_v56 = vpop.f32.mrb[71].mxu1 }
 0xd9a   :  { %v6796_v47 = vpack.c.bf16 %v3755_v49, %v3755_v49  ;;  %v6798_v19 = vpack.c.bf16 %v3796_v51, %v3796_v51 }
 0xd9b   :  { %3801 = vst [vmem:[#allocation2] sm:$0x1] %v3800_v54  ;;  %v3813_v50 = vrot.slane %v6797_v55, 6 }
 0xd9c   :  { %v3806_v57 = vrot.slane %v6796_v47, 7  ;;  %v3820_v58 = vrot.slane %v6798_v19, 5 }
 0xd9d   :  { %3815 = vst [vmem:[#allocation2] sm:$0x4] %v3813_v50  ;;  %v8306_v50 = vld [vmem:[%s9156_s19] sm:$0xff]  }
 0xd9e   :  { %3808 = vst [vmem:[#allocation2] sm:$0x2] %v3806_v57  ;;  %3822 = vst [vmem:[#allocation2] sm:$0x8] %v3820_v58  ;;  %v8314_v57 = vld [vmem:[%s9163_s23 + $0x40] sm:$0xff]   ;;  %v8315_v58 = vld [vmem:[%s9163_s23 + $0x48] sm:$0xff]  }
 0xda5   :  { %v3823_v59 = vld [vmem:[#allocation2] sm:$0xf] }
 0xda6   :  { %v3907_v60 = vsel %vm3905_vm6, %v3823_v59, 0  ;;  %v8316_v59 = vld [vmem:[%s9163_s23 + $0x50] sm:$0xff]  }
 0xda7   :  { %7474 = vmatpush3.bf16.msra.mxu0 %v3907_v60 }
 0xda8   :  { %7479 = vmatprep.subr.bf16.mxu0 %v8430_v0 }
 0xdaa   :  { %7476 = vmatmul.mubr.msk.bf16.vlgmr.msra.gmra.mrb[56].mxu0 %vm3901_vm8, %v8270_v61  ;;  %v8318_v61 = vld [vmem:[%s9163_s23 + $0x60] sm:$0xff]  }
 0xdab   :  { %7480 = vmatpush3.bf16.msra.mxu0 %v3907_v60  ;;  %7481 = vmatprep.mubr.msk.bf16.mxu0 %vm8432_vm2, %v8430_v0 }
 0xdac   :  { %7485 = vmatprep.subr.bf16.mxu0 %v8430_v0 }
 0xdb2   :  { %7482 = vmatmul.mubr.msk.bf16.vlgmr.msra.gmra.mrb[60].mxu0 %vm3901_vm8, %v8271_v62 }
 0xdb3   :  { %7486 = vmatpush3.bf16.msra.mxu0 %v8274_v63  ;;  %7501 = vmatprep.mubr.msk.bf16.mxu0 %vm8432_vm2, %v8430_v0 }
 0xdb4   :  { %7487 = vmatprep.subr.bf16.mxu0 %v8430_v0 }
 0xdb7   :  { %7488 = vmatpush3.bf16.msra.mxu0 %v8276_v1 }
 0xdb8   :  { %7489 = vmatprep.subr.bf16.mxu0 %v8430_v0 }
 0xdbb   :  { %7490 = vmatpush3.bf16.msra.mxu0 %v8278_v2 }
 0xdbc   :  { %7491 = vmatprep.subr.bf16.mxu0 %v8430_v0 }
 0xdbf   :  { %7492 = vmatpush3.bf16.msra.mxu0 %v8280_v3 }
 0xdc0   :  { %7493 = vmatprep.subr.bf16.mxu0 %v8430_v0 }
 0xdc3   :  { %7494 = vmatpush3.bf16.msra.mxu0 %v8282_v4 }
 0xdc4   :  { %7495 = vmatprep.subr.bf16.mxu0 %v8430_v0 }
 0xdc7   :  { %7496 = vmatpush3.bf16.msra.mxu0 %v8284_v5 }
 0xdc8   :  { %7497 = vmatprep.subr.bf16.mxu0 %v8430_v0 }
 0xdcb   :  { %7498 = vmatpush3.bf16.msra.mxu0 %v8286_v7 }
 0xdcc   :  { %7499 = vmatprep.subr.bf16.mxu0 %v8430_v0 }
 0xdcf   :  { %7500 = vmatpush3.bf16.msra.mxu0 %v8287_v8 }
 0xdd0   :  { %7525 = vmatprep.subr.bf16.mxu0 %v8430_v0 }
 0xe7d   :  { %v3943_v9 = vpop.f32.mrb[56].mxu0 }
 0xe7e   :  { %v7477_v10 = vpop.f32.mrb[57].mxu0 }
 0xe7f   :  { %v3946_v11 = vpop.f32.mrb[58].mxu0 }
 0xe80   :  { %v3950_v12 = vpack.c.bf16 %v3946_v11, %v3943_v9  ;;  %v7478_v13 = vpop.f32.mrb[59].mxu0 }
 0xe82   :  { %7522 = vmatmul.mubr.bf16.vlgmr.msra.gmra.mrb[72].mxu1 %v3950_v12 }
 0xe83   :  { %7552 = vmatpush3.bf16.msra.mxu1 %v3907_v60  ;;  %7553 = vmatprep.mubr.msk.bf16.mxu1 %vm8432_vm2, %v8430_v0 }
 0xe84   :  { %7557 = vmatprep.subr.bf16.mxu1 %v8430_v0 }
 0xe85   :  { %v3993_v14 = vpop.f32.mrb[60].mxu0 }
 0xe86   :  { %v7483_v15 = vpop.f32.mrb[61].mxu0 }
 0xe87   :  { %v3996_v17 = vpop.f32.mrb[62].mxu0 }
 0xe88   :  { %v4000_v18 = vpack.c.bf16 %v3996_v17, %v3993_v14  ;;  %v7484_v20 = vpop.f32.mrb[63].mxu0 }
 0xe89   :  { %v8307_v20 = vld [vmem:[%s9156_s19 + $0x8] sm:$0xff]  }
 0xe8a   :  { %7502 = vmatmul.mubr.bf16.vlgmr.msra.gmra.mrb[64].mxu0 %v4000_v18  ;;  %7554 = vmatmul.mubr.msk.bf16.vlgmr.msra.gmra.mrb[76].mxu1 %vm3901_vm8, %v8288_v16 }
 0xe8b   :  { %7526 = vmatpush3.bf16.msra.mxu0 %v3907_v60  ;;  %7527 = vmatprep.mubr.msk.bf16.mxu0 %vm8432_vm2, %v8430_v0  ;;  %v8317_v60 = vld [vmem:[%s9163_s23 + $0x58] sm:$0xff]  }
 0xe8c   :  { %7558 = vmatpush3.bf16.msra.mxu1 %v8290_v21  ;;  %7531 = vmatprep.subr.bf16.mxu0 %v8430_v0  ;;  %v8308_v21 = vld [vmem:[%s9156_s19 + $0x10] sm:$0xff]  }
 0xe8d   :  { %7559 = vmatprep.subr.bf16.mxu1 %v8430_v0  ;;  %7573 = vmatprep.mubr.msk.bf16.mxu1 %vm8432_vm2, %v8430_v0 }
 0xe90   :  { %7560 = vmatpush3.bf16.msra.mxu1 %v8292_v22  ;;  %v8309_v22 = vld [vmem:[%s9156_s19 + $0x18] sm:$0xff]  }
 0xe91   :  { %7561 = vmatprep.subr.bf16.mxu1 %v8430_v0 }
 0xe92   :  { %7528 = vmatmul.mubr.msk.bf16.vlgmr.msra.gmra.mrb[68].mxu0 %vm3901_vm8, %v8289_v23  ;;  %v8310_v23 = vld [vmem:[%s9156_s19 + $0x20] sm:$0xff]  }
 0xe93   :  { %7532 = vmatpush3.bf16.msra.mxu0 %v8291_v24  ;;  %7547 = vmatprep.mubr.msk.bf16.mxu0 %vm8432_vm2, %v8430_v0  ;;  %v8311_v24 = vld [vmem:[%s9156_s19 + $0x28] sm:$0xff]  }
 0xe94   :  { %7533 = vmatprep.subr.bf16.mxu0 %v8430_v0  ;;  %7562 = vmatpush3.bf16.msra.mxu1 %v8294_v25  ;;  %v8312_v25 = vld [vmem:[%s9156_s19 + $0x30] sm:$0xff]  }
 0xe95   :  { %7563 = vmatprep.subr.bf16.mxu1 %v8430_v0 }
 0xe97   :  { %7534 = vmatpush3.bf16.msra.mxu0 %v8293_v26  ;;  %v8313_v26 = vld [vmem:[%s9156_s19 + $0x38] sm:$0xff]  }
 0xe98   :  { %7535 = vmatprep.subr.bf16.mxu0 %v8430_v0  ;;  %7564 = vmatpush3.bf16.msra.mxu1 %v8296_v27  ;;  %v8319_v27 = vld [vmem:[%s9163_s23 + $0x68] sm:$0xff]  }
 0xe99   :  { %7565 = vmatprep.subr.bf16.mxu1 %v8430_v0 }
 0xe9b   :  { %7536 = vmatpush3.bf16.msra.mxu0 %v8295_v28  ;;  %v8320_v28 = vld [vmem:[%s9163_s23 + $0x70] sm:$0xff]  }
 0xe9c   :  { %7537 = vmatprep.subr.bf16.mxu0 %v8430_v0  ;;  %7566 = vmatpush3.bf16.msra.mxu1 %v8298_v30  ;;  %v8322_v30 = vld [vmem:[%s9163_s23] sm:$0xff]  }
 0xe9d   :  { %7567 = vmatprep.subr.bf16.mxu1 %v8430_v0 }
 0xe9f   :  { %7538 = vmatpush3.bf16.msra.mxu0 %v8297_v29  ;;  %v8321_v29 = vld [vmem:[%s9163_s23 + $0x78] sm:$0xff]  }
 0xea0   :  { %7539 = vmatprep.subr.bf16.mxu0 %v8430_v0  ;;  %7568 = vmatpush3.bf16.msra.mxu1 %v8300_v32 }
 0xea1   :  { %7569 = vmatprep.subr.bf16.mxu1 %v8430_v0 }
 0xea3   :  { %7540 = vmatpush3.bf16.msra.mxu0 %v8299_v31 }
 0xea4   :  { %7541 = vmatprep.subr.bf16.mxu0 %v8430_v0  ;;  %7570 = vmatpush3.bf16.msra.mxu1 %v8302_v34 }
 0xea5   :  { %7571 = vmatprep.subr.bf16.mxu1 %v8430_v0 }
 0xea7   :  { %7542 = vmatpush3.bf16.msra.mxu0 %v8301_v33 }
 0xea8   :  { %7543 = vmatprep.subr.bf16.mxu0 %v8430_v0  ;;  %7572 = vmatpush3.bf16.msra.mxu1 %v8304_v36 }
 0xea9   :  { %7589 = vmatprep.subr.bf16.mxu1 %v8314_v57 }
 0xeab   :  { %7544 = vmatpush3.bf16.msra.mxu0 %v8303_v35 }
 0xeac   :  { %7545 = vmatprep.subr.bf16.mxu0 %v8430_v0 }
 0xeaf   :  { %7546 = vmatpush3.bf16.msra.mxu0 %v8305_v37 }
 0xf55   :  { %v4172_v38 = vpop.f32.mrb[72].mxu1 }
 0xf56   :  { %v7523_v39 = vpop.f32.mrb[73].mxu1 }
 0xf57   :  { %v4175_v40 = vpop.f32.mrb[74].mxu1 }
 0xf58   :  { %v7524_v41 = vpop.f32.mrb[75].mxu1 }
 0xf5d   :  { %v4083_v42 = vpop.f32.mrb[64].mxu0  ;;  %v4362_v43 = vpop.f32.mrb[76].mxu1 }
 0xf5e   :  { %v4173_v44 = vadd.f32 %v4172_v38, %v4083_v42  ;;  %v7503_v45 = vpop.f32.mrb[65].mxu0  ;;  %v7555_v48 = vpop.f32.mrb[77].mxu1 }
 0xf5f   :  { %v4086_v49 = vpop.f32.mrb[66].mxu0  ;;  %v4365_v51 = vpop.f32.mrb[78].mxu1  ;;  %v8324_v45 = vld [vmem:[%s9163_s23 + $0x10] sm:$0xff]  }
 0xf60   :  { %v4176_v52 = vadd.f32 %v4175_v40, %v4086_v49  ;;  %v7504_v53 = vpop.f32.mrb[67].mxu0  ;;  %v4369_v54 = vpack.c.bf16 %v4365_v51, %v4362_v43  ;;  %v7556_v55 = vpop.f32.mrb[79].mxu1  ;;  %v8323_v43 = vld [vmem:[%s9163_s23 + $0x8] sm:$0xff]  }
 0xf62   :  { %7574 = vmatmul.mubr.bf16.vlgmr.msra.gmra.mrb[80].mxu1 %v4369_v54  ;;  %v8325_v54 = vld [vmem:[%s9163_s23 + $0x18] sm:$0xff]  }
 0xf63   :  { %7590 = vmatpush3.bf16.msra.mxu1 %v8314_v57  ;;  %v8327_v57 = vld [vmem:[%s9163_s23 + $0x28] sm:$0xff]  }
 0xf64   :  { %7591 = vmatprep.subr.bf16.mxu1 %v8315_v58 }
 0xf65   :  { %v4221_v46 = vpop.f32.mrb[68].mxu0 }
 0xf66   :  { %v7529_v0 = vpop.f32.mrb[69].mxu0 }
 0xf67   :  { %v4224_v56 = vpop.f32.mrb[70].mxu0  ;;  %7592 = vmatpush3.bf16.msra.mxu1 %v8315_v58  ;;  %v8328_v58 = vld [vmem:[%s9163_s23 + $0x30] sm:$0xff]  }
 0xf68   :  { %v4228_v47 = vpack.c.bf16 %v4224_v56, %v4221_v46  ;;  %v7530_v19 = vpop.f32.mrb[71].mxu0  ;;  %7593 = vmatprep.subr.bf16.mxu1 %v8316_v59  ;;  %v8326_v46 = vld [vmem:[%s9163_s23 + $0x20] sm:$0xff]  }
 0xf6a   :  { %7548 = vmatmul.mubr.bf16.vlgmr.msra.gmra.mrb[72].mxu0 %v4228_v47 }
 0xf6b   :  { %7579 = vmatprep.mubr.msk.bf16.mxu0 %vm1618_vm10, %v8306_v50  ;;  %7594 = vmatpush3.bf16.msra.mxu1 %v8316_v59  ;;  %v8329_v59 = vld [vmem:[%s9163_s23 + $0x38] sm:$0xff]  }
 0xf6c   :  { %7595 = vmatprep.subr.bf16.mxu1 %v8317_v60 }
 0xf6f   :  { %7596 = vmatpush3.bf16.msra.mxu1 %v8317_v60  ;;  %v8330_v60 = vld [vmem:[%s9163_s23 + $0x80] sm:$0xff]  }
 0xf70   :  { %7597 = vmatprep.subr.bf16.mxu1 %v8318_v61 }
 0xf73   :  { %7598 = vmatpush3.bf16.msra.mxu1 %v8318_v61  ;;  %v8331_v61 = vld [vmem:[%s9163_s23 + $0x88] sm:$0xff]  }
 0xf74   :  { %7599 = vmatprep.subr.bf16.mxu1 %v8319_v27 }
 0xf77   :  { %7600 = vmatpush3.bf16.msra.mxu1 %v8319_v27 }
 0xf78   :  { %7601 = vmatprep.subr.bf16.mxu1 %v8320_v28 }
 0xf7b   :  { %7602 = vmatpush3.bf16.msra.mxu1 %v8320_v28 }
 0xf7c   :  { %7603 = vmatprep.subr.bf16.mxu1 %v8321_v29 }
 0xf7f   :  { %7604 = vmatpush3.bf16.msra.mxu1 %v8321_v29 }
 0xf80   :  { %7609 = vmatprep.subr.bf16.mxu1 %v8322_v30 }
0x1035   :  { %v4452_v62 = vpop.f32.mrb[80].mxu1 }
0x1036   :  { %v7575_v63 = vpop.f32.mrb[81].mxu1 }
0x1037   :  { %v4455_v1 = vpop.f32.mrb[82].mxu1  ;;  %v8333_v63 = vld [vmem:[%s9163_s23 + $0x98] sm:$0xff]  }
0x1038   :  { %v7576_v2 = vpop.f32.mrb[83].mxu1 }
0x1039   :  { %v8335_v2 = vld [vmem:[%s9163_s23 + $0xa8] sm:$0xff]  }
0x103d   :  { %v4311_v3 = vpop.f32.mrb[72].mxu0 }
0x103e   :  { %v4318_v4 = vadd.f32 %v4311_v3, %v4173_v44  ;;  %v7549_v5 = vpop.f32.mrb[73].mxu0  ;;  %v8336_v3 = vld [vmem:[%s9163_s23 + $0xb0] sm:$0xff]  }
0x103f   :  { %v4314_v7 = vpop.f32.mrb[74].mxu0  ;;  %v8338_v5 = vld [vmem:[%s9163_s23 + $0xc0] sm:$0xff]  }
0x1040   :  { %v4459_v8 = vadd.f32 %v4452_v62, %v4318_v4  ;;  %v4319_v9 = vadd.f32 %v4314_v7, %v4176_v52  ;;  %v7550_v10 = vpop.f32.mrb[75].mxu0  ;;  %v8332_v62 = vld [vmem:[%s9163_s23 + $0x90] sm:$0xff]   ;;  %v8337_v4 = vld [vmem:[%s9163_s23 + $0xb8] sm:$0xff]  }
0x1041   :  { %v8340_v7 = vld [vmem:[%s9163_s23 + $0xd0] sm:$0xff]   ;;  %v8343_v10 = vld [vmem:[%s9163_s23 + $0xe8] sm:$0xff]  }
0x1042   :  { %v4468_v11 = vadd.f32 %v6681_v6, %v4459_v8  ;;  %v4460_v12 = vadd.f32 %v4455_v1, %v4319_v9  ;;  %v8334_v1 = vld [vmem:[%s9163_s23 + $0xa0] sm:$0xff]   ;;  %v8341_v8 = vld [vmem:[%s9163_s23 + $0xd8] sm:$0xff]  }
0x1043   :  { %v8342_v9 = vld [vmem:[%s9163_s23 + $0xe0] sm:$0xff]  }
0x1044   :  { %v4472_v13 = vmul.f32 0.01, %v4468_v11  ;;  %v4469_v14 = vadd.f32 %v6681_v6, %v4460_v12  ;;  %vm4470_vm2 = vcmp.ge.f32.partialorder %v4468_v11, 0.0  ;;  %v8339_v6 = vld [vmem:[%s9163_s23 + $0xc8] sm:$0xff]   ;;  %v8345_v12 = vld [vmem:[%s9163_s23 + $0xf8] sm:$0xff]  }
0x1046   :  { %vm4471_vm9 = vcmp.ge.f32.partialorder %v4469_v14, 0.0  ;;  %v4473_v15 = vmul.f32 0.01, %v4469_v14  ;;  %v4474_v16 = vsel %vm4470_vm2, %v4468_v11, %v4472_v13  ;;  %v8344_v11 = vld [vmem:[%s9163_s23 + $0xf0] sm:$0xff]   ;;  %v8346_v13 = vld [vmem:[%s9226_s1] sm:$0xff]  }
0x1048   :  { %v4475_v17 = vsel %vm4471_vm9, %v4469_v14, %v4473_v15  ;;  %v6730_v14 = vld [vmem:[%s6320_s9] ss:$0 sm:$0xff] }
0x1049   :  { %v4476_v18 = vpack.c.bf16 %v4475_v17, %v4474_v16 }
0x104b   :  { %7577 = vmatprep.subr.bf16.mxu0 %v4476_v18 }
0x104c   :  { %7578 = vmatpush3.bf16.msra.mxu0 %v4476_v18 }
0x104d   :  { %7583 = vmatprep.subr.bf16.mxu0 %v4476_v18 }
0x104f   :  { %7580 = vmatmul.mubr.msk.bf16.vlgmr.msra.gmra.mrb[76].mxu0 %vm1618_vm10, %v8307_v20 }
0x1050   :  { %7584 = vmatpush3.bf16.msra.mxu0 %v4476_v18  ;;  %7585 = vmatprep.mubr.msk.bf16.mxu0 %vm1618_vm10, %v8308_v21 }
0x1051   :  { %7629 = vmatprep.subr.bf16.mxu0 %v4476_v18 }
0x1057   :  { %7586 = vmatmul.mubr.msk.bf16.vlgmr.msra.gmra.mrb[80].mxu0 %vm1618_vm10, %v8309_v22 }
0x1058   :  { %7630 = vmatpush3.bf16.msra.mxu0 %v4476_v18  ;;  %7631 = vmatprep.mubr.msk.bf16.mxu0 %vm1618_vm10, %v8310_v23 }
0x1059   :  { %7655 = vmatprep.subr.bf16.mxu0 %v4476_v18 }
0x105f   :  { %7632 = vmatmul.mubr.msk.bf16.vlgmr.msra.gmra.mrb[84].mxu0 %vm1618_vm10, %v8311_v24 }
0x1060   :  { %7656 = vmatpush3.bf16.msra.mxu0 %v4476_v18  ;;  %7657 = vmatprep.mubr.msk.bf16.mxu0 %vm1618_vm10, %v8312_v25 }
0x1067   :  { %7658 = vmatmul.mubr.msk.bf16.vlgmr.msra.gmra.mrb[88].mxu0 %vm1618_vm10, %v8313_v26 }
0x1068   :  { %7685 = vmatprep.mubr.msk.bf16.mxu0 %vm978_vm7, %v8346_v13 }
0x1122   :  { %v7581_v31 = vpop.f32.mrb[76].mxu0 }
0x1123   :  { %v4607_v32 = vpop.f32.mrb[77].mxu0 }
0x1124   :  { %v7582_v33 = vpop.f32.mrb[78].mxu0 }
0x1125   :  { %v4623_v34 = vpack.c.bf16 %v7582_v33, %v7581_v31  ;;  %v4610_v35 = vpop.f32.mrb[79].mxu0 }
0x1126   :  { %v4622_v36 = vpack.c.bf16 %v4610_v35, %v4607_v32  ;;  %v8348_v35 = vld [vmem:[%s9226_s1 + $0x10] sm:$0xff]  }
0x112a   :  { %v7587_v37 = vpop.f32.mrb[80].mxu0 }
0x112b   :  { %v4674_v38 = vpop.f32.mrb[81].mxu0 }
0x112c   :  { %v7588_v39 = vpop.f32.mrb[82].mxu0 }
0x112d   :  { %v4690_v40 = vpack.c.bf16 %v7588_v39, %v7587_v37  ;;  %v4677_v41 = vpop.f32.mrb[83].mxu0  ;;  %v8349_v37 = vld [vmem:[%s9226_s1 + $0x18] sm:$0xff]   ;;  %v8351_v39 = vld [vmem:[%s9226_s1 + $0x28] sm:$0xff]  }
0x112e   :  { %v4689_v42 = vpack.c.bf16 %v4677_v41, %v4674_v38  ;;  %v8350_v38 = vld [vmem:[%s9226_s1 + $0x20] sm:$0xff]   ;;  %v8355_v41 = vld [vmem:[%s9233_s5 + $0x48] sm:$0xff]  }
0x1130   :  { %7605 = vmatprep.mubr.bf16.mxu1 %v4689_v42  ;;  %v8356_v42 = vld [vmem:[%s9233_s5 + $0x50] sm:$0xff]  }
0x1131   :  { %7606 = vmatmul.mubr.bf16.vlgmr.msra.gmra.mrb[84].mxu1 %v4690_v40  ;;  %v8352_v40 = vld [vmem:[%s9226_s1 + $0x30] sm:$0xff]  }
0x1132   :  { %7610 = vmatpush3.bf16.msra.mxu1 %v8322_v30  ;;  %7625 = vmatprep.mubr.bf16.mxu1 %v4622_v36  ;;  %v7633_v44 = vpop.f32.mrb[84].mxu0  ;;  %v8354_v36 = vld [vmem:[%s9233_s5 + $0x40] sm:$0xff]  }
0x1133   :  { %7611 = vmatprep.subr.bf16.mxu1 %v8323_v43  ;;  %v4935_v48 = vpop.f32.mrb[85].mxu0 }
0x1134   :  { %v7634_v49 = vpop.f32.mrb[86].mxu0 }
0x1135   :  { %v4951_v51 = vpack.c.bf16 %v7634_v49, %v7633_v44  ;;  %v4938_v52 = vpop.f32.mrb[87].mxu0  ;;  %v8357_v44 = vld [vmem:[%s9233_s5 + $0x58] sm:$0xff]   ;;  %v8360_v49 = vld [vmem:[%s9233_s5 + $0x70] sm:$0xff]  }
0x1136   :  { %7612 = vmatpush3.bf16.msra.mxu1 %v8323_v43  ;;  %v4950_v53 = vpack.c.bf16 %v4938_v52, %v4935_v48  ;;  %v8353_v43 = vld [vmem:[%s9226_s1 + $0x38] sm:$0xff]   ;;  %v8359_v48 = vld [vmem:[%s9233_s5 + $0x68] sm:$0xff]   ;;  %v8362_v52 = vld [vmem:[%s9233_s5] sm:$0xff]  }
0x1137   :  { %7613 = vmatprep.subr.bf16.mxu1 %v8324_v45 }
0x113a   :  { %7614 = vmatpush3.bf16.msra.mxu1 %v8324_v45  ;;  %v9194_v55 = vpop.f32.mrb[88].mxu0  ;;  %v8358_v45 = vld [vmem:[%s9233_s5 + $0x60] sm:$0xff]  }
0x113b   :  { %7615 = vmatprep.subr.bf16.mxu1 %v8325_v54  ;;  %v5103_v0 = vpop.f32.mrb[89].mxu0 }
0x113c   :  { %v9197_v56 = vpop.f32.mrb[90].mxu0 }
0x113d   :  { %v5119_v47 = vpack.c.bf16 %v9197_v56, %v9194_v55  ;;  %v5106_v19 = vpop.f32.mrb[91].mxu0  ;;  %v8376_v55 = vld [vmem:[%s9226_s1 + $0x70] sm:$0xff]  }
0x113e   :  { %7616 = vmatpush3.bf16.msra.mxu1 %v8325_v54  ;;  %v5118_v50 = vpack.c.bf16 %v5106_v19, %v5103_v0  ;;  %v8375_v54 = vld [vmem:[%s9226_s1 + $0x68] sm:$0xff]  }
0x113f   :  { %7617 = vmatprep.subr.bf16.mxu1 %v8326_v46 }
0x1142   :  { %7618 = vmatpush3.bf16.msra.mxu1 %v8326_v46  ;;  %v8377_v46 = vld [vmem:[%s9226_s1 + $0x78] sm:$0xff]  }
0x1143   :  { %7619 = vmatprep.subr.bf16.mxu1 %v8327_v57 }
0x1146   :  { %7620 = vmatpush3.bf16.msra.mxu1 %v8327_v57 }
0x1147   :  { %7621 = vmatprep.subr.bf16.mxu1 %v8328_v58 }
0x114a   :  { %7622 = vmatpush3.bf16.msra.mxu1 %v8328_v58 }
0x114b   :  { %7623 = vmatprep.subr.bf16.mxu1 %v8329_v59 }
0x114e   :  { %7624 = vmatpush3.bf16.msra.mxu1 %v8329_v59 }
0x114f   :  { %7635 = vmatprep.subr.bf16.mxu1 %v8330_v60 }
0x1151   :  { %7626 = vmatmul.mubr.bf16.vlgmr.msra.gmra.mrb[84].mxu1 %v4623_v34  ;;  %v8347_v34 = vld [vmem:[%s9226_s1 + $0x8] sm:$0xff]  }
0x1152   :  { %7636 = vmatpush3.bf16.msra.mxu1 %v8330_v60  ;;  %7651 = vmatprep.mubr.bf16.mxu1 %v4950_v53  ;;  %v8374_v53 = vld [vmem:[%s9226_s1 + $0x60] sm:$0xff]  }
0x1153   :  { %7637 = vmatprep.subr.bf16.mxu1 %v8331_v61 }
0x1156   :  { %7638 = vmatpush3.bf16.msra.mxu1 %v8331_v61 }
0x1157   :  { %7639 = vmatprep.subr.bf16.mxu1 %v8332_v62 }
0x115a   :  { %7640 = vmatpush3.bf16.msra.mxu1 %v8332_v62 }
0x115b   :  { %7641 = vmatprep.subr.bf16.mxu1 %v8333_v63 }
0x115e   :  { %7642 = vmatpush3.bf16.msra.mxu1 %v8333_v63 }
0x115f   :  { %7643 = vmatprep.subr.bf16.mxu1 %v8334_v1 }
0x1162   :  { %7644 = vmatpush3.bf16.msra.mxu1 %v8334_v1 }
0x1163   :  { %7645 = vmatprep.subr.bf16.mxu1 %v8335_v2 }
0x1166   :  { %7646 = vmatpush3.bf16.msra.mxu1 %v8335_v2 }
0x1167   :  { %7647 = vmatprep.subr.bf16.mxu1 %v8336_v3 }
0x116a   :  { %7648 = vmatpush3.bf16.msra.mxu1 %v8336_v3 }
0x116b   :  { %7649 = vmatprep.subr.bf16.mxu1 %v8337_v4 }
0x116e   :  { %7650 = vmatpush3.bf16.msra.mxu1 %v8337_v4 }
0x116f   :  { %7661 = vmatprep.subr.bf16.mxu1 %v8338_v5 }
0x1171   :  { %7652 = vmatmul.mubr.bf16.vlgmr.msra.gmra.mrb[84].mxu1 %v4951_v51  ;;  %v8361_v51 = vld [vmem:[%s9233_s5 + $0x78] sm:$0xff]  }
0x1172   :  { %7662 = vmatpush3.bf16.msra.mxu1 %v8338_v5  ;;  %7677 = vmatprep.mubr.bf16.mxu1 %v5118_v50 }
0x1173   :  { %7663 = vmatprep.subr.bf16.mxu1 %v8339_v6 }
0x1176   :  { %7664 = vmatpush3.bf16.msra.mxu1 %v8339_v6 }
0x1177   :  { %7665 = vmatprep.subr.bf16.mxu1 %v8340_v7 }
0x117a   :  { %7666 = vmatpush3.bf16.msra.mxu1 %v8340_v7  ;;  %v8363_v7 = vld [vmem:[%s9233_s5 + $0x8] sm:$0xff]  }
0x117b   :  { %7667 = vmatprep.subr.bf16.mxu1 %v8341_v8 }
0x117e   :  { %7668 = vmatpush3.bf16.msra.mxu1 %v8341_v8 }
0x117f   :  { %7669 = vmatprep.subr.bf16.mxu1 %v8342_v9 }
0x1182   :  { %7670 = vmatpush3.bf16.msra.mxu1 %v8342_v9 }
0x1183   :  { %7671 = vmatprep.subr.bf16.mxu1 %v8343_v10 }
0x1186   :  { %7672 = vmatpush3.bf16.msra.mxu1 %v8343_v10  ;;  %v8364_v10 = vld [vmem:[%s9233_s5 + $0x10] sm:$0xff]  }
0x1187   :  { %7673 = vmatprep.subr.bf16.mxu1 %v8344_v11 }
0x118a   :  { %7674 = vmatpush3.bf16.msra.mxu1 %v8344_v11 }
0x118b   :  { %7675 = vmatprep.subr.bf16.mxu1 %v8345_v12 }
0x118e   :  { %7676 = vmatpush3.bf16.msra.mxu1 %v8345_v12 }
0x1191   :  { %7678 = vmatmul.mubr.bf16.vlgmr.msra.gmra.mrb[84].mxu1 %v5119_v47 }
0x1192   :  { %7793 = vmatprep.mubr.msk.bf16.mxu1 %vm978_vm7, %v8374_v53 }
0x1264   :  { %v7679_v15 = vpop.f32.mrb[84].mxu1 }
0x1265   :  { %v5230_v16 = vadd.f32 %v7679_v15, %v6730_v14  ;;  %v5202_v17 = vpop.f32.mrb[85].mxu1  ;;  %v8365_v15 = vld [vmem:[%s9233_s5 + $0x18] sm:$0xff]  }
0x1266   :  { %v5228_v18 = vadd.f32 %v6730_v14, %v5202_v17  ;;  %v7680_v20 = vpop.f32.mrb[86].mxu1  ;;  %v8367_v17 = vld [vmem:[%s9233_s5 + $0x28] sm:$0xff]  }
0x1267   :  { %v5238_v21 = vmul.f32 0.01, %v5230_v16  ;;  %v5231_v22 = vadd.f32 %v7680_v20, %v6730_v14  ;;  %v5205_v23 = vpop.f32.mrb[87].mxu1  ;;  %vm5234_vm10 = vcmp.ge.f32.partialorder %v5230_v16, 0.0  ;;  %v8369_v20 = vld [vmem:[%s9233_s5 + $0x38] sm:$0xff]  }
0x1268   :  { %v5236_v24 = vmul.f32 0.01, %v5228_v18  ;;  %v5229_v25 = vadd.f32 %v6730_v14, %v5205_v23  ;;  %vm5232_vm11 = vcmp.ge.f32.partialorder %v5228_v18, 0.0  ;;  %v8371_v23 = vld [vmem:[%s9226_s1 + $0x48] sm:$0xff]  }
0x1269   :  { %vm5235_vm12 = vcmp.ge.f32.partialorder %v5231_v22, 0.0  ;;  %v5239_v26 = vmul.f32 0.01, %v5231_v22  ;;  %v5242_v28 = vsel %vm5234_vm10, %v5230_v16, %v5238_v21  ;;  %v8366_v16 = vld [vmem:[%s9233_s5 + $0x20] sm:$0xff]  }
0x126a   :  { %vm5233_vm13 = vcmp.ge.f32.partialorder %v5229_v25, 0.0  ;;  %v5237_v27 = vmul.f32 0.01, %v5229_v25  ;;  %v5240_v30 = vsel %vm5232_vm11, %v5228_v18, %v5236_v24  ;;  %v8368_v18 = vld [vmem:[%s9233_s5 + $0x30] sm:$0xff]   ;;  %v8378_v21 = vld [vmem:[%s9233_s5 + $0x80] sm:$0xff]  }
0x126b   :  { %v5243_v29 = vsel %vm5235_vm12, %v5231_v22, %v5239_v26  ;;  %v8370_v22 = vld [vmem:[%s9226_s1 + $0x40] sm:$0xff]   ;;  %v8372_v24 = vld [vmem:[%s9226_s1 + $0x50] sm:$0xff]  }
0x126c   :  { %v9238_v31 = vpack.c.bf16 %v5243_v29, %v5242_v28  ;;  %v5241_v32 = vsel %vm5233_vm13, %v5229_v25, %v5237_v27  ;;  %v8379_v25 = vld [vmem:[%s9233_s5 + $0x88] sm:$0xff]   ;;  %v8380_v26 = vld [vmem:[%s9233_s5 + $0x90] sm:$0xff]   ;;  %v8373_v27 = vld [vmem:[%s9226_s1 + $0x58] sm:$0xff]  }
0x126d   :  { %v9240_v33 = vpack.c.bf16 %v5241_v32, %v5240_v30  ;;  %v8381_v28 = vld [vmem:[%s9233_s5 + $0x98] sm:$0xff]   ;;  %v8382_v29 = vld [vmem:[%s9233_s5 + $0xa0] sm:$0xff]   ;;  %v8383_v30 = vld [vmem:[%s9233_s5 + $0xa8] sm:$0xff]  }
0x126e   :  { %v8385_v32 = vld [vmem:[%s9233_s5 + $0xb8] sm:$0xff]  }
0x126f   :  { %7681 = vmatprep.subr.bf16.mxu0 %v9240_v33  ;;  %7789 = vmatprep.subr.bf16.mxu1 %v9240_v33 }
0x1270   :  { %7682 = vmatpush3.bf16.msra.mxu0 %v9240_v33  ;;  %7790 = vmatpush3.bf16.msra.mxu1 %v9240_v33 }
0x1271   :  { %7683 = vmatprep.subr.bf16.mxu0 %v9238_v31  ;;  %7791 = vmatprep.subr.bf16.mxu1 %v9238_v31 }
0x1274   :  { %7684 = vmatpush3.bf16.msra.mxu0 %v9238_v31  ;;  %7792 = vmatpush3.bf16.msra.mxu1 %v9238_v31 }
0x1275   :  { %7693 = vmatprep.subr.bf16.mxu0 %v9240_v33 }
0x1277   :  { %7686 = vmatmul.mubr.msk.bf16.vlgmr.msra.gmra.mrb[92].mxu0 %vm978_vm7, %v8347_v34  ;;  %7794 = vmatmul.mubr.msk.bf16.vlgmr.msra.gmra.mrb[88].mxu1 %vm978_vm7, %v8375_v54 }
0x1278   :  { %7694 = vmatpush3.bf16.msra.mxu0 %v9240_v33  ;;  %7689 = vmatprep.mubr.msk.bf16.mxu0 %vm978_vm7, %v8348_v35 }
0x1279   :  { %7695 = vmatprep.subr.bf16.mxu0 %v9238_v31  ;;  %7797 = vmatprep.mubr.msk.bf16.mxu1 %vm978_vm7, %v8376_v55  ;;  %v8387_v55 = vld [vmem:[%s9233_s5 + $0xc8] sm:$0xff]  }
0x127c   :  { %7696 = vmatpush3.bf16.msra.mxu0 %v9238_v31 }
0x127d   :  { %7705 = vmatprep.subr.bf16.mxu0 %v8354_v36 }
0x127f   :  { %7690 = vmatmul.mubr.msk.bf16.gmra.mrb[96].mxu0 %vm978_vm7, %v8349_v37  ;;  %7798 = vmatmul.mubr.msk.bf16.gmra.mrb[92].mxu1 %vm978_vm7, %v8377_v46 }
0x1280   :  { %7697 = vmatprep.mubr.msk.bf16.mxu0 %vm978_vm7, %v8350_v38 }
0x1287   :  { %7698 = vmatmul.mubr.msk.bf16.vlgmr.msra.gmra.mrb[100].mxu0 %vm978_vm7, %v8351_v39 }
0x1288   :  { %7701 = vmatprep.mubr.msk.bf16.mxu0 %vm978_vm7, %v8352_v40  ;;  %7706 = vmatpush3.bf16.msra.mxu0 %v8354_v36 }
0x1289   :  { %7707 = vmatprep.subr.bf16.mxu0 %v8355_v41 }
0x128c   :  { %7708 = vmatpush3.bf16.msra.mxu0 %v8355_v41 }
0x128d   :  { %7709 = vmatprep.subr.bf16.mxu0 %v8356_v42 }
0x128f   :  { %7702 = vmatmul.mubr.msk.bf16.gmra.mrb[104].mxu0 %vm978_vm7, %v8353_v43 }
0x1290   :  { %7710 = vmatpush3.bf16.msra.mxu0 %v8356_v42 }
0x1291   :  { %7711 = vmatprep.subr.bf16.mxu0 %v8357_v44 }
0x1294   :  { %7712 = vmatpush3.bf16.msra.mxu0 %v8357_v44 }
0x1295   :  { %7713 = vmatprep.subr.bf16.mxu0 %v8358_v45 }
0x1298   :  { %7714 = vmatpush3.bf16.msra.mxu0 %v8358_v45 }
0x1299   :  { %7715 = vmatprep.subr.bf16.mxu0 %v8359_v48 }
0x129c   :  { %7716 = vmatpush3.bf16.msra.mxu0 %v8359_v48 }
0x129d   :  { %7717 = vmatprep.subr.bf16.mxu0 %v8360_v49 }
0x12a0   :  { %7718 = vmatpush3.bf16.msra.mxu0 %v8360_v49 }
0x12a1   :  { %7719 = vmatprep.subr.bf16.mxu0 %v8361_v51 }
0x12a4   :  { %7720 = vmatpush3.bf16.msra.mxu0 %v8361_v51 }
0x12a5   :  { %7729 = vmatprep.subr.bf16.mxu0 %v8362_v52 }
0x134a   :  { %v7687_v0 = vpop.f32.mrb[92].mxu0  ;;  %v7795_v34 = vpop.f32.mrb[88].mxu1 }
0x134b   :  { %v5408_v56 = vpop.f32.mrb[93].mxu0  ;;  %v6058_v35 = vpop.f32.mrb[89].mxu1 }
0x134c   :  { %v7688_v47 = vpop.f32.mrb[94].mxu0  ;;  %v7796_v36 = vpop.f32.mrb[90].mxu1 }
0x134d   :  { %v5440_v19 = vpack.c.bf16 %v7688_v47, %v7687_v0  ;;  %v5411_v50 = vpop.f32.mrb[95].mxu0  ;;  %v6090_v37 = vpack.c.bf16 %v7796_v36, %v7795_v34  ;;  %v6061_v38 = vpop.f32.mrb[91].mxu1  ;;  %v8388_v0 = vld [vmem:[%s9233_s5 + $0xd0] sm:$0xff]  }
0x134e   :  { %v5439_v57 = vpack.c.bf16 %v5411_v50, %v5408_v56  ;;  %v6089_v39 = vpack.c.bf16 %v6061_v38, %v6058_v35 }
0x1352   :  { %v7691_v58 = vpop.f32.mrb[96].mxu0  ;;  %v7799_v40 = vpop.f32.mrb[92].mxu1 }
0x1353   :  { %v5424_v59 = vpop.f32.mrb[97].mxu0  ;;  %v6074_v41 = vpop.f32.mrb[93].mxu1 }
0x1354   :  { %v7692_v60 = vpop.f32.mrb[98].mxu0  ;;  %v7800_v42 = vpop.f32.mrb[94].mxu1 }
0x1355   :  { %v5442_v61 = vpack.c.bf16 %v7692_v60, %v7691_v58  ;;  %v5427_v62 = vpop.f32.mrb[99].mxu0  ;;  %v6092_v43 = vpack.c.bf16 %v7800_v42, %v7799_v40  ;;  %v6077_v44 = vpop.f32.mrb[95].mxu1  ;;  %v8389_v58 = vld [vmem:[%s9233_s5 + $0xd8] sm:$0xff]   ;;  %v8391_v60 = vld [vmem:[%s9233_s5 + $0xe8] sm:$0xff]  }
0x1356   :  { %v5441_v63 = vpack.c.bf16 %v5427_v62, %v5424_v59  ;;  %v6091_v45 = vpack.c.bf16 %v6077_v44, %v6074_v41  ;;  %v8390_v59 = vld [vmem:[%s9233_s5 + $0xe0] sm:$0xff]   ;;  %v8393_v62 = vld [vmem:[%s9233_s5 + $0xf8] sm:$0xff]  }
0x135a   :  { %v7699_v1 = vpop.f32.mrb[100].mxu0 }
0x135b   :  { %v5509_v2 = vpop.f32.mrb[101].mxu0 }
0x135c   :  { %v7700_v3 = vpop.f32.mrb[102].mxu0 }
0x135d   :  { %v5541_v4 = vpack.c.bf16 %v7700_v3, %v7699_v1  ;;  %v5512_v5 = vpop.f32.mrb[103].mxu0 }
0x135e   :  { %v5540_v6 = vpack.c.bf16 %v5512_v5, %v5509_v2 }
0x1360   :  { %7721 = vmatprep.mubr.bf16.mxu0 %v5540_v6 }
0x1361   :  { %7722 = vmatmul.mubr.bf16.vlgmr.msra.gmra.mrb[108].mxu0 %v5541_v4 }
0x1362   :  { %7730 = vmatpush3.bf16.msra.mxu0 %v8362_v52  ;;  %v7703_v8 = vpop.f32.mrb[104].mxu0 }
0x1363   :  { %v5525_v9 = vpop.f32.mrb[105].mxu0  ;;  %7731 = vmatprep.subr.bf16.mxu0 %v8363_v7 }
0x1364   :  { %v7704_v11 = vpop.f32.mrb[106].mxu0 }
0x1365   :  { %v5543_v12 = vpack.c.bf16 %v7704_v11, %v7703_v8  ;;  %v5528_v13 = vpop.f32.mrb[107].mxu0 }
0x1366   :  { %v5542_v14 = vpack.c.bf16 %v5528_v13, %v5525_v9  ;;  %7732 = vmatpush3.bf16.msra.mxu0 %v8363_v7 }
0x1367   :  { %7733 = vmatprep.subr.bf16.mxu0 %v8364_v10 }
0x1368   :  { %7725 = vmatprep.mubr.bf16.mxu0 %v5542_v14 }
0x1369   :  { %7726 = vmatmul.mubr.bf16.gmra.mrb[112].mxu0 %v5543_v12 }
0x136a   :  { %7734 = vmatpush3.bf16.msra.mxu0 %v8364_v10  ;;  %7745 = vmatprep.mubr.bf16.mxu0 %v5439_v57 }
0x136b   :  { %7735 = vmatprep.subr.bf16.mxu0 %v8365_v15 }
0x136e   :  { %7736 = vmatpush3.bf16.msra.mxu0 %v8365_v15 }
0x136f   :  { %7737 = vmatprep.subr.bf16.mxu0 %v8366_v16 }
0x1372   :  { %7738 = vmatpush3.bf16.msra.mxu0 %v8366_v16 }
0x1373   :  { %7739 = vmatprep.subr.bf16.mxu0 %v8367_v17 }
0x1376   :  { %7740 = vmatpush3.bf16.msra.mxu0 %v8367_v17 }
0x1377   :  { %7741 = vmatprep.subr.bf16.mxu0 %v8368_v18 }
0x137a   :  { %7742 = vmatpush3.bf16.msra.mxu0 %v8368_v18 }
0x137b   :  { %7743 = vmatprep.subr.bf16.mxu0 %v8369_v20 }
0x137e   :  { %7744 = vmatpush3.bf16.msra.mxu0 %v8369_v20 }
0x137f   :  { %7753 = vmatprep.subr.bf16.mxu0 %v9240_v33 }
0x1381   :  { %7746 = vmatmul.mubr.bf16.vlgmr.msra.gmra.mrb[108].mxu0 %v5440_v19 }
0x1382   :  { %7749 = vmatprep.mubr.bf16.mxu0 %v5441_v63  ;;  %7754 = vmatpush3.bf16.msra.mxu0 %v9240_v33  ;;  %v8386_v33 = vld [vmem:[%s9233_s5 + $0xc0] sm:$0xff]  }
0x1383   :  { %7755 = vmatprep.subr.bf16.mxu0 %v9238_v31  ;;  %v6795_v63 = vld [vmem:[%s6323_s13] ss:$0 sm:$0xff] }
0x1386   :  { %7756 = vmatpush3.bf16.msra.mxu0 %v9238_v31  ;;  %v8384_v31 = vld [vmem:[%s9233_s5 + $0xb0] sm:$0xff]  }
0x1387   :  { %7765 = vmatprep.subr.bf16.mxu0 %v8378_v21 }
0x1389   :  { %7750 = vmatmul.mubr.bf16.gmra.mrb[112].mxu0 %v5442_v61  ;;  %v8392_v61 = vld [vmem:[%s9233_s5 + $0xf0] sm:$0xff]  }
0x138a   :  { %7757 = vmatprep.mubr.msk.bf16.mxu0 %vm978_vm7, %v8370_v22 }
0x1391   :  { %7758 = vmatmul.mubr.msk.bf16.vlgmr.msra.gmra.mrb[116].mxu0 %vm978_vm7, %v8371_v23 }
0x1392   :  { %7761 = vmatprep.mubr.msk.bf16.mxu0 %vm978_vm7, %v8372_v24  ;;  %7766 = vmatpush3.bf16.msra.mxu0 %v8378_v21 }
0x1393   :  { %7767 = vmatprep.subr.bf16.mxu0 %v8379_v25 }
0x1396   :  { %7768 = vmatpush3.bf16.msra.mxu0 %v8379_v25 }
0x1397   :  { %7769 = vmatprep.subr.bf16.mxu0 %v8380_v26 }
0x1399   :  { %7762 = vmatmul.mubr.msk.bf16.gmra.mrb[120].mxu0 %vm978_vm7, %v8373_v27 }
0x139a   :  { %7770 = vmatpush3.bf16.msra.mxu0 %v8380_v26 }
0x139b   :  { %7771 = vmatprep.subr.bf16.mxu0 %v8381_v28 }
0x139e   :  { %7772 = vmatpush3.bf16.msra.mxu0 %v8381_v28 }
0x139f   :  { %7773 = vmatprep.subr.bf16.mxu0 %v8382_v29 }
0x13a2   :  { %7774 = vmatpush3.bf16.msra.mxu0 %v8382_v29 }
0x13a3   :  { %7775 = vmatprep.subr.bf16.mxu0 %v8383_v30 }
0x13a6   :  { %7776 = vmatpush3.bf16.msra.mxu0 %v8383_v30 }
0x13a7   :  { %7777 = vmatprep.subr.bf16.mxu0 %v8384_v31 }
0x13aa   :  { %7778 = vmatpush3.bf16.msra.mxu0 %v8384_v31 }
0x13ab   :  { %7779 = vmatprep.subr.bf16.mxu0 %v8385_v32 }
0x13ae   :  { %7780 = vmatpush3.bf16.msra.mxu0 %v8385_v32 }
0x13af   :  { %7801 = vmatprep.subr.bf16.mxu0 %v8386_v33 }
0x1464   :  { %v7759_v48 = vpop.f32.mrb[116].mxu0 }
0x1465   :  { %v5836_v49 = vpop.f32.mrb[117].mxu0 }
0x1466   :  { %v7760_v51 = vpop.f32.mrb[118].mxu0 }
0x1467   :  { %v5868_v52 = vpack.c.bf16 %v7760_v51, %v7759_v48  ;;  %v5839_v53 = vpop.f32.mrb[119].mxu0 }
0x1468   :  { %v5867_v54 = vpack.c.bf16 %v5839_v53, %v5836_v49 }
0x146a   :  { %7781 = vmatprep.mubr.bf16.mxu0 %v5867_v54 }
0x146b   :  { %7782 = vmatmul.mubr.bf16.vlgmr.msra.gmra.mrb[108].mxu0 %v5868_v52 }
0x146c   :  { %7802 = vmatpush3.bf16.msra.mxu0 %v8386_v33  ;;  %v7763_v46 = vpop.f32.mrb[120].mxu0 }
0x146d   :  { %7803 = vmatprep.subr.bf16.mxu0 %v8387_v55  ;;  %v5852_v56 = vpop.f32.mrb[121].mxu0 }
0x146e   :  { %v7764_v47 = vpop.f32.mrb[122].mxu0 }
0x146f   :  { %v5870_v19 = vpack.c.bf16 %v7764_v47, %v7763_v46  ;;  %v5855_v50 = vpop.f32.mrb[123].mxu0 }
0x1470   :  { %7804 = vmatpush3.bf16.msra.mxu0 %v8387_v55  ;;  %v5869_v57 = vpack.c.bf16 %v5855_v50, %v5852_v56 }
0x1471   :  { %7805 = vmatprep.subr.bf16.mxu0 %v8388_v0 }
0x1472   :  { %7785 = vmatprep.mubr.bf16.mxu0 %v5869_v57 }
0x1473   :  { %7786 = vmatmul.mubr.bf16.gmra.mrb[112].mxu0 %v5870_v19 }
0x1474   :  { %7806 = vmatpush3.bf16.msra.mxu0 %v8388_v0  ;;  %7817 = vmatprep.mubr.bf16.mxu0 %v6089_v39 }
0x1475   :  { %7807 = vmatprep.subr.bf16.mxu0 %v8389_v58 }
0x1478   :  { %7808 = vmatpush3.bf16.msra.mxu0 %v8389_v58 }
0x1479   :  { %7809 = vmatprep.subr.bf16.mxu0 %v8390_v59 }
0x147c   :  { %7810 = vmatpush3.bf16.msra.mxu0 %v8390_v59 }
0x147d   :  { %7811 = vmatprep.subr.bf16.mxu0 %v8391_v60 }
0x1480   :  { %7812 = vmatpush3.bf16.msra.mxu0 %v8391_v60 }
0x1481   :  { %7813 = vmatprep.subr.bf16.mxu0 %v8392_v61 }
0x1484   :  { %7814 = vmatpush3.bf16.msra.mxu0 %v8392_v61 }
0x1485   :  { %7815 = vmatprep.subr.bf16.mxu0 %v8393_v62 }
0x1488   :  { %7816 = vmatpush3.bf16.msra.mxu0 %v8393_v62 }
0x148b   :  { %7818 = vmatmul.mubr.bf16.vlgmr.msra.gmra.mrb[108].mxu0 %v6090_v37 }
0x148c   :  { %7821 = vmatprep.mubr.bf16.mxu0 %v6091_v45 }
0x1493   :  { %7822 = vmatmul.mubr.bf16.gmra.mrb[112].mxu0 %v6092_v43 }
0x155e   :  { %v7819_v1 = vpop.f32.mrb[108].mxu0 }
0x155f   :  { %v6223_v2 = vadd.f32 %v7819_v1, %v6795_v63  ;;  %v6175_v3 = vpop.f32.mrb[109].mxu0 }
0x1560   :  { %v6221_v4 = vadd.f32 %v6795_v63, %v6175_v3  ;;  %v7820_v5 = vpop.f32.mrb[110].mxu0 }
0x1561   :  { %v6231_v6 = vsub.f32 0.0, %v6223_v2  ;;  %v6224_v7 = vadd.f32 %v7820_v5, %v6795_v63  ;;  %v6178_v8 = vpop.f32.mrb[111].mxu0 }
0x1562   :  { %v6229_v9 = vsub.f32 0.0, %v6221_v4  ;;  %v6222_v10 = vadd.f32 %v6795_v63, %v6178_v8 }
0x1563   :  { %v6241_v11 = vmul.f32 1.442695, %v6231_v6  ;;  %v6232_v12 = vsub.f32 0.0, %v6224_v7 }
0x1564   :  { %v6237_v13 = vmul.f32 1.442695, %v6229_v9  ;;  %v6230_v14 = vsub.f32 0.0, %v6222_v10 }
0x1565   :  { %8396 = vpow2.f32 %v6241_v11  ;;  %v6243_v15 = vmul.f32 1.442695, %v6232_v12 }
0x1566   :  { %8398 = vpow2.f32 %v6237_v13  ;;  %v6239_v16 = vmul.f32 1.442695, %v6230_v14  ;;  %v7823_v17 = vpop.f32.mrb[112].mxu0 }
0x1567   :  { %8400 = vpow2.f32 %v6243_v15  ;;  %v6227_v18 = vadd.f32 %v7823_v17, %v6795_v63  ;;  %v6191_v20 = vpop.f32.mrb[113].mxu0 }
0x1568   :  { %8402 = vpow2.f32 %v6239_v16  ;;  %v6225_v21 = vadd.f32 %v6795_v63, %v6191_v20  ;;  %v7824_v22 = vpop.f32.mrb[114].mxu0 }
0x1569   :  { %v6235_v23 = vsub.f32 0.0, %v6227_v18  ;;  %v6228_v24 = vadd.f32 %v7824_v22, %v6795_v63  ;;  %v6194_v25 = vpop.f32.mrb[115].mxu0 }
0x156a   :  { %v6233_v26 = vsub.f32 0.0, %v6225_v21  ;;  %v6226_v27 = vadd.f32 %v6795_v63, %v6194_v25 }
0x156b   :  { %v6249_v28 = vmul.f32 1.442695, %v6235_v23  ;;  %v6236_v29 = vsub.f32 0.0, %v6228_v24 }
0x156c   :  { %v6245_v30 = vmul.f32 1.442695, %v6233_v26  ;;  %v6234_v31 = vsub.f32 0.0, %v6226_v27 }
0x156d   :  { %8404 = vpow2.f32 %v6249_v28  ;;  %v6251_v32 = vmul.f32 1.442695, %v6236_v29 }
0x156e   :  { %8406 = vpow2.f32 %v6245_v30  ;;  %v6247_v33 = vmul.f32 1.442695, %v6234_v31 }
0x156f   :  { %v8397_v34 = vpop.eup %8396  ;;  %8408 = vpow2.f32 %v6251_v32 }
0x1570   :  { %v8399_v35 = vpop.eup %8398  ;;  %v6255_v36 = vadd.f32 1.0, %v8397_v34  ;;  %8410 = vpow2.f32 %v6247_v33 }
0x1571   :  { %v8401_v37 = vpop.eup %8400  ;;  %v6253_v38 = vadd.f32 1.0, %v8399_v35 }
0x1572   :  { %v8403_v39 = vpop.eup %8402  ;;  %8412 = vrcp.f32 %v6255_v36  ;;  %v6256_v40 = vadd.f32 1.0, %v8401_v37 }
0x1573   :  { %8414 = vrcp.f32 %v6253_v38  ;;  %v6254_v41 = vadd.f32 1.0, %v8403_v39 }
0x1574   :  { %8416 = vrcp.f32 %v6256_v40 }
0x1575   :  { %8418 = vrcp.f32 %v6254_v41 }
0x1577   :  { %v8405_v42 = vpop.eup %8404 }
0x1578   :  { %v8407_v43 = vpop.eup %8406  ;;  %v6259_v44 = vadd.f32 1.0, %v8405_v42 }
0x1579   :  { %v8409_v45 = vpop.eup %8408  ;;  %v6257_v48 = vadd.f32 1.0, %v8407_v43 }
0x157a   :  { %v8411_v49 = vpop.eup %8410  ;;  %8420 = vrcp.f32 %v6259_v44  ;;  %v6260_v51 = vadd.f32 1.0, %v8409_v45 }
0x157b   :  { %8422 = vrcp.f32 %v6257_v48  ;;  %v6258_v52 = vadd.f32 1.0, %v8411_v49 }
0x157c   :  { %v8413_v53 = vpop.eup %8412  ;;  %8424 = vrcp.f32 %v6260_v51 }
0x157d   :  { %v8415_v54 = vpop.eup %8414  ;;  %6279 = vst.msk [vmem:[%s6325_s17 + $0x10] sm:$0xff] %vm405_vm1, %v8413_v53  ;;  %8426 = vrcp.f32 %v6258_v52 }
0x157e   :  { %v8417_v55 = vpop.eup %8416  ;;  %6277 = vst.msk [vmem:[%s6325_s17] sm:$0xff] %vm405_vm1, %v8415_v54 }
0x157f   :  { %v8419_v46 = vpop.eup %8418  ;;  %6280 = vst.msk [vmem:[%s6325_s17 + $0x18] sm:$0xff] %vm405_vm1, %v8417_v55 }
0x1580   :  { %6278 = vst.msk [vmem:[%s6325_s17 + $0x8] sm:$0xff] %vm405_vm1, %v8419_v46 }
0x1584   :  { %v8421_v0 = vpop.eup %8420 }
0x1585   :  { %v8423_v56 = vpop.eup %8422  ;;  %6283 = vst.msk [vmem:[%s6325_s17 + $0x30] sm:$0xff] %vm405_vm1, %v8421_v0 }
0x1586   :  { %v8425_v47 = vpop.eup %8424  ;;  %6281 = vst.msk [vmem:[%s6325_s17 + $0x20] sm:$0xff] %vm405_vm1, %v8423_v56 }
0x1587   :  { %v8427_v19 = vpop.eup %8426  ;;  %6284 = vst.msk [vmem:[%s6325_s17 + $0x38] sm:$0xff] %vm405_vm1, %v8425_v47 }
0x1588   :  { %6282 = vst.msk [vmem:[%s6325_s17 + $0x28] sm:$0xff] %vm405_vm1, %v8427_v19 }

</bundles_post_ra>
